<compile_context>
chip_gen: v5e
topology: v5e:2x2
jax: 0.10.0
libtpu: 0.0.40
codegen_flags: <defaults>
</compile_context>

<pallas_src>
import functools

import jax
import jax.numpy as jnp
from jax.experimental import pallas as pl
from jax.experimental.pallas import tpu as pltpu

MNIST_SIZE = 28 * 28      # 784
MN_P = 896                # 784 padded up to 7 * 128 lanes
LAT_P = 128               # latent path padded to one full vreg of lanes


def _round_up(x, m):
    return ((x + m - 1) // m) * m


def _vae_kernel(x_ref, z_ref,
                w1e_ref, b1e_ref, w2e_ref, b2e_ref,
                w1d_ref, b1d_ref, w2d_ref, b2d_ref,
                ml_ref, out_ref):
    """One batch tile of the full VAE forward. Weights are VMEM-resident."""
    # ---- Encoder fc1: (tb, 896) x (896, HE_P), bf16 operands, f32 accum ----
    x = x_ref[...].astype(jnp.bfloat16)
    h_e = jnp.dot(x, w1e_ref[...],
                  preferred_element_type=jnp.float32) + b1e_ref[...]
    h_e = jnp.maximum(h_e, 0.0)                                # relu (f32)

    # ---- Encoder fc2 head: f32 (tiny, feeds exp); columns laid out as
    # [mean | pad | logvar | pad] so mean = lanes [0,128), logvar = [128,256).
    enc = jnp.dot(h_e, w2e_ref[...],
                  preferred_element_type=jnp.float32) + b2e_ref[...]
    ml_ref[...] = enc                                          # packed (mean|logvar), f32

    mean = enc[:, :LAT_P]                                      # full-vreg column slice
    logvar = enc[:, LAT_P:]

    # ---- Reparameterization (f32): latent = mean + z * exp(0.5 * logvar) ----
    # Padded lanes: mean = 0, z = 0 -> latent = 0 regardless of exp(0)=1.
    latent = mean + z_ref[...] * jnp.exp(0.5 * logvar)

    # ---- Decoder ----
    h_d = jnp.dot(latent.astype(jnp.bfloat16), w1d_ref[...],
                  preferred_element_type=jnp.float32) + b1d_ref[...]
    h_d = jnp.maximum(h_d, 0.0)                                # relu (f32)
    logits = jnp.dot(h_d.astype(jnp.bfloat16), w2d_ref[...],
                     preferred_element_type=jnp.float32) + b2d_ref[...]
    # sigmoid(x) == 0.5 * (tanh(0.5 * x) + 1): single EUP transcendental.
    out_ref[...] = (0.5 * (jnp.tanh(0.5 * logits) + 1.0)).astype(out_ref.dtype)


@functools.partial(jax.jit, static_argnames=("latent_size", "tile_b"))
def vae_forward(x_img, params, z, *, latent_size, tile_b=512):
    """x_img: (B, 28, 28) f32; z: (B, latent) f32 reparam noise.
    Returns (mean f32, logvar f32, out bf16 (B, 28, 28))."""
    B = x_img.shape[0]
    L = latent_size
    assert L <= LAT_P, "latent_size > 128 needs a wider latent lane layout"

    (w1e, b1e, w2e, b2e, w1d, b1d, w2d, b2d) = params
    HE, HD = w1e.shape[1], w1d.shape[1]
    HE_P, HD_P = _round_up(HE, 128), _round_up(HD, 128)

    # ---- Weight prep: zero-pad to lane-dense shapes (exact semantics). ----
    # Encoder fc1: K 784->896, N HE->HE_P; bf16 MXU operand.
    w1e_p = jnp.pad(w1e, ((0, MN_P - MNIST_SIZE), (0, HE_P - HE))).astype(jnp.bfloat16)
    b1e_p = jnp.pad(b1e, ((0, 0), (0, HE_P - HE)))
    # Encoder fc2 head: keep f32; mean cols -> lanes [0,L), logvar -> [128,128+L).
    w2e_p = jnp.zeros((HE_P, 2 * LAT_P), jnp.float32)
    w2e_p = w2e_p.at[:HE, :L].set(w2e[:, :L])
    w2e_p = w2e_p.at[:HE, LAT_P:LAT_P + L].set(w2e[:, L:])
    b2e_p = jnp.zeros((1, 2 * LAT_P), jnp.float32)
    b2e_p = b2e_p.at[:, :L].set(b2e[:, :L])
    b2e_p = b2e_p.at[:, LAT_P:LAT_P + L].set(b2e[:, L:])
    # Decoder fc1: K L->128, N HD->HD_P.
    w1d_p = jnp.pad(w1d, ((0, LAT_P - L), (0, HD_P - HD))).astype(jnp.bfloat16)
    b1d_p = jnp.pad(b1d, ((0, 0), (0, HD_P - HD)))
    # Decoder fc2: K HD->HD_P, N 784->896.
    w2d_p = jnp.pad(w2d, ((0, HD_P - HD), (0, MN_P - MNIST_SIZE))).astype(jnp.bfloat16)
    b2d_p = jnp.pad(b2d, ((0, 0), (0, MN_P - MNIST_SIZE)))
    weights = (w1e_p, b1e_p, w2e_p, b2e_p, w1d_p, b1d_p, w2d_p, b2d_p)

    # ---- Batch tiling (sublane-aligned, multiple of 16 for the bf16 x cast).
    # If the whole batch fits in one tile but is big enough, split into two
    # grid steps so v7x's second TensorCore has work.
    tb = min(tile_b, _round_up(B, 16))
    if tb == _round_up(B, 16) and B >= 32:
        tb = max(16, _round_up(-(-B // 2), 16))
    Bp = _round_up(B, tb)
    grid = (Bp // tb,)

    # ---- Input prep: pad batch + lanes. ----
    x = jnp.pad(x_img.reshape(B, MNIST_SIZE),
                ((0, Bp - B), (0, MN_P - MNIST_SIZE)))
    z_p = jnp.pad(z, ((0, Bp - B), (0, LAT_P - L)))

    def tiled(lanes):
        return pl.BlockSpec((tb, lanes), lambda i: (i, 0))

    def resident(arr):
        # Constant index_map + single buffer: DMA'd once, stays in VMEM.
        return pl.BlockSpec(arr.shape, lambda i: (0, 0),
                            pipeline_mode=pl.Buffered(1))

    flops = 2 * Bp * (MN_P * HE_P + HE_P * 2 * LAT_P + LAT_P * HD_P + HD_P * MN_P)
    bytes_w = sum(int(a.size) * a.dtype.itemsize for a in weights)
    bytes_io = (int(x.size) + int(z_p.size)) * 4 + Bp * (2 * LAT_P * 4 + MN_P * 2)
    cost = pl.CostEstimate(flops=flops,
                           transcendentals=Bp * (LAT_P + MN_P),
                           bytes_accessed=bytes_w + bytes_io)

    ml, out_flat = pl.pallas_call(
        _vae_kernel,
        out_shape=(
            jax.ShapeDtypeStruct((Bp, 2 * LAT_P), jnp.float32),   # packed mean|logvar
            jax.ShapeDtypeStruct((Bp, MN_P), jnp.bfloat16),        # reconstruction
        ),
        grid=grid,
        in_specs=[tiled(MN_P), tiled(LAT_P)] + [resident(a) for a in weights],
        out_specs=(
            pl.BlockSpec((tb, 2 * LAT_P), lambda i: (i, 0)),
            pl.BlockSpec((tb, MN_P), lambda i: (i, 0)),
        ),
        compiler_params=pltpu.CompilerParams(
            dimension_semantics=("parallel",),
            vmem_limit_bytes=64 << 20),
        cost_estimate=cost,
    )(x, z_p, *weights)

    mean = ml[:B, :L]
    logvar = ml[:B, LAT_P:LAT_P + L]
    out = out_flat[:B, :MNIST_SIZE].reshape(B, 28, 28)   # bf16 by design
    return mean, logvar, out


def init_params(key, latent_size):
    """PyTorch-style uniform(-1/sqrt(fan_in), 1/sqrt(fan_in)) init.
    Weights stored as (in_features, out_features) (= PyTorch weight.T);
    biases as (1, out_features). All f32 (bf16 cast happens in the wrapper)."""
    hidden_e = (MNIST_SIZE + latent_size * 2) // 2
    hidden_d = (latent_size + MNIST_SIZE) // 2

    def linear(k, fan_in, fan_out):
        kw, kb = jax.random.split(k)
        bound = 1.0 / jnp.sqrt(fan_in)
        w = jax.random.uniform(kw, (fan_in, fan_out), jnp.float32, -bound, bound)
        b = jax.random.uniform(kb, (1, fan_out), jnp.float32, -bound, bound)
        return w, b

    k1, k2, k3, k4 = jax.random.split(key, 4)
    w1e, b1e = linear(k1, MNIST_SIZE, hidden_e)          # encoder.fc1
    w2e, b2e = linear(k2, hidden_e, latent_size * 2)     # encoder.fc2 (cols = [mean | logvar])
    w1d, b1d = linear(k3, latent_size, hidden_d)         # decoder.fc1
    w2d, b2d = linear(k4, hidden_d, MNIST_SIZE)          # decoder.fc2
    return (w1e, b1e, w2e, b2e, w1d, b1d, w2d, b2d)


if __name__ == "__main__":
    latent_size = 8
    batch = 2

    key = jax.random.PRNGKey(0)
    k_params, k_x, k_z = jax.random.split(key, 3)

    params = init_params(k_params, latent_size)
    x_img = jax.random.uniform(k_x, (batch, 28, 28), jnp.float32)     # "MNIST" images
    # Reparameterization noise (torch.randn_like(mean)); drawn deterministically here.
    z = jax.random.normal(k_z, (batch, latent_size), jnp.float32)

    mean, logvar, out = vae_forward(x_img, params, z, latent_size=latent_size)
    jax.block_until_ready((mean, logvar, out))

    # Pure-JAX f32 reference of the same math (kernel uses bf16 matmul operands
    # for the big matmuls + bf16 output, hence the relaxed tolerance).
    w1e, b1e, w2e, b2e, w1d, b1d, w2d, b2d = params
    xf = x_img.reshape(batch, MNIST_SIZE)
    h = jnp.maximum(xf @ w1e + b1e, 0.0)
    enc = h @ w2e + b2e
    mean_ref, logvar_ref = enc[:, :latent_size], enc[:, latent_size:]
    latent = mean_ref + z * jnp.exp(0.5 * logvar_ref)
    hd = jnp.maximum(latent @ w1d + b1d, 0.0)
    out_ref = jax.nn.sigmoid(hd @ w2d + b2d).reshape(batch, 28, 28)

    assert jnp.allclose(mean, mean_ref, atol=3e-2), float(jnp.max(jnp.abs(mean - mean_ref)))
    assert jnp.allclose(logvar, logvar_ref, atol=3e-2), float(jnp.max(jnp.abs(logvar - logvar_ref)))
    assert jnp.allclose(out.astype(jnp.float32), out_ref, atol=3e-2), \
        float(jnp.max(jnp.abs(out.astype(jnp.float32) - out_ref)))
    assert mean.shape == (batch, latent_size)
    assert logvar.shape == (batch, latent_size)
    assert out.shape == (batch, 28, 28)

    print("KERNEL_OK")
</pallas_src>

<mosaic_0001>
module attributes {stable_mosaic.version = 11 : i64} {
  func.func @_vae_kernel(%arg0: i32, %arg1: memref<16x896xf32, #tpu.memory_space<vmem>>, %arg2: memref<16x128xf32, #tpu.memory_space<vmem>>, %arg3: memref<896x512xbf16, #tpu.memory_space<vmem>>, %arg4: memref<1x512xf32, #tpu.memory_space<vmem>>, %arg5: memref<512x256xf32, #tpu.memory_space<vmem>>, %arg6: memref<1x256xf32, #tpu.memory_space<vmem>>, %arg7: memref<128x512xbf16, #tpu.memory_space<vmem>>, %arg8: memref<1x512xf32, #tpu.memory_space<vmem>>, %arg9: memref<512x896xbf16, #tpu.memory_space<vmem>>, %arg10: memref<1x896xf32, #tpu.memory_space<vmem>>, %arg11: memref<16x256xf32, #tpu.memory_space<vmem>>, %arg12: memref<16x896xbf16, #tpu.memory_space<vmem>>) attributes {dimension_semantics = [#tpu.dimension_semantics<parallel>], iteration_bounds = array<i64: 1>, scalar_prefetch = 0 : i64, scratch_operands = 0 : i64, tpu.core_type = #tpu.core_type<tc>, window_params = [{transform_indices = @transform_0, window_bounds = array<i64: 16, 896>}, {transform_indices = @transform_1, window_bounds = array<i64: 16, 128>}, {pipeline_mode = #tpu.pipeline_mode<synchronous>, transform_indices = @transform_2, window_bounds = array<i64: 896, 512>}, {pipeline_mode = #tpu.pipeline_mode<synchronous>, transform_indices = @transform_3, window_bounds = array<i64: 1, 512>}, {pipeline_mode = #tpu.pipeline_mode<synchronous>, transform_indices = @transform_4, window_bounds = array<i64: 512, 256>}, {pipeline_mode = #tpu.pipeline_mode<synchronous>, transform_indices = @transform_5, window_bounds = array<i64: 1, 256>}, {pipeline_mode = #tpu.pipeline_mode<synchronous>, transform_indices = @transform_6, window_bounds = array<i64: 128, 512>}, {pipeline_mode = #tpu.pipeline_mode<synchronous>, transform_indices = @transform_7, window_bounds = array<i64: 1, 512>}, {pipeline_mode = #tpu.pipeline_mode<synchronous>, transform_indices = @transform_8, window_bounds = array<i64: 512, 896>}, {pipeline_mode = #tpu.pipeline_mode<synchronous>, transform_indices = @transform_9, window_bounds = array<i64: 1, 896>}, {transform_indices = @transform_10, window_bounds = array<i64: 16, 256>}, {transform_indices = @transform_11, window_bounds = array<i64: 16, 896>}]} {
    %c0 = arith.constant 0 : index
    %c0_0 = arith.constant 0 : index
    %0 = vector.load %arg1[%c0, %c0_0] : memref<16x896xf32, #tpu.memory_space<vmem>>, vector<16x896xf32>
    %1 = arith.truncf %0 : vector<16x896xf32> to vector<16x896xbf16>
    %c0_1 = arith.constant 0 : index
    %c0_2 = arith.constant 0 : index
    %2 = vector.load %arg3[%c0_1, %c0_2] : memref<896x512xbf16, #tpu.memory_space<vmem>>, vector<896x512xbf16>
    %cst = arith.constant dense<0.000000e+00> : vector<16x512xf32>
    %3 = tpu.matmul %1, %2, %cst {dimension_numbers = #tpu.dot_dimension_numbers<[1], [0], [0], [1], [0, 0, 1, 1], [], []>} : vector<16x896xbf16>, vector<896x512xbf16>, vector<16x512xf32> -> vector<16x512xf32>
    %c0_3 = arith.constant 0 : index
    %c0_4 = arith.constant 0 : index
    %4 = vector.load %arg4[%c0_3, %c0_4] : memref<1x512xf32, #tpu.memory_space<vmem>>, vector<1x512xf32>
    %5 = vector.broadcast %4 : vector<1x512xf32> to vector<16x512xf32>
    %6 = arith.addf %3, %5 : vector<16x512xf32>
    %cst_5 = arith.constant 0.000000e+00 : f32
    %7 = vector.broadcast %cst_5 : f32 to vector<16x512xf32>
    %8 = arith.maximumf %6, %7 : vector<16x512xf32>
    %c0_6 = arith.constant 0 : index
    %c0_7 = arith.constant 0 : index
    %9 = vector.load %arg5[%c0_6, %c0_7] : memref<512x256xf32, #tpu.memory_space<vmem>>, vector<512x256xf32>
    %cst_8 = arith.constant dense<0.000000e+00> : vector<16x256xf32>
    %10 = tpu.matmul %8, %9, %cst_8 {dimension_numbers = #tpu.dot_dimension_numbers<[1], [0], [0], [1], [0, 0, 1, 1], [], []>} : vector<16x512xf32>, vector<512x256xf32>, vector<16x256xf32> -> vector<16x256xf32>
    %c0_9 = arith.constant 0 : index
    %c0_10 = arith.constant 0 : index
    %11 = vector.load %arg6[%c0_9, %c0_10] : memref<1x256xf32, #tpu.memory_space<vmem>>, vector<1x256xf32>
    %12 = vector.broadcast %11 : vector<1x256xf32> to vector<16x256xf32>
    %13 = arith.addf %10, %12 : vector<16x256xf32>
    %c0_11 = arith.constant 0 : index
    %c0_12 = arith.constant 0 : index
    %14 = vector.load %arg11[%c0_11, %c0_12] : memref<16x256xf32, #tpu.memory_space<vmem>>, vector<16x256xf32>
    tpu.vector_store %arg11[%c0_11, %c0_12], %13 {strides = array<i32>} : memref<16x256xf32, #tpu.memory_space<vmem>>, vector<16x256xf32>,
    %15 = vector.extract_strided_slice %13 {offsets = [0, 0], sizes = [16, 128], strides = [1, 1]} : vector<16x256xf32> to vector<16x128xf32>
    %16 = vector.extract_strided_slice %13 {offsets = [0, 128], sizes = [16, 128], strides = [1, 1]} : vector<16x256xf32> to vector<16x128xf32>
    %c0_13 = arith.constant 0 : index
    %c0_14 = arith.constant 0 : index
    %17 = vector.load %arg2[%c0_13, %c0_14] : memref<16x128xf32, #tpu.memory_space<vmem>>, vector<16x128xf32>
    %cst_15 = arith.constant 5.000000e-01 : f32
    %18 = vector.broadcast %cst_15 : f32 to vector<16x128xf32>
    %19 = arith.mulf %18, %16 : vector<16x128xf32>
    %20 = math.exp %19 : vector<16x128xf32>
    %21 = arith.mulf %17, %20 : vector<16x128xf32>
    %22 = arith.addf %15, %21 : vector<16x128xf32>
    %23 = arith.truncf %22 : vector<16x128xf32> to vector<16x128xbf16>
    %c0_16 = arith.constant 0 : index
    %c0_17 = arith.constant 0 : index
    %24 = vector.load %arg7[%c0_16, %c0_17] : memref<128x512xbf16, #tpu.memory_space<vmem>>, vector<128x512xbf16>
    %cst_18 = arith.constant dense<0.000000e+00> : vector<16x512xf32>
    %25 = tpu.matmul %23, %24, %cst_18 {dimension_numbers = #tpu.dot_dimension_numbers<[1], [0], [0], [1], [0, 0, 1, 1], [], []>} : vector<16x128xbf16>, vector<128x512xbf16>, vector<16x512xf32> -> vector<16x512xf32>
    %c0_19 = arith.constant 0 : index
    %c0_20 = arith.constant 0 : index
    %26 = vector.load %arg8[%c0_19, %c0_20] : memref<1x512xf32, #tpu.memory_space<vmem>>, vector<1x512xf32>
    %27 = vector.broadcast %26 : vector<1x512xf32> to vector<16x512xf32>
    %28 = arith.addf %25, %27 : vector<16x512xf32>
    %cst_21 = arith.constant 0.000000e+00 : f32
    %29 = vector.broadcast %cst_21 : f32 to vector<16x512xf32>
    %30 = arith.maximumf %28, %29 : vector<16x512xf32>
    %31 = arith.truncf %30 : vector<16x512xf32> to vector<16x512xbf16>
    %c0_22 = arith.constant 0 : index
    %c0_23 = arith.constant 0 : index
    %32 = vector.load %arg9[%c0_22, %c0_23] : memref<512x896xbf16, #tpu.memory_space<vmem>>, vector<512x896xbf16>
    %cst_24 = arith.constant dense<0.000000e+00> : vector<16x896xf32>
    %33 = tpu.matmul %31, %32, %cst_24 {dimension_numbers = #tpu.dot_dimension_numbers<[1], [0], [0], [1], [0, 0, 1, 1], [], []>} : vector<16x512xbf16>, vector<512x896xbf16>, vector<16x896xf32> -> vector<16x896xf32>
    %c0_25 = arith.constant 0 : index
    %c0_26 = arith.constant 0 : index
    %34 = vector.load %arg10[%c0_25, %c0_26] : memref<1x896xf32, #tpu.memory_space<vmem>>, vector<1x896xf32>
    %35 = vector.broadcast %34 : vector<1x896xf32> to vector<16x896xf32>
    %36 = arith.addf %33, %35 : vector<16x896xf32>
    %cst_27 = arith.constant 5.000000e-01 : f32
    %37 = vector.broadcast %cst_27 : f32 to vector<16x896xf32>
    %38 = arith.mulf %37, %36 : vector<16x896xf32>
    %39 = math.tanh %38 : vector<16x896xf32>
    %cst_28 = arith.constant 1.000000e+00 : f32
    %40 = vector.broadcast %cst_28 : f32 to vector<16x896xf32>
    %41 = arith.addf %39, %40 : vector<16x896xf32>
    %cst_29 = arith.constant 5.000000e-01 : f32
    %42 = vector.broadcast %cst_29 : f32 to vector<16x896xf32>
    %43 = arith.mulf %42, %41 : vector<16x896xf32>
    %44 = arith.truncf %43 : vector<16x896xf32> to vector<16x896xbf16>
    %c0_30 = arith.constant 0 : index
    %c0_31 = arith.constant 0 : index
    %45 = vector.load %arg12[%c0_30, %c0_31] : memref<16x896xbf16, #tpu.memory_space<vmem>>, vector<16x896xbf16>
    tpu.vector_store %arg12[%c0_30, %c0_31], %44 {strides = array<i32>} : memref<16x896xbf16, #tpu.memory_space<vmem>>, vector<16x896xbf16>,
    return
  }
  func.func @transform_0(%arg0: i32) -> (i32, i32) {
    %c0_i32 = arith.constant 0 : i32
    %c0_i32_0 = arith.constant 0 : i32
    return %arg0, %c0_i32 : i32, i32
  }
  func.func @transform_1(%arg0: i32) -> (i32, i32) {
    %c0_i32 = arith.constant 0 : i32
    %c0_i32_0 = arith.constant 0 : i32
    return %arg0, %c0_i32 : i32, i32
  }
  func.func @transform_2(%arg0: i32) -> (i32, i32) {
    %c0_i32 = arith.constant 0 : i32
    %c0_i32_0 = arith.constant 0 : i32
    %c0_i32_1 = arith.constant 0 : i32
    return %c0_i32, %c0_i32_0 : i32, i32
  }
  func.func @transform_3(%arg0: i32) -> (i32, i32) {
    %c0_i32 = arith.constant 0 : i32
    %c0_i32_0 = arith.constant 0 : i32
    %c0_i32_1 = arith.constant 0 : i32
    return %c0_i32, %c0_i32_0 : i32, i32
  }
  func.func @transform_4(%arg0: i32) -> (i32, i32) {
    %c0_i32 = arith.constant 0 : i32
    %c0_i32_0 = arith.constant 0 : i32
    %c0_i32_1 = arith.constant 0 : i32
    return %c0_i32, %c0_i32_0 : i32, i32
  }
  func.func @transform_5(%arg0: i32) -> (i32, i32) {
    %c0_i32 = arith.constant 0 : i32
    %c0_i32_0 = arith.constant 0 : i32
    %c0_i32_1 = arith.constant 0 : i32
    return %c0_i32, %c0_i32_0 : i32, i32
  }
  func.func @transform_6(%arg0: i32) -> (i32, i32) {
    %c0_i32 = arith.constant 0 : i32
    %c0_i32_0 = arith.constant 0 : i32
    %c0_i32_1 = arith.constant 0 : i32
    return %c0_i32, %c0_i32_0 : i32, i32
  }
  func.func @transform_7(%arg0: i32) -> (i32, i32) {
    %c0_i32 = arith.constant 0 : i32
    %c0_i32_0 = arith.constant 0 : i32
    %c0_i32_1 = arith.constant 0 : i32
    return %c0_i32, %c0_i32_0 : i32, i32
  }
  func.func @transform_8(%arg0: i32) -> (i32, i32) {
    %c0_i32 = arith.constant 0 : i32
    %c0_i32_0 = arith.constant 0 : i32
    %c0_i32_1 = arith.constant 0 : i32
    return %c0_i32, %c0_i32_0 : i32, i32
  }
  func.func @transform_9(%arg0: i32) -> (i32, i32) {
    %c0_i32 = arith.constant 0 : i32
    %c0_i32_0 = arith.constant 0 : i32
    %c0_i32_1 = arith.constant 0 : i32
    return %c0_i32, %c0_i32_0 : i32, i32
  }
  func.func @transform_10(%arg0: i32) -> (i32, i32) {
    %c0_i32 = arith.constant 0 : i32
    %c0_i32_0 = arith.constant 0 : i32
    return %arg0, %c0_i32 : i32, i32
  }
  func.func @transform_11(%arg0: i32) -> (i32, i32) {
    %c0_i32 = arith.constant 0 : i32
    %c0_i32_0 = arith.constant 0 : i32
    return %arg0, %c0_i32 : i32, i32
  }
}

</mosaic_0001>

<bundles_post_ra>
// kernel: vae_forward.1
= control target key start
LH: loop header
LB: loop body
LE: loop exit
PB: predicated region body
PF: predicated region fallthrough
CT: control target
= control target key end

     0   :  { %s10332_s2 = inlined_call_operand.vmem [shape: bf16[896,512], index: 2, kind: input, shape index: {}]   ;;  %s10333_s0 = inlined_call_operand.vmem [shape: f32[16,896], index: 0, kind: input, shape index: {}]   ;;  %s10334_s3 = inlined_call_operand.vmem [shape: f32[1,512], index: 3, kind: input, shape index: {}]   ;;  %s10335_s4 = inlined_call_operand.vmem [shape: f32[512,256], index: 4, kind: input, shape index: {}]   ;;  %s10336_s6 = inlined_call_operand.vmem [shape: bf16[128,512], index: 6, kind: input, shape index: {}]   ;;  %s10337_s5 = inlined_call_operand.vmem [shape: f32[1,256], index: 5, kind: input, shape index: {}]   ;;  %s10338_s10 = inlined_call_operand.vmem [shape: f32[16,256], index: 10, kind: output, shape index: {0}]   ;;  %s10339_s8 = inlined_call_operand.vmem [shape: bf16[512,896], index: 8, kind: input, shape index: {}]   ;;  %s10340_s1 = inlined_call_operand.vmem [shape: f32[16,128], index: 1, kind: input, shape index: {}]   ;;  %s10341_s7 = inlined_call_operand.vmem [shape: f32[1,512], index: 7, kind: input, shape index: {}]   ;;  %s10342_s9 = inlined_call_operand.vmem [shape: f32[1,896], index: 9, kind: input, shape index: {}]   ;;  %s10343_s11 = inlined_call_operand.vmem [shape: bf16[16,896], index: 11, kind: output, shape index: {1}]  }
   0x1   :  { %v4427_v0 = vld [vmem:[%s10332_s2 + $0xe0] sm:$0xf]  ;;  %v6263_v1 = vld [vmem:[%s10332_s2 + $0xec] sm:$0xf0] }
   0x2   :  { %v4555_v2 = vld [vmem:[%s10332_s2 + $0x1e0] sm:$0xf]  ;;  %v4428_v3 = vor.u32 %v6263_v1, %v4427_v0  ;;  %v6295_v4 = vld [vmem:[%s10332_s2 + $0x1ec] sm:$0xf0] }
   0x3   :  { %v4683_v5 = vld [vmem:[%s10332_s2 + $0x2e0] sm:$0xf]  ;;  %v6327_v6 = vld [vmem:[%s10332_s2 + $0x2ec] sm:$0xf0]  ;;  %v4556_v7 = vor.u32 %v6295_v4, %v4555_v2 }
   0x4   :  { %v4684_v8 = vor.u32 %v6327_v6, %v4683_v5  ;;  %v4811_v9 = vld [vmem:[%s10332_s2 + $0x3e0] sm:$0xf]  ;;  %v6359_v10 = vld [vmem:[%s10332_s2 + $0x3ec] sm:$0xf0]  ;;  %1412 = vmatpush.bf16.msra.mxu0 %v4428_v3 }
   0x5   :  { %v4411_v11 = vld [vmem:[%s10332_s2 + $0xc0] sm:$0xf]  ;;  %v4812_v12 = vor.u32 %v6359_v10, %v4811_v9  ;;  %v6259_v13 = vld [vmem:[%s10332_s2 + $0xcc] sm:$0xf0]  ;;  %1426 = vmatpush.bf16.msra.mxu1 %v4556_v7 }
   0x6   :  { %v4539_v14 = vld [vmem:[%s10332_s2 + $0x1c0] sm:$0xf]  ;;  %v6291_v15 = vld [vmem:[%s10332_s2 + $0x1cc] sm:$0xf0]  ;;  %1440 = vmatpush.bf16.msra.mxu2 %v4684_v8  ;;  %v4412_v16 = vor.u32 %v6259_v13, %v4411_v11 }
   0x7   :  { %v4540_v17 = vor.u32 %v6291_v15, %v4539_v14  ;;  %v4667_v18 = vld [vmem:[%s10332_s2 + $0x2c0] sm:$0xf]  ;;  %v6323_v19 = vld [vmem:[%s10332_s2 + $0x2cc] sm:$0xf0]  ;;  %1454 = vmatpush.bf16.msra.mxu3 %v4812_v12 }
   0x8   :  { %v4795_v20 = vld [vmem:[%s10332_s2 + $0x3c0] sm:$0xf]  ;;  %v4668_v21 = vor.u32 %v6323_v19, %v4667_v18  ;;  %v6355_v22 = vld [vmem:[%s10332_s2 + $0x3cc] sm:$0xf0]  ;;  %1413 = vmatpush.bf16.msra.mxu0 %v4412_v16 }
   0x9   :  { %v4395_v23 = vld [vmem:[%s10332_s2 + $0xa0] sm:$0xf]  ;;  %v6255_v24 = vld [vmem:[%s10332_s2 + $0xac] sm:$0xf0]  ;;  %v4796_v25 = vor.u32 %v6355_v22, %v4795_v20  ;;  %1427 = vmatpush.bf16.msra.mxu1 %v4540_v17 }
   0xa   :  { %v4523_v26 = vld [vmem:[%s10332_s2 + $0x1a0] sm:$0xf]  ;;  %v6287_v27 = vld [vmem:[%s10332_s2 + $0x1ac] sm:$0xf0]  ;;  %v4396_v29 = vor.u32 %v6255_v24, %v4395_v23  ;;  %1441 = vmatpush.bf16.msra.mxu2 %v4668_v21 }
   0xb   :  { %v4651_v28 = vld [vmem:[%s10332_s2 + $0x2a0] sm:$0xf]  ;;  %v6319_v30 = vld [vmem:[%s10332_s2 + $0x2ac] sm:$0xf0]  ;;  %v4524_v33 = vor.u32 %v6287_v27, %v4523_v26  ;;  %1455 = vmatpush.bf16.msra.mxu3 %v4796_v25 }
   0xc   :  { %v4779_v31 = vld [vmem:[%s10332_s2 + $0x3a0] sm:$0xf]  ;;  %v6351_v32 = vld [vmem:[%s10332_s2 + $0x3ac] sm:$0xf0]  ;;  %v4652_v34 = vor.u32 %v6319_v30, %v4651_v28  ;;  %1414 = vmatpush.bf16.msra.mxu0 %v4396_v29 }
   0xd   :  { %v4379_v35 = vld [vmem:[%s10332_s2 + $0x80] sm:$0xf]  ;;  %v6251_v36 = vld [vmem:[%s10332_s2 + $0x8c] sm:$0xf0]  ;;  %v4780_v38 = vor.u32 %v6351_v32, %v4779_v31  ;;  %1428 = vmatpush.bf16.msra.mxu1 %v4524_v33 }
   0xe   :  { %v4507_v37 = vld [vmem:[%s10332_s2 + $0x180] sm:$0xf]  ;;  %v6283_v39 = vld [vmem:[%s10332_s2 + $0x18c] sm:$0xf0]  ;;  %v4380_v44 = vor.u32 %v6251_v36, %v4379_v35  ;;  %1442 = vmatpush.bf16.msra.mxu2 %v4652_v34 }
   0xf   :  { %v4635_v40 = vld [vmem:[%s10332_s2 + $0x280] sm:$0xf]  ;;  %v6315_v41 = vld [vmem:[%s10332_s2 + $0x28c] sm:$0xf0]  ;;  %v4508_v45 = vor.u32 %v6283_v39, %v4507_v37  ;;  %1456 = vmatpush.bf16.msra.mxu3 %v4780_v38  ;;  %v6261_v37 = vld [vmem:[%s10332_s2 + $0xe4] sm:$0xf] }
  0x10   :  { %v4763_v42 = vld [vmem:[%s10332_s2 + $0x380] sm:$0xf]  ;;  %v6347_v43 = vld [vmem:[%s10332_s2 + $0x38c] sm:$0xf0]  ;;  %v4636_v46 = vor.u32 %v6315_v41, %v4635_v40  ;;  %1415 = vmatpush.bf16.msra.mxu0 %v4380_v44  ;;  %v4429_v38 = vld [vmem:[%s10332_s2 + $0xf0] sm:$0xf0] }
  0x11   :  { %v4363_v47 = vld [vmem:[%s10332_s2 + $0x60] sm:$0xf]  ;;  %v6247_v48 = vld [vmem:[%s10332_s2 + $0x6c] sm:$0xf0]  ;;  %v4764_v50 = vor.u32 %v6347_v43, %v4763_v42  ;;  %1429 = vmatpush.bf16.msra.mxu1 %v4508_v45 }
  0x12   :  { %v4491_v49 = vld [vmem:[%s10332_s2 + $0x160] sm:$0xf]  ;;  %v6279_v51 = vld [vmem:[%s10332_s2 + $0x16c] sm:$0xf0]  ;;  %v4364_v56 = vor.u32 %v6247_v48, %v4363_v47  ;;  %1443 = vmatpush.bf16.msra.mxu2 %v4636_v46  ;;  %v4432_v48 = vor.u32 %v6261_v37, %v4429_v38 }
  0x13   :  { %v4619_v52 = vld [vmem:[%s10332_s2 + $0x260] sm:$0xf]  ;;  %v6311_v53 = vld [vmem:[%s10332_s2 + $0x26c] sm:$0xf0]  ;;  %v4492_v57 = vor.u32 %v6279_v51, %v4491_v49  ;;  %1457 = vmatpush.bf16.msra.mxu3 %v4764_v50  ;;  %v6257_v50 = vld [vmem:[%s10332_s2 + $0xc4] sm:$0xf] }
  0x14   :  { %v4747_v54 = vld [vmem:[%s10332_s2 + $0x360] sm:$0xf]  ;;  %v6343_v55 = vld [vmem:[%s10332_s2 + $0x36c] sm:$0xf0]  ;;  %v4620_v58 = vor.u32 %v6311_v53, %v4619_v52  ;;  %1416 = vmatpush.bf16.msra.mxu0 %v4364_v56  ;;  %v4413_v51 = vld [vmem:[%s10332_s2 + $0xd0] sm:$0xf0] }
  0x15   :  { %v4347_v59 = vld [vmem:[%s10332_s2 + $0x40] sm:$0xf]  ;;  %v6243_v60 = vld [vmem:[%s10332_s2 + $0x4c] sm:$0xf0]  ;;  %v4748_v62 = vor.u32 %v6343_v55, %v4747_v54  ;;  %1430 = vmatpush.bf16.msra.mxu1 %v4492_v57  ;;  %v44_v53 = vld [vmem:[%s10333_s0 + $0x38] sm:$0xff] }
  0x16   :  { %v4475_v61 = vld [vmem:[%s10332_s2 + $0x140] sm:$0xf]  ;;  %v6275_v63 = vld [vmem:[%s10332_s2 + $0x14c] sm:$0xf0]  ;;  %v4348_v4 = vor.u32 %v6243_v60, %v4347_v59  ;;  %1444 = vmatpush.bf16.msra.mxu2 %v4620_v58  ;;  %v46_v58 = vld [vmem:[%s10333_s0 + $0x48] sm:$0xff] }
  0x17   :  { %v4603_v0 = vld [vmem:[%s10332_s2 + $0x240] sm:$0xf]  ;;  %v6307_v1 = vld [vmem:[%s10332_s2 + $0x24c] sm:$0xf0]  ;;  %v4476_v5 = vor.u32 %v6275_v63, %v4475_v61  ;;  %1458 = vmatpush.bf16.msra.mxu3 %v4748_v62 }
  0x18   :  { %v4731_v2 = vld [vmem:[%s10332_s2 + $0x340] sm:$0xf]  ;;  %v6339_v3 = vld [vmem:[%s10332_s2 + $0x34c] sm:$0xf0]  ;;  %v4604_v6 = vor.u32 %v6307_v1, %v4603_v0  ;;  %1417 = vmatpush.bf16.msra.mxu0 %v4348_v4  ;;  %v4416_v1 = vor.u32 %v6257_v50, %v4413_v51  ;;  %v6253_v4 = vld [vmem:[%s10332_s2 + $0xa4] sm:$0xf] }
  0x19   :  { %v4331_v7 = vld [vmem:[%s10332_s2 + $0x20] sm:$0xf]  ;;  %v6239_v8 = vld [vmem:[%s10332_s2 + $0x2c] sm:$0xf0]  ;;  %v4732_v10 = vor.u32 %v6339_v3, %v4731_v2  ;;  %1431 = vmatpush.bf16.msra.mxu1 %v4476_v5  ;;  %v4397_v5 = vld [vmem:[%s10332_s2 + $0xb0] sm:$0xf0] }
  0x1a   :  { %v4459_v9 = vld [vmem:[%s10332_s2 + $0x120] sm:$0xf]  ;;  %v6271_v11 = vld [vmem:[%s10332_s2 + $0x12c] sm:$0xf0]  ;;  %v4332_v16 = vor.u32 %v6239_v8, %v4331_v7  ;;  %1445 = vmatpush.bf16.msra.mxu2 %v4604_v6  ;;  %v38_v6 = vld [vmem:[%s10333_s0 + $0x8] sm:$0xff] }
  0x1b   :  { %v4587_v12 = vld [vmem:[%s10332_s2 + $0x220] sm:$0xf]  ;;  %v6303_v13 = vld [vmem:[%s10332_s2 + $0x22c] sm:$0xf0]  ;;  %v4460_v19 = vor.u32 %v6271_v11, %v4459_v9  ;;  %1459 = vmatpush.bf16.msra.mxu3 %v4732_v10 }
  0x1c   :  { %v4715_v14 = vld [vmem:[%s10332_s2 + $0x320] sm:$0xf]  ;;  %v6335_v15 = vld [vmem:[%s10332_s2 + $0x32c] sm:$0xf0]  ;;  %v4588_v20 = vor.u32 %v6303_v13, %v4587_v12  ;;  %1418 = vmatpush.bf16.msra.mxu0 %v4332_v16 }
  0x1d   :  { %v4315_v17 = vld [vmem:[%s10332_s2] sm:$0xf]  ;;  %v6235_v18 = vld [vmem:[%s10332_s2 + $0xc] sm:$0xf0]  ;;  %v4716_v24 = vor.u32 %v6335_v15, %v4715_v14  ;;  %1432 = vmatpush.bf16.msra.mxu1 %v4460_v19  ;;  %v40_v19 = vld [vmem:[%s10333_s0 + $0x18] sm:$0xff] }
  0x1e   :  { %v4443_v21 = vld [vmem:[%s10332_s2 + $0x100] sm:$0xf]  ;;  %v6267_v22 = vld [vmem:[%s10332_s2 + $0x10c] sm:$0xf0]  ;;  %v4316_v31 = vor.u32 %v6235_v18, %v4315_v17  ;;  %1446 = vmatpush.bf16.msra.mxu2 %v4588_v20  ;;  %v4400_v17 = vor.u32 %v6253_v4, %v4397_v5 }
  0x1f   :  { %v4571_v23 = vld [vmem:[%s10332_s2 + $0x200] sm:$0xf]  ;;  %v6299_v25 = vld [vmem:[%s10332_s2 + $0x20c] sm:$0xf0]  ;;  %v4444_v35 = vor.u32 %v6267_v22, %v4443_v21  ;;  %1460 = vmatpush.bf16.msra.mxu3 %v4716_v24  ;;  %v6249_v21 = vld [vmem:[%s10332_s2 + $0x84] sm:$0xf] }
  0x20   :  { %v4699_v26 = vld [vmem:[%s10332_s2 + $0x300] sm:$0xf]  ;;  %v6331_v27 = vld [vmem:[%s10332_s2 + $0x30c] sm:$0xf0]  ;;  %v4572_v36 = vor.u32 %v6299_v25, %v4571_v23  ;;  %1419 = vmatpush.bf16.msra.mxu0 %v4316_v31  ;;  %v4381_v22 = vld [vmem:[%s10332_s2 + $0x90] sm:$0xf0] }
  0x21   :  { %v4939_v28 = vld [vmem:[%s10332_s2 + $0x4e0] sm:$0xf]  ;;  %v6391_v29 = vld [vmem:[%s10332_s2 + $0x4ec] sm:$0xf0]  ;;  %v4700_v39 = vor.u32 %v6331_v27, %v4699_v26  ;;  %1433 = vmatpush.bf16.msra.mxu1 %v4444_v35  ;;  %v4365_v35 = vld [vmem:[%s10332_s2 + $0x70] sm:$0xf0] }
  0x22   :  { %v5067_v30 = vld [vmem:[%s10332_s2 + $0x5e0] sm:$0xf]  ;;  %v6423_v32 = vld [vmem:[%s10332_s2 + $0x5ec] sm:$0xf0]  ;;  %v4940_v40 = vor.u32 %v6391_v29, %v4939_v28  ;;  %1447 = vmatpush.bf16.msra.mxu2 %v4572_v36 }
  0x23   :  { %v5195_v33 = vld [vmem:[%s10332_s2 + $0x6e0] sm:$0xf]  ;;  %v6455_v34 = vld [vmem:[%s10332_s2 + $0x6ec] sm:$0xf0]  ;;  %v5068_v43 = vor.u32 %v6423_v32, %v5067_v30  ;;  %1461 = vmatpush.bf16.msra.mxu3 %v4700_v39  ;;  %v4384_v30 = vor.u32 %v6249_v21, %v4381_v22 }
  0x24   :  { %v4923_v41 = vld [vmem:[%s10332_s2 + $0x4c0] sm:$0xf]  ;;  %v6387_v42 = vld [vmem:[%s10332_s2 + $0x4cc] sm:$0xf0]  ;;  %v5196_v44 = vor.u32 %v6455_v34, %v5195_v33  ;;  %1468 = vmatpush.bf16.msrb.mxu0 %v4940_v40  ;;  %v6245_v34 = vld [vmem:[%s10332_s2 + $0x64] sm:$0xf] }
  0x25   :  { %v5051_v45 = vld [vmem:[%s10332_s2 + $0x5c0] sm:$0xf]  ;;  %v6419_v46 = vld [vmem:[%s10332_s2 + $0x5cc] sm:$0xf0]  ;;  %v4924_v55 = vor.u32 %v6387_v42, %v4923_v41  ;;  %1482 = vmatpush.bf16.msrb.mxu1 %v5068_v43  ;;  %v4368_v42 = vor.u32 %v6245_v34, %v4365_v35  ;;  %v4541_v34 = vld [vmem:[%s10332_s2 + $0x1d0] sm:$0xf0] }
  0x26   :  { %v5179_v47 = vld [vmem:[%s10332_s2 + $0x6c0] sm:$0xf]  ;;  %v6451_v49 = vld [vmem:[%s10332_s2 + $0x6cc] sm:$0xf0]  ;;  %1496 = vmatpush.bf16.msrb.mxu2 %v5196_v44  ;;  %v5052_v59 = vor.u32 %v6419_v46, %v5051_v45  ;;  %v6241_v46 = vld [vmem:[%s10332_s2 + $0x44] sm:$0xf] }
  0x27   :  { %v37_v52 = vld [vmem:[%s10333_s0] sm:$0xff]  ;;  %v39_v54 = vld [vmem:[%s10333_s0 + $0x10] sm:$0xff]  ;;  %v5180_v60 = vor.u32 %v6451_v49, %v5179_v47  ;;  %1510 = vmatpush.bf16.msrb.mxu3 %v4432_v48 }
  0x28   :  { %v4907_v56 = vld [vmem:[%s10332_s2 + $0x4a0] sm:$0xf]  ;;  %v7057_v57 = vpack.c.bf16 %v44_v53, %v37_v52  ;;  %v6383_v61 = vld [vmem:[%s10332_s2 + $0x4ac] sm:$0xf0]  ;;  %v7071_v0 = vpack.c.bf16 %v46_v58, %v39_v54  ;;  %1469 = vmatpush.bf16.msrb.mxu0 %v4924_v55  ;;  %v4349_v47 = vld [vmem:[%s10332_s2 + $0x50] sm:$0xf0] }
  0x29   :  { %v5035_v62 = vld [vmem:[%s10332_s2 + $0x5a0] sm:$0xf]  ;;  %v6415_v63 = vld [vmem:[%s10332_s2 + $0x5ac] sm:$0xf0]  ;;  %v4908_v8 = vor.u32 %v6383_v61, %v4907_v56  ;;  %1483 = vmatpush.bf16.msrb.mxu1 %v5052_v59  ;;  %v4352_v54 = vor.u32 %v6241_v46, %v4349_v47  ;;  %v6237_v59 = vld [vmem:[%s10332_s2 + $0x24] sm:$0xf] }
  0x2a   :  { %v5163_v2 = vld [vmem:[%s10332_s2 + $0x6a0] sm:$0xf]  ;;  %v6447_v3 = vld [vmem:[%s10332_s2 + $0x6ac] sm:$0xf0]  ;;  %1420 = vmatmul.bf16.vlgmr.msra.gmra.mxu0 %v7057_v57  ;;  %1448 = vmatmul.bf16.vlgmr.msra.gmra.mxu2 %v7071_v0  ;;  %v5036_v12 = vor.u32 %v6415_v63, %v5035_v62  ;;  %v6321_v35 = vld [vmem:[%s10332_s2 + $0x2c4] sm:$0xf] }
  0x2b   :  { %v45_v7 = vld [vmem:[%s10333_s0 + $0x40] sm:$0xff]  ;;  %v6379_v10 = vld [vmem:[%s10332_s2 + $0x48c] sm:$0xf0]  ;;  %1497 = vmatpush.bf16.msrb.mxu2 %v5180_v60  ;;  %v5164_v13 = vor.u32 %v6447_v3, %v5163_v2  ;;  %1511 = vmatpush.bf16.msrb.mxu3 %v4416_v1  ;;  %v4333_v60 = vld [vmem:[%s10332_s2 + $0x30] sm:$0xf0] }
  0x2c   :  { %v4891_v9 = vld [vmem:[%s10332_s2 + $0x480] sm:$0xf]  ;;  %v7099_v11 = vpack.c.bf16 %v45_v7, %v38_v6  ;;  %v6411_v15 = vld [vmem:[%s10332_s2 + $0x58c] sm:$0xf0]  ;;  %1470 = vmatpush.bf16.msrb.mxu0 %v4908_v8  ;;  %v6233_v7 = vld [vmem:[%s10332_s2 + $0x4] sm:$0xf]  ;;  %v4336_v8 = vor.u32 %v6237_v59, %v4333_v60 }
  0x2d   :  { %v5019_v14 = vld [vmem:[%s10332_s2 + $0x580] sm:$0xf]  ;;  %v6443_v18 = vld [vmem:[%s10332_s2 + $0x68c] sm:$0xf0]  ;;  %v4892_v24 = vor.u32 %v6379_v10, %v4891_v9  ;;  %1484 = vmatpush.bf16.msrb.mxu1 %v5036_v12  ;;  %v4317_v9 = vld [vmem:[%s10332_s2 + $0x10] sm:$0xf0] }
  0x2e   :  { %v5147_v16 = vld [vmem:[%s10332_s2 + $0x680] sm:$0xf]  ;;  %1434 = vmatmul.bf16.vlgmr.msra.gmra.mxu1 %v7099_v11  ;;  %v47_v20 = vld [vmem:[%s10333_s0 + $0x50] sm:$0xff]  ;;  %v5020_v25 = vor.u32 %v6411_v15, %v5019_v14  ;;  %v6293_v10 = vld [vmem:[%s10332_s2 + $0x1e4] sm:$0xf] }
  0x2f   :  { %v7126_v23 = vpack.c.bf16 %v47_v20, %v40_v19  ;;  %1498 = vmatpush.bf16.msrb.mxu2 %v5164_v13  ;;  %v5148_v26 = vor.u32 %v6443_v18, %v5147_v16  ;;  %v4875_v27 = vld [vmem:[%s10332_s2 + $0x460] sm:$0xf]  ;;  %v6375_v28 = vld [vmem:[%s10332_s2 + $0x46c] sm:$0xf0]  ;;  %1512 = vmatpush.bf16.msrb.mxu3 %v4400_v17  ;;  %v4557_v12 = vld [vmem:[%s10332_s2 + $0x1f0] sm:$0xf0] }
  0x30   :  { %v5003_v29 = vld [vmem:[%s10332_s2 + $0x560] sm:$0xf]  ;;  %v6407_v31 = vld [vmem:[%s10332_s2 + $0x56c] sm:$0xf0]  ;;  %1471 = vmatpush.bf16.msrb.mxu0 %v4892_v24  ;;  %v4876_v36 = vor.u32 %v6375_v28, %v4875_v27  ;;  %v6325_v13 = vld [vmem:[%s10332_s2 + $0x2e4] sm:$0xf]  ;;  %v4560_v27 = vor.u32 %v6293_v10, %v4557_v12 }
  0x31   :  { %v5131_v32 = vld [vmem:[%s10332_s2 + $0x660] sm:$0xf]  ;;  %v6439_v33 = vld [vmem:[%s10332_s2 + $0x66c] sm:$0xf0]  ;;  %1462 = vmatmul.bf16.vlgmr.msra.gmra.mxu3 %v7126_v23  ;;  %1485 = vmatpush.bf16.msrb.mxu1 %v5020_v25  ;;  %v5004_v37 = vor.u32 %v6407_v31, %v5003_v29  ;;  %v4685_v14 = vld [vmem:[%s10332_s2 + $0x2f0] sm:$0xf0] }
  0x32   :  { %v5132_v38 = vor.u32 %v6439_v33, %v5131_v32  ;;  %v4859_v39 = vld [vmem:[%s10332_s2 + $0x440] sm:$0xf]  ;;  %v6371_v40 = vld [vmem:[%s10332_s2 + $0x44c] sm:$0xf0]  ;;  %v6357_v15 = vld [vmem:[%s10332_s2 + $0x3e4] sm:$0xf]  ;;  %v4688_v31 = vor.u32 %v6325_v13, %v4685_v14 }
  0x33   :  { %1499 = vmatpush.bf16.msrb.mxu2 %v5148_v26  ;;  %v4987_v41 = vld [vmem:[%s10332_s2 + $0x540] sm:$0xf]  ;;  %1513 = vmatpush.bf16.msrb.mxu3 %v4384_v30  ;;  %v6403_v43 = vld [vmem:[%s10332_s2 + $0x54c] sm:$0xf0]  ;;  %v4860_v48 = vor.u32 %v6371_v40, %v4859_v39  ;;  %v4813_v17 = vld [vmem:[%s10332_s2 + $0x3f0] sm:$0xf0]  ;;  %v4320_v26 = vor.u32 %v6233_v7, %v4317_v9 }
  0x34   :  { %v5115_v44 = vld [vmem:[%s10332_s2 + $0x640] sm:$0xf]  ;;  %v6435_v45 = vld [vmem:[%s10332_s2 + $0x64c] sm:$0xf0]  ;;  %1472 = vmatpush.bf16.msrb.mxu0 %v4876_v36  ;;  %v4988_v49 = vor.u32 %v6403_v43, %v4987_v41  ;;  %v6389_v18 = vld [vmem:[%s10332_s2 + $0x4e4] sm:$0xf]  ;;  %v4816_v32 = vor.u32 %v6357_v15, %v4813_v17 }
  0x35   :  { %1486 = vmatpush.bf16.msrb.mxu1 %v5004_v37  ;;  %v5116_v50 = vor.u32 %v6435_v45, %v5115_v44  ;;  %v4843_v51 = vld [vmem:[%s10332_s2 + $0x420] sm:$0xf]  ;;  %v6367_v52 = vld [vmem:[%s10332_s2 + $0x42c] sm:$0xf0]  ;;  %v4941_v19 = vld [vmem:[%s10332_s2 + $0x4f0] sm:$0xf0] }
  0x36   :  { %v4971_v53 = vld [vmem:[%s10332_s2 + $0x520] sm:$0xf]  ;;  %v6399_v55 = vld [vmem:[%s10332_s2 + $0x52c] sm:$0xf0]  ;;  %v4844_v62 = vor.u32 %v6367_v52, %v4843_v51  ;;  %v48_v24 = vld [vmem:[%s10333_s0 + $0x58] sm:$0xff]  ;;  %v4944_v36 = vor.u32 %v6389_v18, %v4941_v19 }
  0x37   :  { %1500 = vmatpush.bf16.msrb.mxu2 %v5132_v38  ;;  %1514 = vmatpush.bf16.msrb.mxu3 %v4368_v42  ;;  %v5099_v56 = vld [vmem:[%s10332_s2 + $0x620] sm:$0xf]  ;;  %v6431_v58 = vld [vmem:[%s10332_s2 + $0x62c] sm:$0xf0]  ;;  %v4972_v3 = vor.u32 %v6399_v55, %v4971_v53  ;;  %v50_v28 = vld [vmem:[%s10333_s0 + $0x68] sm:$0xff] }
  0x38   :  { %v4827_v61 = vld [vmem:[%s10332_s2 + $0x400] sm:$0xf]  ;;  %1473 = vmatpush.bf16.msrb.mxu0 %v4860_v48  ;;  %v6363_v63 = vld [vmem:[%s10332_s2 + $0x40c] sm:$0xf0]  ;;  %v5100_v4 = vor.u32 %v6431_v58, %v5099_v56  ;;  %v42_v29 = vld [vmem:[%s10333_s0 + $0x28] sm:$0xff] }
  0x39   :  { %v4955_v1 = vld [vmem:[%s10332_s2 + $0x500] sm:$0xf]  ;;  %v6395_v2 = vld [vmem:[%s10332_s2 + $0x50c] sm:$0xf0]  ;;  %1487 = vmatpush.bf16.msrb.mxu1 %v4988_v49  ;;  %v4828_v16 = vor.u32 %v6363_v63, %v4827_v61  ;;  %v6289_v33 = vld [vmem:[%s10332_s2 + $0x1c4] sm:$0xf] }
  0x3a   :  { %v5083_v5 = vld [vmem:[%s10332_s2 + $0x600] sm:$0xf]  ;;  %v6427_v6 = vld [vmem:[%s10332_s2 + $0x60c] sm:$0xf0]  ;;  %v4956_v20 = vor.u32 %v6395_v2, %v4955_v1  ;;  %v4669_v38 = vld [vmem:[%s10332_s2 + $0x2d0] sm:$0xf0]  ;;  %v4544_v45 = vor.u32 %v6289_v33, %v4541_v34 }
  0x3b   :  { %1501 = vmatpush.bf16.msrb.mxu2 %v5116_v50  ;;  %1515 = vmatpush.bf16.msrb.mxu3 %v4352_v54  ;;  %v5084_v21 = vor.u32 %v6427_v6, %v5083_v5  ;;  %v41_v22 = vld [vmem:[%s10333_s0 + $0x20] sm:$0xff]  ;;  %v43_v25 = vld [vmem:[%s10333_s0 + $0x30] sm:$0xff]  ;;  %v4672_v46 = vor.u32 %v6321_v35, %v4669_v38 }
  0x3c   :  { %1474 = vmatpush.bf16.msrb.mxu0 %v4844_v62  ;;  %v49_v30 = vld [vmem:[%s10333_s0 + $0x60] sm:$0xff]  ;;  %v7276_v37 = vpack.c.bf16 %v48_v24, %v41_v22  ;;  %v4797_v40 = vld [vmem:[%s10332_s2 + $0x3d0] sm:$0xf0]  ;;  %v7287_v41 = vpack.c.bf16 %v50_v28, %v43_v25 }
  0x3d   :  { %1488 = vmatpush.bf16.msrb.mxu1 %v4972_v3  ;;  %v6353_v39 = vld [vmem:[%s10332_s2 + $0x3c4] sm:$0xf]  ;;  %v7289_v42 = vpack.c.bf16 %v49_v30, %v42_v29  ;;  %v4925_v44 = vld [vmem:[%s10332_s2 + $0x4d0] sm:$0xf0] }
  0x3e   :  { %v6385_v43 = vld [vmem:[%s10332_s2 + $0x4c4] sm:$0xf]  ;;  %v4800_v47 = vor.u32 %v6353_v39, %v4797_v40  ;;  %v4525_v49 = vld [vmem:[%s10332_s2 + $0x1b0] sm:$0xf0] }
  0x3f   :  { %1502 = vmatpush.bf16.msrb.mxu2 %v5100_v4  ;;  %1516 = vmatpush.bf16.msrb.mxu3 %v4336_v8  ;;  %v6285_v48 = vld [vmem:[%s10332_s2 + $0x1a4] sm:$0xf]  ;;  %v4928_v51 = vor.u32 %v6385_v43, %v4925_v44  ;;  %v4653_v52 = vld [vmem:[%s10332_s2 + $0x2b0] sm:$0xf0] }
  0x40   :  { %1475 = vmatpush.bf16.msrb.mxu0 %v4828_v16  ;;  %v6317_v50 = vld [vmem:[%s10332_s2 + $0x2a4] sm:$0xf]  ;;  %v4781_v54 = vld [vmem:[%s10332_s2 + $0x3b0] sm:$0xf0]  ;;  %v4528_v58 = vor.u32 %v6285_v48, %v4525_v49 }
  0x41   :  { %1489 = vmatpush.bf16.msrb.mxu1 %v4956_v20  ;;  %v6349_v53 = vld [vmem:[%s10332_s2 + $0x3a4] sm:$0xf]  ;;  %v4909_v56 = vld [vmem:[%s10332_s2 + $0x4b0] sm:$0xf0]  ;;  %v4656_v59 = vor.u32 %v6317_v50, %v4653_v52 }
  0x42   :  { %v6381_v55 = vld [vmem:[%s10332_s2 + $0x4a4] sm:$0xf]  ;;  %v4784_v60 = vor.u32 %v6349_v53, %v4781_v54  ;;  %v4509_v62 = vld [vmem:[%s10332_s2 + $0x190] sm:$0xf0] }
  0x43   :  { %1503 = vmatpush.bf16.msrb.mxu2 %v5084_v21  ;;  %1517 = vmatpush.bf16.msrb.mxu3 %v4320_v26  ;;  %v6281_v61 = vld [vmem:[%s10332_s2 + $0x184] sm:$0xf]  ;;  %v4912_v1 = vor.u32 %v6381_v55, %v4909_v56  ;;  %v4637_v2 = vld [vmem:[%s10332_s2 + $0x290] sm:$0xf0] }
  0x44   :  { %1524 = vmatpush.bf16.msra.mxu0 %v4560_v27  ;;  %1490 = vmatmul.bf16.vlgmr.msrb.gmra.mxu1 %v7289_v42  ;;  %v6313_v63 = vld [vmem:[%s10332_s2 + $0x284] sm:$0xf]  ;;  %v4765_v4 = vld [vmem:[%s10332_s2 + $0x390] sm:$0xf0]  ;;  %v4512_v7 = vor.u32 %v6281_v61, %v4509_v62 }
  0x45   :  { %1538 = vmatpush.bf16.msra.mxu1 %v4688_v31  ;;  %1476 = vmatmul.bf16.vlgmr.msrb.gmra.mxu0 %v7276_v37  ;;  %v6345_v3 = vld [vmem:[%s10332_s2 + $0x384] sm:$0xf]  ;;  %v4893_v6 = vld [vmem:[%s10332_s2 + $0x490] sm:$0xf0]  ;;  %v4640_v8 = vor.u32 %v6313_v63, %v4637_v2 }
  0x46   :  { %1504 = vmatmul.bf16.vlgmr.msrb.gmra.mxu2 %v7287_v41  ;;  %1518 = vmatmul.bf16.vlgmr.msrb.gmra.mxu3 %v7057_v57  ;;  %v6377_v5 = vld [vmem:[%s10332_s2 + $0x484] sm:$0xf]  ;;  %v4768_v9 = vor.u32 %v6345_v3, %v4765_v4  ;;  %v4493_v12 = vld [vmem:[%s10332_s2 + $0x170] sm:$0xf0]  ;;  %v4435_v3 = vld [vmem:[%s10332_s2 + $0xe8] sm:$0xf] }
  0x47   :  { %1552 = vmatpush.bf16.msra.mxu2 %v4816_v32  ;;  %1566 = vmatpush.bf16.msra.mxu3 %v4944_v36  ;;  %v6277_v10 = vld [vmem:[%s10332_s2 + $0x164] sm:$0xf]  ;;  %v4896_v14 = vor.u32 %v6377_v5, %v4893_v6  ;;  %v4621_v15 = vld [vmem:[%s10332_s2 + $0x270] sm:$0xf0]  ;;  %v6264_v4 = vld [vmem:[%s10332_s2 + $0xf4] sm:$0xf0] }
  0x48   :  { %1525 = vmatpush.bf16.msra.mxu0 %v4544_v45  ;;  %v6309_v13 = vld [vmem:[%s10332_s2 + $0x264] sm:$0xf]  ;;  %v4749_v17 = vld [vmem:[%s10332_s2 + $0x370] sm:$0xf0]  ;;  %v4496_v20 = vor.u32 %v6277_v10, %v4493_v12 }
  0x49   :  { %1539 = vmatpush.bf16.msra.mxu1 %v4672_v46  ;;  %v6341_v16 = vld [vmem:[%s10332_s2 + $0x364] sm:$0xf]  ;;  %v4877_v19 = vld [vmem:[%s10332_s2 + $0x470] sm:$0xf0]  ;;  %v4624_v21 = vor.u32 %v6309_v13, %v4621_v15  ;;  %v4436_v13 = vor.u32 %v6264_v4, %v4435_v3 }
  0x4a   :  { %v6373_v18 = vld [vmem:[%s10332_s2 + $0x464] sm:$0xf]  ;;  %v4752_v22 = vor.u32 %v6341_v16, %v4749_v17  ;;  %v4477_v25 = vld [vmem:[%s10332_s2 + $0x150] sm:$0xf0] }
  0x4b   :  { %1553 = vmatpush.bf16.msra.mxu2 %v4800_v47  ;;  %1567 = vmatpush.bf16.msra.mxu3 %v4928_v51  ;;  %v6273_v24 = vld [vmem:[%s10332_s2 + $0x144] sm:$0xf]  ;;  %v4880_v27 = vor.u32 %v6373_v18, %v4877_v19  ;;  %v4605_v28 = vld [vmem:[%s10332_s2 + $0x250] sm:$0xf0]  ;;  %v4419_v19 = vld [vmem:[%s10332_s2 + $0xc8] sm:$0xf] }
  0x4c   :  { %1526 = vmatpush.bf16.msra.mxu0 %v4528_v58  ;;  %v6305_v26 = vld [vmem:[%s10332_s2 + $0x244] sm:$0xf]  ;;  %v4733_v30 = vld [vmem:[%s10332_s2 + $0x350] sm:$0xf0]  ;;  %v4480_v33 = vor.u32 %v6273_v24, %v4477_v25 }
  0x4d   :  { %1540 = vmatpush.bf16.msra.mxu1 %v4656_v59  ;;  %v6337_v29 = vld [vmem:[%s10332_s2 + $0x344] sm:$0xf]  ;;  %v4861_v32 = vld [vmem:[%s10332_s2 + $0x450] sm:$0xf0]  ;;  %v4608_v34 = vor.u32 %v6305_v26, %v4605_v28 }
  0x4e   :  { %v6369_v31 = vld [vmem:[%s10332_s2 + $0x444] sm:$0xf]  ;;  %v4736_v35 = vor.u32 %v6337_v29, %v4733_v30  ;;  %v4461_v38 = vld [vmem:[%s10332_s2 + $0x130] sm:$0xf0] }
  0x4f   :  { %1554 = vmatpush.bf16.msra.mxu2 %v4784_v60  ;;  %1568 = vmatpush.bf16.msra.mxu3 %v4912_v1  ;;  %v6269_v36 = vld [vmem:[%s10332_s2 + $0x124] sm:$0xf]  ;;  %v4864_v40 = vor.u32 %v6369_v31, %v4861_v32  ;;  %v4589_v43 = vld [vmem:[%s10332_s2 + $0x230] sm:$0xf0]  ;;  %v4403_v32 = vld [vmem:[%s10332_s2 + $0xa8] sm:$0xf] }
  0x50   :  { %1527 = vmatpush.bf16.msra.mxu0 %v4512_v7  ;;  %v6301_v39 = vld [vmem:[%s10332_s2 + $0x224] sm:$0xf]  ;;  %v4717_v45 = vld [vmem:[%s10332_s2 + $0x330] sm:$0xf0]  ;;  %v4464_v48 = vor.u32 %v6269_v36, %v4461_v38  ;;  %v4563_v7 = vld [vmem:[%s10332_s2 + $0x1e8] sm:$0xf] }
  0x51   :  { %1541 = vmatpush.bf16.msra.mxu1 %v4640_v8  ;;  %v6333_v44 = vld [vmem:[%s10332_s2 + $0x324] sm:$0xf]  ;;  %v4845_v47 = vld [vmem:[%s10332_s2 + $0x430] sm:$0xf0]  ;;  %v4592_v51 = vor.u32 %v6301_v39, %v4589_v43  ;;  %v6296_v8 = vld [vmem:[%s10332_s2 + $0x1f4] sm:$0xf0] }
  0x52   :  { %v6365_v46 = vld [vmem:[%s10332_s2 + $0x424] sm:$0xf]  ;;  %v4445_v50 = vld [vmem:[%s10332_s2 + $0x110] sm:$0xf0]  ;;  %v4720_v52 = vor.u32 %v6333_v44, %v4717_v45  ;;  %v4564_v17 = vor.u32 %v6296_v8, %v4563_v7 }
  0x53   :  { %1555 = vmatpush.bf16.msra.mxu2 %v4768_v9  ;;  %1569 = vmatpush.bf16.msra.mxu3 %v4896_v14  ;;  %v6265_v49 = vld [vmem:[%s10332_s2 + $0x104] sm:$0xf]  ;;  %v4573_v54 = vld [vmem:[%s10332_s2 + $0x210] sm:$0xf0]  ;;  %v4848_v56 = vor.u32 %v6365_v46, %v4845_v47  ;;  %v4387_v47 = vld [vmem:[%s10332_s2 + $0x88] sm:$0xf] }
  0x54   :  { %1528 = vmatpush.bf16.msra.mxu0 %v4496_v20  ;;  %v6297_v53 = vld [vmem:[%s10332_s2 + $0x204] sm:$0xf]  ;;  %v4701_v58 = vld [vmem:[%s10332_s2 + $0x310] sm:$0xf0]  ;;  %v4448_v1 = vor.u32 %v6265_v49, %v4445_v50  ;;  %v6260_v20 = vld [vmem:[%s10332_s2 + $0xd4] sm:$0xf0] }
  0x55   :  { %1542 = vmatpush.bf16.msra.mxu1 %v4624_v21  ;;  %v6329_v55 = vld [vmem:[%s10332_s2 + $0x304] sm:$0xf]  ;;  %v4829_v60 = vld [vmem:[%s10332_s2 + $0x410] sm:$0xf0]  ;;  %v4576_v5 = vor.u32 %v6297_v53, %v4573_v54  ;;  %v4547_v21 = vld [vmem:[%s10332_s2 + $0x1c8] sm:$0xf]  ;;  %v4420_v26 = vor.u32 %v6260_v20, %v4419_v19 }
  0x56   :  { %v6361_v59 = vld [vmem:[%s10332_s2 + $0x404] sm:$0xf]  ;;  %v5069_v62 = vld [vmem:[%s10332_s2 + $0x5f0] sm:$0xf0]  ;;  %v4704_v6 = vor.u32 %v6329_v55, %v4701_v58  ;;  %v4515_v49 = vld [vmem:[%s10332_s2 + $0x188] sm:$0xf] }
  0x57   :  { %1556 = vmatpush.bf16.msra.mxu2 %v4752_v22  ;;  %1570 = vmatpush.bf16.msra.mxu3 %v4880_v27  ;;  %v6421_v61 = vld [vmem:[%s10332_s2 + $0x5e4] sm:$0xf]  ;;  %v5197_v2 = vld [vmem:[%s10332_s2 + $0x6f0] sm:$0xf0]  ;;  %v4832_v9 = vor.u32 %v6361_v59, %v4829_v60  ;;  %v6292_v22 = vld [vmem:[%s10332_s2 + $0x1d4] sm:$0xf0] }
  0x58   :  { %1529 = vmatpush.bf16.msra.mxu0 %v4480_v33  ;;  %v6453_v63 = vld [vmem:[%s10332_s2 + $0x6e4] sm:$0xf]  ;;  %v5072_v10 = vor.u32 %v6421_v61, %v5069_v62  ;;  %v5053_v15 = vld [vmem:[%s10332_s2 + $0x5d0] sm:$0xf0]  ;;  %v4548_v30 = vor.u32 %v6292_v22, %v4547_v21  ;;  %v6256_v33 = vld [vmem:[%s10332_s2 + $0xb4] sm:$0xf0] }
  0x59   :  { %1543 = vmatpush.bf16.msra.mxu1 %v4608_v34  ;;  %v5200_v12 = vor.u32 %v6453_v63, %v5197_v2  ;;  %v6417_v14 = vld [vmem:[%s10332_s2 + $0x5c4] sm:$0xf]  ;;  %v5181_v18 = vld [vmem:[%s10332_s2 + $0x6d0] sm:$0xf0]  ;;  %v4531_v34 = vld [vmem:[%s10332_s2 + $0x1a8] sm:$0xf]  ;;  %v4404_v39 = vor.u32 %v6256_v33, %v4403_v32 }
  0x5a   :  { %v6449_v16 = vld [vmem:[%s10332_s2 + $0x6c4] sm:$0xf]  ;;  %v5056_v24 = vor.u32 %v6417_v14, %v5053_v15  ;;  %v5037_v28 = vld [vmem:[%s10332_s2 + $0x5b0] sm:$0xf0]  ;;  %v6284_v50 = vld [vmem:[%s10332_s2 + $0x194] sm:$0xf0] }
  0x5b   :  { %1557 = vmatpush.bf16.msra.mxu2 %v4736_v35  ;;  %1571 = vmatpush.bf16.msra.mxu3 %v4864_v40  ;;  %v5184_v25 = vor.u32 %v6449_v16, %v5181_v18  ;;  %v6413_v27 = vld [vmem:[%s10332_s2 + $0x5a4] sm:$0xf]  ;;  %v5165_v31 = vld [vmem:[%s10332_s2 + $0x6b0] sm:$0xf0]  ;;  %v6288_v35 = vld [vmem:[%s10332_s2 + $0x1b4] sm:$0xf0]  ;;  %v4516_v58 = vor.u32 %v6284_v50, %v4515_v49 }
  0x5c   :  { %1530 = vmatpush.bf16.msra.mxu0 %v4464_v48  ;;  %v6445_v29 = vld [vmem:[%s10332_s2 + $0x6a4] sm:$0xf]  ;;  %v5040_v36 = vor.u32 %v6413_v27, %v5037_v28  ;;  %v5021_v43 = vld [vmem:[%s10332_s2 + $0x590] sm:$0xf0]  ;;  %v4532_v45 = vor.u32 %v6288_v35, %v4531_v34  ;;  %v6252_v48 = vld [vmem:[%s10332_s2 + $0x94] sm:$0xf0] }
  0x5d   :  { %1544 = vmatpush.bf16.msra.mxu1 %v4592_v51  ;;  %v5168_v38 = vor.u32 %v6445_v29, %v5165_v31  ;;  %v6409_v40 = vld [vmem:[%s10332_s2 + $0x584] sm:$0xf]  ;;  %v5149_v46 = vld [vmem:[%s10332_s2 + $0x690] sm:$0xf0]  ;;  %v4388_v53 = vor.u32 %v6252_v48, %v4387_v47  ;;  %v4371_v60 = vld [vmem:[%s10332_s2 + $0x68] sm:$0xf] }
  0x5e   :  { %v6441_v44 = vld [vmem:[%s10332_s2 + $0x684] sm:$0xf]  ;;  %v5024_v51 = vor.u32 %v6409_v40, %v5021_v43  ;;  %v5005_v55 = vld [vmem:[%s10332_s2 + $0x570] sm:$0xf0]  ;;  %v6248_v61 = vld [vmem:[%s10332_s2 + $0x74] sm:$0xf0] }
  0x5f   :  { %1558 = vmatpush.bf16.msra.mxu2 %v4720_v52  ;;  %1572 = vmatpush.bf16.msra.mxu3 %v4848_v56  ;;  %v5152_v52 = vor.u32 %v6441_v44, %v5149_v46  ;;  %v6405_v54 = vld [vmem:[%s10332_s2 + $0x564] sm:$0xf]  ;;  %v5133_v59 = vld [vmem:[%s10332_s2 + $0x670] sm:$0xf0]  ;;  %v4499_v62 = vld [vmem:[%s10332_s2 + $0x168] sm:$0xf]  ;;  %v4372_v3 = vor.u32 %v6248_v61, %v4371_v60 }
  0x60   :  { %1531 = vmatpush.bf16.msra.mxu0 %v4448_v1  ;;  %v6437_v56 = vld [vmem:[%s10332_s2 + $0x664] sm:$0xf]  ;;  %v6280_v63 = vld [vmem:[%s10332_s2 + $0x174] sm:$0xf0]  ;;  %v5008_v1 = vor.u32 %v6405_v54, %v5005_v55  ;;  %v5117_v8 = vld [vmem:[%s10332_s2 + $0x650] sm:$0xf0] }
  0x61   :  { %1545 = vmatpush.bf16.msra.mxu1 %v4576_v5  ;;  %v5136_v2 = vor.u32 %v6437_v56, %v5133_v59  ;;  %v6401_v4 = vld [vmem:[%s10332_s2 + $0x544] sm:$0xf]  ;;  %v4989_v5 = vld [vmem:[%s10332_s2 + $0x550] sm:$0xf0]  ;;  %v4500_v7 = vor.u32 %v6280_v63, %v4499_v62  ;;  %v4339_v22 = vld [vmem:[%s10332_s2 + $0x28] sm:$0xf] }
  0x62   :  { %v4992_v14 = vor.u32 %v6401_v4, %v4989_v5  ;;  %v4973_v18 = vld [vmem:[%s10332_s2 + $0x530] sm:$0xf0]  ;;  %v6429_v19 = vld [vmem:[%s10332_s2 + $0x624] sm:$0xf]  ;;  %v4323_v34 = vld [vmem:[%s10332_s2 + $0x8] sm:$0xf] }
  0x63   :  { %1559 = vmatpush.bf16.msra.mxu2 %v4704_v6  ;;  %1573 = vmatpush.bf16.msra.mxu3 %v4832_v9  ;;  %v6433_v6 = vld [vmem:[%s10332_s2 + $0x644] sm:$0xf]  ;;  %v4355_v9 = vld [vmem:[%s10332_s2 + $0x48] sm:$0xf]  ;;  %v5101_v21 = vld [vmem:[%s10332_s2 + $0x630] sm:$0xf0] }
  0x64   :  { %1580 = vmatpush.bf16.msrb.mxu0 %v5072_v10  ;;  %1546 = vmatmul.bf16.vlgmr.msra.gmra.mxu1 %v7071_v0  ;;  %v6244_v10 = vld [vmem:[%s10332_s2 + $0x54] sm:$0xf0]  ;;  %v5120_v15 = vor.u32 %v6433_v6, %v5117_v8  ;;  %v6393_v28 = vld [vmem:[%s10332_s2 + $0x504] sm:$0xf]  ;;  %v4957_v29 = vld [vmem:[%s10332_s2 + $0x510] sm:$0xf0] }
  0x65   :  { %1594 = vmatpush.bf16.msrb.mxu1 %v5200_v12  ;;  %1532 = vmatmul.bf16.vlgmr.msra.gmra.mxu0 %v7099_v11  ;;  %v4483_v12 = vld [vmem:[%s10332_s2 + $0x148] sm:$0xf]  ;;  %v4356_v16 = vor.u32 %v6244_v10, %v4355_v9  ;;  %v6425_v32 = vld [vmem:[%s10332_s2 + $0x604] sm:$0xf]  ;;  %v5085_v33 = vld [vmem:[%s10332_s2 + $0x610] sm:$0xf0] }
  0x66   :  { %1560 = vmatmul.bf16.vlgmr.msra.gmra.mxu2 %v7126_v23  ;;  %1574 = vmatmul.bf16.vlgmr.msra.gmra.mxu3 %v7276_v37  ;;  %v4691_v40 = vld [vmem:[%s10332_s2 + $0x2e8] sm:$0xf]  ;;  %v6328_v43 = vld [vmem:[%s10332_s2 + $0x2f4] sm:$0xf0]  ;;  %v5088_v49 = vor.u32 %v6425_v32, %v5085_v33 }
  0x67   :  { %1608 = vmatpush.bf16.msrb.mxu2 %v4436_v13  ;;  %1622 = vmatpush.bf16.msrb.mxu3 %v4564_v17  ;;  %v6276_v13 = vld [vmem:[%s10332_s2 + $0x154] sm:$0xf0]  ;;  %v6397_v17 = vld [vmem:[%s10332_s2 + $0x524] sm:$0xf]  ;;  %v4819_v44 = vld [vmem:[%s10332_s2 + $0x3e8] sm:$0xf]  ;;  %v4692_v54 = vor.u32 %v6328_v43, %v4691_v40 }
  0x68   :  { %1581 = vmatpush.bf16.msrb.mxu0 %v5056_v24  ;;  %v4484_v20 = vor.u32 %v6276_v13, %v4483_v12  ;;  %v6240_v24 = vld [vmem:[%s10332_s2 + $0x34] sm:$0xf0]  ;;  %v4976_v27 = vor.u32 %v6397_v17, %v4973_v18  ;;  %v4947_v47 = vld [vmem:[%s10332_s2 + $0x4e8] sm:$0xf] }
  0x69   :  { %1595 = vmatpush.bf16.msrb.mxu1 %v5184_v25  ;;  %v4467_v25 = vld [vmem:[%s10332_s2 + $0x128] sm:$0xf]  ;;  %v4340_v31 = vor.u32 %v6240_v24, %v4339_v22  ;;  %v6360_v46 = vld [vmem:[%s10332_s2 + $0x3f4] sm:$0xf0] }
  0x6a   :  { %v6392_v48 = vld [vmem:[%s10332_s2 + $0x4f4] sm:$0xf0]  ;;  %v4820_v55 = vor.u32 %v6360_v46, %v4819_v44  ;;  %v4803_v60 = vld [vmem:[%s10332_s2 + $0x3c8] sm:$0xf] }
  0x6b   :  { %1609 = vmatpush.bf16.msrb.mxu2 %v4420_v26  ;;  %1623 = vmatpush.bf16.msrb.mxu3 %v4548_v30  ;;  %v6272_v26 = vld [vmem:[%s10332_s2 + $0x134] sm:$0xf0]  ;;  %v5104_v30 = vor.u32 %v6429_v19, %v5101_v21  ;;  %v4948_v56 = vor.u32 %v6392_v48, %v4947_v47  ;;  %v4931_v63 = vld [vmem:[%s10332_s2 + $0x4c8] sm:$0xf] }
  0x6c   :  { %1582 = vmatpush.bf16.msrb.mxu0 %v5040_v36  ;;  %v4468_v35 = vor.u32 %v6272_v26, %v4467_v25  ;;  %v6236_v36 = vld [vmem:[%s10332_s2 + $0x14] sm:$0xf0]  ;;  %v4787_v9 = vld [vmem:[%s10332_s2 + $0x3a8] sm:$0xf] }
  0x6d   :  { %1596 = vmatpush.bf16.msrb.mxu1 %v5168_v38  ;;  %v4451_v38 = vld [vmem:[%s10332_s2 + $0x108] sm:$0xf]  ;;  %v4324_v50 = vor.u32 %v6236_v36, %v4323_v34  ;;  %v6324_v59 = vld [vmem:[%s10332_s2 + $0x2d4] sm:$0xf0] }
  0x6e   :  { %v6356_v62 = vld [vmem:[%s10332_s2 + $0x3d4] sm:$0xf0]  ;;  %v4915_v13 = vld [vmem:[%s10332_s2 + $0x4a8] sm:$0xf] }
  0x6f   :  { %1610 = vmatpush.bf16.msrb.mxu2 %v4404_v39  ;;  %1624 = vmatpush.bf16.msrb.mxu3 %v4532_v45  ;;  %v6268_v39 = vld [vmem:[%s10332_s2 + $0x114] sm:$0xf0]  ;;  %v4960_v45 = vor.u32 %v6393_v28, %v4957_v29  ;;  %v4804_v5 = vor.u32 %v6356_v62, %v4803_v60  ;;  %v4771_v22 = vld [vmem:[%s10332_s2 + $0x388] sm:$0xf] }
  0x70   :  { %1583 = vmatpush.bf16.msrb.mxu0 %v5024_v51  ;;  %v5075_v51 = vld [vmem:[%s10332_s2 + $0x5e8] sm:$0xf]  ;;  %v6320_v8 = vld [vmem:[%s10332_s2 + $0x2b4] sm:$0xf0] }
  0x71   :  { %1597 = vmatpush.bf16.msrb.mxu1 %v5152_v52  ;;  %v6424_v52 = vld [vmem:[%s10332_s2 + $0x5f4] sm:$0xf0]  ;;  %v4899_v26 = vld [vmem:[%s10332_s2 + $0x488] sm:$0xf] }
  0x72   :  { %v5076_v61 = vor.u32 %v6424_v52, %v5075_v51  ;;  %v6352_v12 = vld [vmem:[%s10332_s2 + $0x3b4] sm:$0xf0]  ;;  %v5027_v28 = vld [vmem:[%s10332_s2 + $0x588] sm:$0xf] }
  0x73   :  { %1611 = vmatpush.bf16.msrb.mxu2 %v4388_v53  ;;  %1625 = vmatpush.bf16.msrb.mxu3 %v4516_v58  ;;  %v4452_v53 = vor.u32 %v6268_v39, %v4451_v38  ;;  %v4675_v58 = vld [vmem:[%s10332_s2 + $0x2c8] sm:$0xf]  ;;  %v4788_v18 = vor.u32 %v6352_v12, %v4787_v9  ;;  %v6316_v21 = vld [vmem:[%s10332_s2 + $0x294] sm:$0xf0] }
  0x74   :  { %1584 = vmatpush.bf16.msrb.mxu0 %v5008_v1  ;;  %v6388_v1 = vld [vmem:[%s10332_s2 + $0x4d4] sm:$0xf0]  ;;  %v4676_v4 = vor.u32 %v6324_v59, %v4675_v58  ;;  %v4627_v33 = vld [vmem:[%s10332_s2 + $0x268] sm:$0xf] }
  0x75   :  { %1598 = vmatpush.bf16.msrb.mxu1 %v5136_v2  ;;  %v5059_v2 = vld [vmem:[%s10332_s2 + $0x5c8] sm:$0xf]  ;;  %v4932_v6 = vor.u32 %v6388_v1, %v4931_v63  ;;  %v6348_v25 = vld [vmem:[%s10332_s2 + $0x394] sm:$0xf0] }
  0x76   :  { %v6412_v29 = vld [vmem:[%s10332_s2 + $0x594] sm:$0xf0]  ;;  %v4883_v39 = vld [vmem:[%s10332_s2 + $0x468] sm:$0xf] }
  0x77   :  { %1612 = vmatpush.bf16.msrb.mxu2 %v4372_v3  ;;  %1626 = vmatpush.bf16.msrb.mxu3 %v4500_v7  ;;  %v6420_v3 = vld [vmem:[%s10332_s2 + $0x5d4] sm:$0xf0]  ;;  %v4659_v7 = vld [vmem:[%s10332_s2 + $0x2a8] sm:$0xf]  ;;  %v5028_v36 = vor.u32 %v6412_v29, %v5027_v28 }
  0x78   :  { %1585 = vmatpush.bf16.msrb.mxu0 %v4992_v14  ;;  %v5060_v10 = vor.u32 %v6420_v3, %v5059_v2  ;;  %v6384_v14 = vld [vmem:[%s10332_s2 + $0x4b4] sm:$0xf0]  ;;  %v4660_v17 = vor.u32 %v6320_v8, %v4659_v7  ;;  %v5011_v43 = vld [vmem:[%s10332_s2 + $0x568] sm:$0xf] }
  0x79   :  { %1599 = vmatpush.bf16.msrb.mxu1 %v5120_v15  ;;  %v5043_v15 = vld [vmem:[%s10332_s2 + $0x5a8] sm:$0xf]  ;;  %v4916_v19 = vor.u32 %v6384_v14, %v4915_v13  ;;  %v6312_v34 = vld [vmem:[%s10332_s2 + $0x274] sm:$0xf0] }
  0x7a   :  { %v6344_v38 = vld [vmem:[%s10332_s2 + $0x374] sm:$0xf0]  ;;  %v4611_v48 = vld [vmem:[%s10332_s2 + $0x248] sm:$0xf] }
  0x7b   :  { %1613 = vmatpush.bf16.msrb.mxu2 %v4356_v16  ;;  %1627 = vmatpush.bf16.msrb.mxu3 %v4484_v20  ;;  %v6416_v16 = vld [vmem:[%s10332_s2 + $0x5b4] sm:$0xf0]  ;;  %v4643_v20 = vld [vmem:[%s10332_s2 + $0x288] sm:$0xf] }
  0x7c   :  { %1586 = vmatpush.bf16.msrb.mxu0 %v4976_v27  ;;  %v5044_v24 = vor.u32 %v6416_v16, %v5043_v15  ;;  %v6380_v27 = vld [vmem:[%s10332_s2 + $0x494] sm:$0xf0]  ;;  %v4723_v63 = vld [vmem:[%s10332_s2 + $0x328] sm:$0xf] }
  0x7d   :  { %1600 = vmatpush.bf16.msrb.mxu1 %v5104_v30  ;;  %v4644_v30 = vor.u32 %v6316_v21, %v4643_v20  ;;  %v4900_v32 = vor.u32 %v6380_v27, %v4899_v26  ;;  %v6376_v40 = vld [vmem:[%s10332_s2 + $0x474] sm:$0xf0]  ;;  %v4851_v3 = vld [vmem:[%s10332_s2 + $0x428] sm:$0xf]  ;;  %v6294_v26 = vld [vmem:[%s10332_s2 + $0x1ec] sm:$0xf] }
  0x7e   :  { %v6408_v44 = vld [vmem:[%s10332_s2 + $0x574] sm:$0xf0]  ;;  %v4884_v47 = vor.u32 %v6376_v40, %v4883_v39  ;;  %v4579_v8 = vld [vmem:[%s10332_s2 + $0x208] sm:$0xf]  ;;  %v4565_v27 = vld [vmem:[%s10332_s2 + $0x1f8] sm:$0xf0] }
  0x7f   :  { %1614 = vmatpush.bf16.msrb.mxu2 %v4340_v31  ;;  %1628 = vmatpush.bf16.msrb.mxu3 %v4468_v35  ;;  %v4772_v31 = vor.u32 %v6348_v25, %v4771_v22  ;;  %v4755_v35 = vld [vmem:[%s10332_s2 + $0x368] sm:$0xf]  ;;  %v5012_v51 = vor.u32 %v6408_v44, %v5011_v43  ;;  %v6340_v52 = vld [vmem:[%s10332_s2 + $0x354] sm:$0xf0]  ;;  %v6262_v22 = vld [vmem:[%s10332_s2 + $0xec] sm:$0xf] }
  0x80   :  { %1587 = vmatpush.bf16.msrb.mxu0 %v4960_v45  ;;  %v4628_v45 = vor.u32 %v6312_v34, %v4627_v33  ;;  %v4756_v46 = vor.u32 %v6344_v38, %v4755_v35  ;;  %v6304_v62 = vld [vmem:[%s10332_s2 + $0x234] sm:$0xf0]  ;;  %v4707_v13 = vld [vmem:[%s10332_s2 + $0x308] sm:$0xf]  ;;  %v4437_v25 = vld [vmem:[%s10332_s2 + $0xf8] sm:$0xf0]  ;;  %v4568_v35 = vor.u32 %v6294_v26, %v4565_v27 }
  0x81   :  { %1601 = vmatpush.bf16.msrb.mxu1 %v5088_v49  ;;  %v6308_v49 = vld [vmem:[%s10332_s2 + $0x254] sm:$0xf0]  ;;  %v4835_v15 = vld [vmem:[%s10332_s2 + $0x408] sm:$0xf]  ;;  %v4440_v34 = vor.u32 %v6262_v22, %v4437_v25  ;;  %v6258_v39 = vld [vmem:[%s10332_s2 + $0xcc] sm:$0xf] }
  0x82   :  { %v4612_v58 = vor.u32 %v6308_v49, %v4611_v48  ;;  %v6336_v2 = vld [vmem:[%s10332_s2 + $0x334] sm:$0xf0]  ;;  %v5203_v20 = vld [vmem:[%s10332_s2 + $0x6e8] sm:$0xf]  ;;  %v4421_v43 = vld [vmem:[%s10332_s2 + $0xd8] sm:$0xf0] }
  0x83   :  { %1615 = vmatpush.bf16.msrb.mxu2 %v4324_v50  ;;  %1629 = vmatpush.bf16.msrb.mxu3 %v4452_v53  ;;  %v4739_v50 = vld [vmem:[%s10332_s2 + $0x348] sm:$0xf]  ;;  %v6300_v9 = vld [vmem:[%s10332_s2 + $0x214] sm:$0xf0]  ;;  %v6290_v44 = vld [vmem:[%s10332_s2 + $0x1cc] sm:$0xf]  ;;  %v4424_v49 = vor.u32 %v6258_v39, %v4421_v43 }
  0x84   :  { %1636 = vmatpush.bf16.msra.mxu0 %v4692_v54  ;;  %1602 = vmatmul.bf16.vlgmr.msrb.gmra.mxu1 %v7287_v41  ;;  %v4867_v53 = vld [vmem:[%s10332_s2 + $0x448] sm:$0xf]  ;;  %v6372_v54 = vld [vmem:[%s10332_s2 + $0x454] sm:$0xf0]  ;;  %v4740_v59 = vor.u32 %v6340_v52, %v4739_v50  ;;  %v4629_v22 = vld [vmem:[%s10332_s2 + $0x278] sm:$0xf0] }
  0x85   :  { %1650 = vmatpush.bf16.msra.mxu1 %v4820_v55  ;;  %1588 = vmatmul.bf16.vlgmr.msrb.gmra.mxu0 %v7289_v42  ;;  %v4995_v55 = vld [vmem:[%s10332_s2 + $0x548] sm:$0xf]  ;;  %v4868_v60 = vor.u32 %v6372_v54, %v4867_v53  ;;  %v6332_v14 = vld [vmem:[%s10332_s2 + $0x314] sm:$0xf0]  ;;  %v6254_v53 = vld [vmem:[%s10332_s2 + $0xac] sm:$0xf] }
  0x86   :  { %1616 = vmatmul.bf16.vlgmr.msrb.gmra.mxu2 %v7057_v57  ;;  %1630 = vmatmul.bf16.vlgmr.msrb.gmra.mxu3 %v7099_v11  ;;  %v6456_v21 = vld [vmem:[%s10332_s2 + $0x6f4] sm:$0xf0]  ;;  %v4708_v28 = vor.u32 %v6332_v14, %v4707_v13  ;;  %v5139_v14 = vld [vmem:[%s10332_s2 + $0x668] sm:$0xf] }
  0x87   :  { %1664 = vmatpush.bf16.msra.mxu2 %v4948_v56  ;;  %1678 = vmatpush.bf16.msra.mxu3 %v5076_v61  ;;  %v6404_v56 = vld [vmem:[%s10332_s2 + $0x554] sm:$0xf0]  ;;  %v4595_v61 = vld [vmem:[%s10332_s2 + $0x228] sm:$0xf]  ;;  %v5204_v33 = vor.u32 %v6456_v21, %v5203_v20  ;;  %v4501_v20 = vld [vmem:[%s10332_s2 + $0x178] sm:$0xf0] }
  0x88   :  { %1637 = vmatpush.bf16.msra.mxu0 %v4676_v4  ;;  %v4996_v1 = vor.u32 %v6404_v56, %v4995_v55  ;;  %v6368_v4 = vld [vmem:[%s10332_s2 + $0x434] sm:$0xf0]  ;;  %v4596_v7 = vor.u32 %v6304_v62, %v4595_v61  ;;  %v4405_v55 = vld [vmem:[%s10332_s2 + $0xb8] sm:$0xf0]  ;;  %v6286_v56 = vld [vmem:[%s10332_s2 + $0x1ac] sm:$0xf] }
  0x89   :  { %1651 = vmatpush.bf16.msra.mxu1 %v4804_v5  ;;  %v4979_v5 = vld [vmem:[%s10332_s2 + $0x528] sm:$0xf]  ;;  %v4852_v12 = vor.u32 %v6368_v4, %v4851_v3  ;;  %v6452_v38 = vld [vmem:[%s10332_s2 + $0x6d4] sm:$0xf0]  ;;  %v4408_v62 = vor.u32 %v6254_v53, %v4405_v55  ;;  %v6250_v3 = vld [vmem:[%s10332_s2 + $0x8c] sm:$0xf] }
  0x8a   :  { %v6448_v52 = vld [vmem:[%s10332_s2 + $0x6b4] sm:$0xf0]  ;;  %v6310_v21 = vld [vmem:[%s10332_s2 + $0x26c] sm:$0xf]  ;;  %v5123_v27 = vld [vmem:[%s10332_s2 + $0x648] sm:$0xf] }
  0x8b   :  { %1665 = vmatpush.bf16.msra.mxu2 %v4932_v6  ;;  %1679 = vmatpush.bf16.msra.mxu3 %v5060_v10  ;;  %v6400_v6 = vld [vmem:[%s10332_s2 + $0x534] sm:$0xf0]  ;;  %v4724_v10 = vor.u32 %v6336_v2, %v4723_v63 }
  0x8c   :  { %1638 = vmatpush.bf16.msra.mxu0 %v4660_v17  ;;  %v4980_v16 = vor.u32 %v6400_v6, %v4979_v5  ;;  %v6364_v17 = vld [vmem:[%s10332_s2 + $0x414] sm:$0xf0]  ;;  %v4389_v5 = vld [vmem:[%s10332_s2 + $0x98] sm:$0xf0]  ;;  %v6282_v6 = vld [vmem:[%s10332_s2 + $0x18c] sm:$0xf] }
  0x8d   :  { %1652 = vmatpush.bf16.msra.mxu1 %v4788_v18  ;;  %v4963_v18 = vld [vmem:[%s10332_s2 + $0x508] sm:$0xf]  ;;  %v4836_v29 = vor.u32 %v6364_v17, %v4835_v15  ;;  %v6444_v2 = vld [vmem:[%s10332_s2 + $0x694] sm:$0xf0] }
  0x8e   :  { %v6440_v15 = vld [vmem:[%s10332_s2 + $0x674] sm:$0xf0] }
  0x8f   :  { %1666 = vmatpush.bf16.msra.mxu2 %v4916_v19  ;;  %1680 = vmatpush.bf16.msra.mxu3 %v5044_v24  ;;  %v6396_v19 = vld [vmem:[%s10332_s2 + $0x514] sm:$0xf0]  ;;  %v4580_v24 = vor.u32 %v6300_v9, %v4579_v8  ;;  %v6314_v8 = vld [vmem:[%s10332_s2 + $0x28c] sm:$0xf]  ;;  %v4645_v9 = vld [vmem:[%s10332_s2 + $0x298] sm:$0xf0] }
  0x90   :  { %1639 = vmatpush.bf16.msra.mxu0 %v4644_v30  ;;  %v6326_v30 = vld [vmem:[%s10332_s2 + $0x2ec] sm:$0xf]  ;;  %v4648_v17 = vor.u32 %v6314_v8, %v4645_v9  ;;  %v6432_v43 = vld [vmem:[%s10332_s2 + $0x634] sm:$0xf0] }
  0x91   :  { %1653 = vmatpush.bf16.msra.mxu1 %v4772_v31  ;;  %v4693_v31 = vld [vmem:[%s10332_s2 + $0x2f8] sm:$0xf0]  ;;  %v6428_v53 = vld [vmem:[%s10332_s2 + $0x614] sm:$0xf0] }
  0x92   :  { %v4696_v40 = vor.u32 %v6326_v30, %v4693_v31  ;;  %v4632_v30 = vor.u32 %v6310_v21, %v4629_v22  ;;  %v4357_v31 = vld [vmem:[%s10332_s2 + $0x58] sm:$0xf0]  ;;  %v6418_v22 = vld [vmem:[%s10332_s2 + $0x5cc] sm:$0xf] }
  0x93   :  { %1667 = vmatpush.bf16.msra.mxu2 %v4900_v32  ;;  %1681 = vmatpush.bf16.msra.mxu3 %v5028_v36  ;;  %v4964_v32 = vor.u32 %v6396_v19, %v4963_v18  ;;  %v5187_v36 = vld [vmem:[%s10332_s2 + $0x6c8] sm:$0xf]  ;;  %v4373_v18 = vld [vmem:[%s10332_s2 + $0x78] sm:$0xf0]  ;;  %v6278_v19 = vld [vmem:[%s10332_s2 + $0x16c] sm:$0xf] }
  0x94   :  { %1640 = vmatpush.bf16.msra.mxu0 %v4628_v45  ;;  %v4549_v45 = vld [vmem:[%s10332_s2 + $0x1d8] sm:$0xf0]  ;;  %v5188_v48 = vor.u32 %v6452_v38, %v5187_v36  ;;  %v4504_v26 = vor.u32 %v6278_v19, %v4501_v20  ;;  %v6386_v19 = vld [vmem:[%s10332_s2 + $0x4cc] sm:$0xf] }
  0x95   :  { %1654 = vmatpush.bf16.msra.mxu1 %v4756_v46  ;;  %v6322_v46 = vld [vmem:[%s10332_s2 + $0x2cc] sm:$0xf]  ;;  %v4552_v50 = vor.u32 %v6290_v44, %v4549_v45  ;;  %v4933_v21 = vld [vmem:[%s10332_s2 + $0x4d8] sm:$0xf0] }
  0x96   :  { %v6238_v44 = vld [vmem:[%s10332_s2 + $0x2c] sm:$0xf] }
  0x97   :  { %1668 = vmatpush.bf16.msra.mxu2 %v4884_v47  ;;  %1682 = vmatpush.bf16.msra.mxu3 %v5012_v51  ;;  %v4677_v47 = vld [vmem:[%s10332_s2 + $0x2d8] sm:$0xf0]  ;;  %v5171_v51 = vld [vmem:[%s10332_s2 + $0x6a8] sm:$0xf] }
  0x98   :  { %1641 = vmatpush.bf16.msra.mxu0 %v4612_v58  ;;  %v4680_v54 = vor.u32 %v6322_v46, %v4677_v47  ;;  %v4533_v58 = vld [vmem:[%s10332_s2 + $0x1b8] sm:$0xf0]  ;;  %v5172_v61 = vor.u32 %v6448_v52, %v5171_v51  ;;  %v6270_v47 = vld [vmem:[%s10332_s2 + $0x12c] sm:$0xf]  ;;  %v5091_v52 = vld [vmem:[%s10332_s2 + $0x608] sm:$0xf] }
  0x99   :  { %1655 = vmatpush.bf16.msra.mxu1 %v4740_v59  ;;  %v6318_v59 = vld [vmem:[%s10332_s2 + $0x2ac] sm:$0xf]  ;;  %v4536_v63 = vor.u32 %v6286_v56, %v4533_v58  ;;  %v4341_v46 = vld [vmem:[%s10332_s2 + $0x38] sm:$0xf0] }
  0x9a   :  { %v6234_v56 = vld [vmem:[%s10332_s2 + $0xc] sm:$0xf]  ;;  %v4325_v58 = vld [vmem:[%s10332_s2 + $0x18] sm:$0xf0] }
  0x9b   :  { %1669 = vmatpush.bf16.msra.mxu2 %v4868_v60  ;;  %1683 = vmatpush.bf16.msra.mxu3 %v4996_v1  ;;  %v4661_v60 = vld [vmem:[%s10332_s2 + $0x2b8] sm:$0xf0]  ;;  %v5155_v1 = vld [vmem:[%s10332_s2 + $0x688] sm:$0xf]  ;;  %v4328_v8 = vor.u32 %v6234_v56, %v4325_v58  ;;  %v6374_v56 = vld [vmem:[%s10332_s2 + $0x46c] sm:$0xf] }
  0x9c   :  { %1642 = vmatpush.bf16.msra.mxu0 %v4596_v7  ;;  %v4664_v4 = vor.u32 %v6318_v59, %v4661_v60  ;;  %v4517_v7 = vld [vmem:[%s10332_s2 + $0x198] sm:$0xf0]  ;;  %v6266_v59 = vld [vmem:[%s10332_s2 + $0x10c] sm:$0xf] }
  0x9d   :  { %1656 = vmatpush.bf16.msra.mxu1 %v4724_v10  ;;  %v5156_v10 = vor.u32 %v6444_v2, %v5155_v1  ;;  %v4520_v13 = vor.u32 %v6282_v6, %v4517_v7  ;;  %v6358_v1 = vld [vmem:[%s10332_s2 + $0x3ec] sm:$0xf]  ;;  %v4821_v2 = vld [vmem:[%s10332_s2 + $0x3f8] sm:$0xf0] }
  0x9e   :  { %v6422_v6 = vld [vmem:[%s10332_s2 + $0x5ec] sm:$0xf]  ;;  %v5077_v7 = vld [vmem:[%s10332_s2 + $0x5f8] sm:$0xf0] }
  0x9f   :  { %1670 = vmatpush.bf16.msra.mxu2 %v4852_v12  ;;  %1684 = vmatpush.bf16.msra.mxu3 %v4980_v16  ;;  %v4392_v12 = vor.u32 %v6250_v3, %v4389_v5  ;;  %v6246_v16 = vld [vmem:[%s10332_s2 + $0x6c] sm:$0xf]  ;;  %v4949_v5 = vld [vmem:[%s10332_s2 + $0x4f8] sm:$0xf0] }
  0xa0   :  { %1643 = vmatpush.bf16.msra.mxu0 %v4580_v24  ;;  %v5140_v24 = vor.u32 %v6440_v15, %v5139_v14  ;;  %v4376_v25 = vor.u32 %v6246_v16, %v4373_v18  ;;  %v6390_v3 = vld [vmem:[%s10332_s2 + $0x4ec] sm:$0xf]  ;;  %v4824_v14 = vor.u32 %v6358_v1, %v4821_v2  ;;  %v5080_v16 = vor.u32 %v6422_v6, %v5077_v7  ;;  %v4805_v18 = vld [vmem:[%s10332_s2 + $0x3d8] sm:$0xf0] }
  0xa1   :  { %1657 = vmatpush.bf16.msra.mxu1 %v4708_v28  ;;  %v6436_v28 = vld [vmem:[%s10332_s2 + $0x654] sm:$0xf0]  ;;  %v4952_v15 = vor.u32 %v6390_v3, %v4949_v5  ;;  %v5141_v1 = vld [vmem:[%s10332_s2 + $0x678] sm:$0xf0]  ;;  %v6338_v6 = vld [vmem:[%s10332_s2 + $0x34c] sm:$0xf] }
  0xa2   :  { %v5124_v36 = vor.u32 %v6436_v28, %v5123_v27  ;;  %v4936_v28 = vor.u32 %v6386_v19, %v4933_v21  ;;  %v4741_v7 = vld [vmem:[%s10332_s2 + $0x358] sm:$0xf0]  ;;  %v6334_v19 = vld [vmem:[%s10332_s2 + $0x32c] sm:$0xf] }
  0xa3   :  { %1671 = vmatpush.bf16.msra.mxu2 %v4836_v29  ;;  %1685 = vmatpush.bf16.msra.mxu3 %v4964_v32  ;;  %v6242_v29 = vld [vmem:[%s10332_s2 + $0x4c] sm:$0xf] }
  0xa4   :  { %1692 = vmatpush.bf16.msrb.mxu0 %v5204_v33  ;;  %1658 = vmatmul.bf16.vlgmr.msra.gmra.mxu1 %v7126_v23  ;;  %v6274_v32 = vld [vmem:[%s10332_s2 + $0x14c] sm:$0xf]  ;;  %v4485_v33 = vld [vmem:[%s10332_s2 + $0x158] sm:$0xf0]  ;;  %v4360_v38 = vor.u32 %v6242_v29, %v4357_v31 }
  0xa5   :  { %1706 = vmatpush.bf16.msrb.mxu1 %v4440_v34  ;;  %1644 = vmatmul.bf16.vlgmr.msra.gmra.mxu0 %v7071_v0  ;;  %v6306_v34 = vld [vmem:[%s10332_s2 + $0x24c] sm:$0xf]  ;;  %v4488_v39 = vor.u32 %v6274_v32, %v4485_v33  ;;  %v4789_v31 = vld [vmem:[%s10332_s2 + $0x3b8] sm:$0xf0] }
  0xa6   :  { %1672 = vmatmul.bf16.vlgmr.msra.gmra.mxu2 %v7276_v37  ;;  %1686 = vmatmul.bf16.vlgmr.msra.gmra.mxu3 %v7289_v42  ;;  %v6382_v32 = vld [vmem:[%s10332_s2 + $0x4ac] sm:$0xf] }
  0xa7   :  { %1720 = vmatpush.bf16.msrb.mxu2 %v4568_v35  ;;  %1734 = vmatpush.bf16.msrb.mxu3 %v4696_v40  ;;  %v4613_v35 = vld [vmem:[%s10332_s2 + $0x258] sm:$0xf0]  ;;  %v5107_v40 = vld [vmem:[%s10332_s2 + $0x628] sm:$0xf]  ;;  %v6366_v21 = vld [vmem:[%s10332_s2 + $0x42c] sm:$0xf] }
  0xa8   :  { %1693 = vmatpush.bf16.msrb.mxu0 %v5188_v48  ;;  %v4616_v45 = vor.u32 %v6306_v34, %v4613_v35  ;;  %v4469_v48 = vld [vmem:[%s10332_s2 + $0x138] sm:$0xf0]  ;;  %v5108_v51 = vor.u32 %v6432_v43, %v5107_v40  ;;  %v6414_v35 = vld [vmem:[%s10332_s2 + $0x5ac] sm:$0xf] }
  0xa9   :  { %1707 = vmatpush.bf16.msrb.mxu1 %v4424_v49  ;;  %v6302_v49 = vld [vmem:[%s10332_s2 + $0x22c] sm:$0xf]  ;;  %v4472_v55 = vor.u32 %v6270_v47, %v4469_v48  ;;  %v4917_v34 = vld [vmem:[%s10332_s2 + $0x4b8] sm:$0xf0] }
  0xaa   :  { %v4920_v43 = vor.u32 %v6382_v32, %v4917_v34  ;;  %v6410_v47 = vld [vmem:[%s10332_s2 + $0x58c] sm:$0xf]  ;;  %v5029_v48 = vld [vmem:[%s10332_s2 + $0x598] sm:$0xf0] }
  0xab   :  { %1721 = vmatpush.bf16.msrb.mxu2 %v4552_v50  ;;  %1735 = vmatpush.bf16.msrb.mxu3 %v4680_v54  ;;  %v4597_v50 = vld [vmem:[%s10332_s2 + $0x238] sm:$0xf0]  ;;  %v4344_v54 = vor.u32 %v6238_v44, %v4341_v46  ;;  %v8159_v2 = vpop.f32.mrf.mxu1  ;;  %v6330_v34 = vld [vmem:[%s10332_s2 + $0x30c] sm:$0xf] }
  0xac   :  { %1694 = vmatpush.bf16.msrb.mxu0 %v5172_v61  ;;  %v4600_v60 = vor.u32 %v6302_v49, %v4597_v50  ;;  %v4453_v61 = vld [vmem:[%s10332_s2 + $0x118] sm:$0xf0]  ;;  %v6442_v49 = vld [vmem:[%s10332_s2 + $0x68c] sm:$0xf] }
  0xad   :  { %1708 = vmatpush.bf16.msrb.mxu1 %v4408_v62  ;;  %v6298_v62 = vld [vmem:[%s10332_s2 + $0x20c] sm:$0xf]  ;;  %v4456_v9 = vor.u32 %v6266_v59, %v4453_v61  ;;  %v5157_v50 = vld [vmem:[%s10332_s2 + $0x698] sm:$0xf0] }
  0xae   :  { %v5160_v58 = vor.u32 %v6442_v49, %v5157_v50  ;;  %v4885_v59 = vld [vmem:[%s10332_s2 + $0x478] sm:$0xf0]  ;;  %v1842_v50 = vld [vmem:[%s10335_s4 + $0xf0] sm:$0xff] }
  0xaf   :  { %1722 = vmatpush.bf16.msrb.mxu2 %v4536_v63  ;;  %1736 = vmatpush.bf16.msrb.mxu3 %v4664_v4  ;;  %v4581_v63 = vld [vmem:[%s10332_s2 + $0x218] sm:$0xf0]  ;;  %v5092_v4 = vor.u32 %v6428_v53, %v5091_v52  ;;  %v5032_v53 = vor.u32 %v6410_v47, %v5029_v48 }
  0xb0   :  { %1695 = vmatpush.bf16.msrb.mxu0 %v5156_v10  ;;  %v6454_v10 = vld [vmem:[%s10332_s2 + $0x6ec] sm:$0xf]  ;;  %v5013_v61 = vld [vmem:[%s10332_s2 + $0x578] sm:$0xf0] }
  0xb1   :  { %1709 = vmatpush.bf16.msrb.mxu1 %v4392_v12  ;;  %v5205_v12 = vld [vmem:[%s10332_s2 + $0x6f8] sm:$0xf0] }
  0xb2   :  { %v5208_v20 = vor.u32 %v6454_v10, %v5205_v12  ;;  %v4869_v10 = vld [vmem:[%s10332_s2 + $0x458] sm:$0xf0]  ;;  %v6402_v12 = vld [vmem:[%s10332_s2 + $0x54c] sm:$0xf] }
  0xb3   :  { %1723 = vmatpush.bf16.msrb.mxu2 %v4520_v13  ;;  %1737 = vmatpush.bf16.msrb.mxu3 %v4648_v17  ;;  %v4584_v13 = vor.u32 %v6298_v62, %v4581_v63  ;;  %v6354_v17 = vld [vmem:[%s10332_s2 + $0x3cc] sm:$0xf]  ;;  %v8151_v62 = vpop.f32.mrf.mxu0 }
  0xb4   :  { %1696 = vmatpush.bf16.msrb.mxu0 %v5140_v24  ;;  %v5061_v24 = vld [vmem:[%s10332_s2 + $0x5d8] sm:$0xf0]  ;;  %v4808_v27 = vor.u32 %v6354_v17, %v4805_v18  ;;  %v6438_v63 = vld [vmem:[%s10332_s2 + $0x66c] sm:$0xf] }
  0xb5   :  { %1710 = vmatpush.bf16.msrb.mxu1 %v4376_v25  ;;  %v6450_v25 = vld [vmem:[%s10332_s2 + $0x6cc] sm:$0xf]  ;;  %v5064_v29 = vor.u32 %v6418_v22, %v5061_v24  ;;  %v4853_v24 = vld [vmem:[%s10332_s2 + $0x438] sm:$0xf0] }
  0xb6   :  { %v4856_v32 = vor.u32 %v6366_v21, %v4853_v24 }
  0xb7   :  { %1724 = vmatpush.bf16.msrb.mxu2 %v4504_v26  ;;  %1738 = vmatpush.bf16.msrb.mxu3 %v4632_v30  ;;  %v5189_v26 = vld [vmem:[%s10332_s2 + $0x6d8] sm:$0xf0]  ;;  %v6350_v30 = vld [vmem:[%s10332_s2 + $0x3ac] sm:$0xf] }
  0xb8   :  { %1697 = vmatpush.bf16.msrb.mxu0 %v5124_v36  ;;  %v5192_v33 = vor.u32 %v6450_v25, %v5189_v26  ;;  %v5045_v36 = vld [vmem:[%s10332_s2 + $0x5b8] sm:$0xf0]  ;;  %v4792_v40 = vor.u32 %v6350_v30, %v4789_v31  ;;  %v6398_v25 = vld [vmem:[%s10332_s2 + $0x52c] sm:$0xf] }
  0xb9   :  { %1711 = vmatpush.bf16.msrb.mxu1 %v4360_v38  ;;  %v6446_v38 = vld [vmem:[%s10332_s2 + $0x6ac] sm:$0xf]  ;;  %v5048_v44 = vor.u32 %v6414_v35, %v5045_v36  ;;  %v4981_v26 = vld [vmem:[%s10332_s2 + $0x538] sm:$0xf0] }
  0xba   :  { %v4709_v35 = vld [vmem:[%s10332_s2 + $0x318] sm:$0xf0]  ;;  %v6362_v36 = vld [vmem:[%s10332_s2 + $0x40c] sm:$0xf] }
  0xbb   :  { %1725 = vmatpush.bf16.msrb.mxu2 %v4488_v39  ;;  %1739 = vmatpush.bf16.msrb.mxu3 %v4616_v45  ;;  %v5173_v39 = vld [vmem:[%s10332_s2 + $0x6b8] sm:$0xf0]  ;;  %v8211_v31 = vpop.f32.mrf.mxu0 }
  0xbc   :  { %1698 = vmatpush.bf16.msrb.mxu0 %v5108_v51  ;;  %v4773_v45 = vld [vmem:[%s10332_s2 + $0x398] sm:$0xf0]  ;;  %v5176_v46 = vor.u32 %v6446_v38, %v5173_v39  ;;  %v8222_v38 = vpop.f32.mrf.mxu1 }
  0xbd   :  { %1712 = vmatpush.bf16.msrb.mxu1 %v4344_v54  ;;  %v6342_v54 = vld [vmem:[%s10332_s2 + $0x36c] sm:$0xf] }
  0xbf   :  { %1726 = vmatpush.bf16.msrb.mxu2 %v4472_v55  ;;  %1740 = vmatpush.bf16.msrb.mxu3 %v4600_v60  ;;  %v4757_v55 = vld [vmem:[%s10332_s2 + $0x378] sm:$0xf0]  ;;  %v6406_v60 = vld [vmem:[%s10332_s2 + $0x56c] sm:$0xf] }
  0xc0   :  { %1699 = vmatpush.bf16.msrb.mxu0 %v5092_v4  ;;  %v4760_v3 = vor.u32 %v6342_v54, %v4757_v55  ;;  %v4888_v4 = vor.u32 %v6374_v56, %v4885_v59  ;;  %v5016_v5 = vor.u32 %v6406_v60, %v5013_v61  ;;  %v1840_v54 = vld [vmem:[%s10335_s4 + $0xe0] sm:$0xff]  ;;  %v1838_v60 = vld [vmem:[%s10335_s4 + $0xd0] sm:$0xff] }
  0xc1   :  { %1713 = vmatpush.bf16.msrb.mxu1 %v4328_v8  ;;  %v6370_v8 = vld [vmem:[%s10332_s2 + $0x44c] sm:$0xf]  ;;  %v1872_v56 = vld [vmem:[%s10335_s4 + $0x1e0] sm:$0xff] }
  0xc2   :  { %v4872_v17 = vor.u32 %v6370_v8, %v4869_v10  ;;  %v1862_v8 = vld [vmem:[%s10335_s4 + $0x190] sm:$0xff] }
  0xc3   :  { %1727 = vmatpush.bf16.msrb.mxu2 %v4456_v9  ;;  %1741 = vmatpush.bf16.msrb.mxu3 %v4584_v13  ;;  %v5144_v9 = vor.u32 %v6438_v63, %v5141_v1  ;;  %v4997_v13 = vld [vmem:[%s10332_s2 + $0x558] sm:$0xf0]  ;;  %v1477_v55 = vpop.f32.mrf.mxu0  ;;  %v1866_v63 = vld [vmem:[%s10335_s4 + $0x1b0] sm:$0xff]  ;;  %v1832_v1 = vld [vmem:[%s10335_s4 + $0xa0] sm:$0xff] }
  0xc4   :  { %1748 = vmatpush.bf16.msra.mxu0 %v4824_v14  ;;  %1714 = vmatmul.bf16.vlgmr.msrb.gmra.mxu1 %v7057_v57  ;;  %v4901_v57 = vld [vmem:[%s10332_s2 + $0x498] sm:$0xf0]  ;;  %v6434_v14 = vld [vmem:[%s10332_s2 + $0x64c] sm:$0xf]  ;;  %v5000_v18 = vor.u32 %v6402_v12, %v4997_v13  ;;  %v1491_v59 = vpop.f32.mrf.mxu1  ;;  %v1828_v12 = vld [vmem:[%s10335_s4 + $0x80] sm:$0xff] }
  0xc5   :  { %1762 = vmatpush.bf16.msra.mxu1 %v4952_v15  ;;  %1700 = vmatmul.bf16.vlgmr.msrb.gmra.mxu0 %v7287_v41  ;;  %v5125_v15 = vld [vmem:[%s10332_s2 + $0x658] sm:$0xf0]  ;;  %v1860_v13 = vld [vmem:[%s10335_s4 + $0x180] sm:$0xff] }
  0xc6   :  { %1728 = vmatmul.bf16.vlgmr.msrb.gmra.mxu2 %v7099_v11  ;;  %1742 = vmatmul.bf16.vlgmr.msrb.gmra.mxu3 %v7071_v0  ;;  %v6346_v11 = vld [vmem:[%s10332_s2 + $0x38c] sm:$0xf]  ;;  %v5128_v22 = vor.u32 %v6434_v14, %v5125_v15  ;;  %v1826_v15 = vld [vmem:[%s10335_s4 + $0x70] sm:$0xff] }
  0xc7   :  { %1776 = vmatpush.bf16.msra.mxu2 %v5080_v16  ;;  %1790 = vmatpush.bf16.msra.mxu3 %v5208_v20  ;;  %v6378_v0 = vld [vmem:[%s10332_s2 + $0x48c] sm:$0xf]  ;;  %v4776_v51 = vor.u32 %v6346_v11, %v4773_v45  ;;  %v4744_v16 = vor.u32 %v6338_v6, %v4741_v7  ;;  %v4725_v20 = vld [vmem:[%s10332_s2 + $0x338] sm:$0xf0]  ;;  %v8233_v11 = vpop.f32.mrf.mxu3 }
  0xc8   :  { %1749 = vmatpush.bf16.msra.mxu0 %v4808_v27  ;;  %v4904_v52 = vor.u32 %v6378_v0, %v4901_v57  ;;  %v8203_v27 = vpop.f32.mrf.mxu2  ;;  %v4728_v30 = vor.u32 %v6334_v19, %v4725_v20  ;;  %v6426_v45 = vld [vmem:[%s10332_s2 + $0x60c] sm:$0xf]  ;;  %v5093_v0 = vld [vmem:[%s10332_s2 + $0x618] sm:$0xf0]  ;;  %v8244_v57 = vld [vmem:[%s10334_s3] sm:$0xf] }
  0xc9   :  { %1763 = vmatpush.bf16.msra.mxu1 %v4936_v28  ;;  %v6430_v28 = vld [vmem:[%s10332_s2 + $0x62c] sm:$0xf]  ;;  %v5096_v49 = vor.u32 %v6426_v45, %v5093_v0  ;;  %v1824_v19 = vld [vmem:[%s10335_s4 + $0x60] sm:$0xff]  ;;  %v1846_v0 = vld [vmem:[%s10335_s4 + $0x110] sm:$0xff] }
  0xca   :  { %v1856_v20 = vld [vmem:[%s10335_s4 + $0x160] sm:$0xff] }
  0xcb   :  { %1777 = vmatpush.bf16.msra.mxu2 %v5064_v29  ;;  %1791 = vmatpush.bf16.msra.mxu3 %v5192_v33  ;;  %v5109_v29 = vld [vmem:[%s10332_s2 + $0x638] sm:$0xf0]  ;;  %v4984_v33 = vor.u32 %v6398_v25, %v4981_v26  ;;  %v1479_v6 = vpop.f32.mrf.mxu0  ;;  %v1854_v26 = vld [vmem:[%s10335_s4 + $0x150] sm:$0xff] }
  0xcc   :  { %1750 = vmatpush.bf16.msra.mxu0 %v4792_v40  ;;  %v5112_v39 = vor.u32 %v6430_v28, %v5109_v29  ;;  %v4837_v40 = vld [vmem:[%s10332_s2 + $0x418] sm:$0xf0]  ;;  %v8299_v10 = vpop.f32.mrf.mxu1 }
  0xcd   :  { %1764 = vmatpush.bf16.msra.mxu1 %v4920_v43  ;;  %v6394_v43 = vld [vmem:[%s10332_s2 + $0x50c] sm:$0xf]  ;;  %v4840_v47 = vor.u32 %v6362_v36, %v4837_v40  ;;  %v1848_v40 = vld [vmem:[%s10335_s4 + $0x120] sm:$0xff] }
  0xcf   :  { %1778 = vmatpush.bf16.msra.mxu2 %v5048_v44  ;;  %1792 = vmatpush.bf16.msra.mxu3 %v5176_v46  ;;  %v4965_v44 = vld [vmem:[%s10332_s2 + $0x518] sm:$0xf0]  ;;  %v4712_v46 = vor.u32 %v6330_v34, %v4709_v35  ;;  %v1465_v61 = vpop.f32.mrf.mxu3  ;;  %v1818_v34 = vld [vmem:[%s10335_s4 + $0x30] sm:$0xff] }
  0xd0   :  { %1751 = vmatpush.bf16.msra.mxu0 %v4776_v51  ;;  %v4968_v48 = vor.u32 %v6394_v43, %v4965_v44  ;;  %v284_v51 = vperm.slane %v8244_v57, 0  ;;  %v1850_v35 = vld [vmem:[%s10335_s4 + $0x130] sm:$0xff] }
  0xd1   :  { %1765 = vmatpush.bf16.msra.mxu1 %v4904_v52  ;;  %v1874_v52 = vld [vmem:[%s10335_s4 + $0x1f0] sm:$0xff] }
  0xd2   :  { %v1906_v43 = vld [vmem:[%s10335_s4 + $0x2f0] sm:$0xff] }
  0xd3   :  { %1779 = vmatpush.bf16.msra.mxu2 %v5032_v53  ;;  %1793 = vmatpush.bf16.msra.mxu3 %v5160_v58  ;;  %v8253_v53 = vpop.f32.mrf.mxu2  ;;  %v1422_v58 = vadd.f32 %v8151_v62, %v284_v51  ;;  %v1836_v62 = vld [vmem:[%s10335_s4 + $0xc0] sm:$0xff] }
  0xd4   :  { %1752 = vmatpush.bf16.msra.mxu0 %v4760_v3 }
  0xd5   :  { %1766 = vmatpush.bf16.msra.mxu1 %v4888_v4 }
  0xd7   :  { %1780 = vmatpush.bf16.msra.mxu2 %v5016_v5  ;;  %1794 = vmatpush.bf16.msra.mxu3 %v5144_v9  ;;  %v1830_v5 = vld [vmem:[%s10335_s4 + $0x90] sm:$0xff]  ;;  %v1519_v7 = vpop.f32.mrf.mxu3  ;;  %v1424_v9 = vadd.f32 %v8211_v31, %v284_v51  ;;  %v1844_v51 = vld [vmem:[%s10335_s4 + $0x100] sm:$0xff] }
  0xd8   :  { %1753 = vmatpush.bf16.msra.mxu0 %v4744_v16  ;;  %v1858_v16 = vld [vmem:[%s10335_s4 + $0x170] sm:$0xff] }
  0xd9   :  { %1767 = vmatpush.bf16.msra.mxu1 %v4872_v17  ;;  %v1438_v17 = vadd.f32 %v8222_v38, %v1424_v9  ;;  %v1894_v9 = vld [vmem:[%s10335_s4 + $0x290] sm:$0xff] }
  0xdb   :  { %1781 = vmatpush.bf16.msra.mxu2 %v5000_v18  ;;  %1795 = vmatpush.bf16.msra.mxu3 %v5128_v22  ;;  %v1505_v3 = vpop.f32.mrf.mxu2  ;;  %v285_v18 = vperm.slane %v8244_v57, 1  ;;  %v1822_v22 = vld [vmem:[%s10335_s4 + $0x50] sm:$0xff] }
  0xdc   :  { %1754 = vmatpush.bf16.msra.mxu0 %v4728_v30  ;;  %v1820_v30 = vld [vmem:[%s10335_s4 + $0x40] sm:$0xff] }
  0xdd   :  { %1768 = vmatpush.bf16.msra.mxu1 %v4856_v32  ;;  %v1520_v28 = vadd.f32 %v1519_v7, %v285_v18  ;;  %v1852_v32 = vld [vmem:[%s10335_s4 + $0x140] sm:$0xff] }
  0xdf   :  { %1782 = vmatpush.bf16.msra.mxu2 %v4984_v33  ;;  %1796 = vmatpush.bf16.msra.mxu3 %v5112_v39  ;;  %v1521_v31 = vpop.f32.mrf.mxu3  ;;  %v1816_v39 = vld [vmem:[%s10335_s4 + $0x20] sm:$0xff] }
  0xe0   :  { %1755 = vmatpush.bf16.msra.mxu0 %v4712_v46  ;;  %v1904_v46 = vld [vmem:[%s10335_s4 + $0x2e0] sm:$0xff] }
  0xe1   :  { %1769 = vmatpush.bf16.msra.mxu1 %v4840_v47  ;;  %v1547_v29 = vpop.f32.mrf.mxu1 }
  0xe2   :  { %v1533_v25 = vpop.f32.mrf.mxu0 }
  0xe3   :  { %1783 = vmatpush.bf16.msra.mxu2 %v4968_v48  ;;  %1797 = vmatpush.bf16.msra.mxu3 %v5096_v49  ;;  %v1507_v24 = vpop.f32.mrf.mxu2  ;;  %v1534_v38 = vadd.f32 %v1533_v25, %v1520_v28  ;;  %v1812_v49 = vld [vmem:[%s10335_s4] sm:$0xff] }
  0xe4   :  { %1946 = vmatpush.msrb.mxu0 %v1842_v50  ;;  %1770 = vmatmul.bf16.vlgmr.msra.gmra.mxu1 %v7276_v37  ;;  %v1868_v37 = vld [vmem:[%s10335_s4 + $0x1c0] sm:$0xff] }
  0xe5   :  { %1969 = vmatpush.msrb.mxu1 %v1874_v52  ;;  %1756 = vmatmul.bf16.vlgmr.msra.gmra.mxu0 %v7126_v23  ;;  %v1870_v23 = vld [vmem:[%s10335_s4 + $0x1d0] sm:$0xff]  ;;  %v1548_v48 = vadd.f32 %v1547_v29, %v1534_v38  ;;  %v1888_v28 = vld [vmem:[%s10335_s4 + $0x260] sm:$0xff] }
  0xe6   :  { %1784 = vmatmul.bf16.vlgmr.msra.gmra.mxu2 %v7289_v42  ;;  %1798 = vmatmul.bf16.vlgmr.msra.gmra.mxu3 %v7287_v41  ;;  %v1436_v42 = vadd.f32 %v8159_v2, %v1422_v58  ;;  %v1834_v41 = vld [vmem:[%s10335_s4 + $0xb0] sm:$0xff]  ;;  %v1864_v2 = vld [vmem:[%s10335_s4 + $0x1a0] sm:$0xff]  ;;  %v1875_v58 = vld [vmem:[%s10335_s4 + $0x1f8] sm:$0xff] }
  0xe7   :  { %1947 = vmatpush.msrb.mxu0 %v1840_v54  ;;  %1970 = vmatpush.msrb.mxu1 %v1872_v56  ;;  %v1902_v52 = vld [vmem:[%s10335_s4 + $0x2d0] sm:$0xff]  ;;  %v1522_v54 = vadd.f32 %v1521_v31, %v285_v18  ;;  %v1843_v56 = vld [vmem:[%s10335_s4 + $0xf8] sm:$0xff]  ;;  %v1833_v18 = vld [vmem:[%s10335_s4 + $0xa8] sm:$0xff] }
  0xe8   :  { %v1450_v4 = vadd.f32 %v8203_v27, %v1436_v42  ;;  %v1452_v27 = vadd.f32 %v8253_v53, %v1438_v17  ;;  %1992 = vmatpush.msrb.mxu2 %v1906_v43  ;;  %v1898_v42 = vld [vmem:[%s10335_s4 + $0x2b0] sm:$0xff]  ;;  %v1861_v31 = vld [vmem:[%s10335_s4 + $0x188] sm:$0xff] }
  0xe9   :  { %1948 = vmatpush.msrb.mxu0 %v1838_v60  ;;  %1971 = vmatpush.msrb.mxu1 %v1870_v23  ;;  %v1841_v23 = vld [vmem:[%s10335_s4 + $0xe8] sm:$0xff] }
  0xea   :  { %v1464_v14 = vadd.f32 %v8233_v11, %v1450_v4  ;;  %v1466_v36 = vadd.f32 %v1465_v61, %v1452_v27  ;;  %v1814_v11 = vld [vmem:[%s10335_s4 + $0x10] sm:$0xff]  ;;  %1993 = vmatpush.msrb.mxu2 %v1904_v46  ;;  %v1535_v50 = vpop.f32.mrf.mxu0  ;;  %v1863_v27 = vld [vmem:[%s10335_s4 + $0x198] sm:$0xff] }
  0xeb   :  { %1949 = vmatpush.msrb.mxu0 %v1836_v62  ;;  %1972 = vmatpush.msrb.mxu1 %v1868_v37  ;;  %v1561_v45 = vpop.f32.mrf.mxu2  ;;  %v1873_v62 = vld [vmem:[%s10335_s4 + $0x1e8] sm:$0xff]  ;;  %v1900_v37 = vld [vmem:[%s10335_s4 + $0x2c0] sm:$0xff]  ;;  %v1855_v46 = vld [vmem:[%s10335_s4 + $0x158] sm:$0xff] }
  0xec   :  { %v1478_v21 = vadd.f32 %v1477_v55, %v1464_v14  ;;  %v1480_v47 = vadd.f32 %v1479_v6, %v1466_v36  ;;  %v1549_v55 = vpop.f32.mrf.mxu1  ;;  %1994 = vmatpush.msrb.mxu2 %v1902_v52  ;;  %v1562_v61 = vadd.f32 %v1561_v45, %v1548_v48  ;;  %v1869_v6 = vld [vmem:[%s10335_s4 + $0x1c8] sm:$0xff]  ;;  %v1859_v36 = vld [vmem:[%s10335_s4 + $0x178] sm:$0xff]  ;;  %v1882_v45 = vld [vmem:[%s10335_s4 + $0x230] sm:$0xff] }
  0xed   :  { %1950 = vmatpush.msrb.mxu0 %v1834_v41  ;;  %1973 = vmatpush.msrb.mxu1 %v1866_v63  ;;  %v1536_v63 = vadd.f32 %v1535_v50, %v1522_v54  ;;  %v1880_v48 = vld [vmem:[%s10335_s4 + $0x220] sm:$0xff]  ;;  %v1853_v50 = vld [vmem:[%s10335_s4 + $0x148] sm:$0xff]  ;;  %v1819_v52 = vld [vmem:[%s10335_s4 + $0x38] sm:$0xff] }
  0xee   :  { %v1492_v33 = vadd.f32 %v1491_v59, %v1478_v21  ;;  %v1575_v59 = vpop.f32.mrf.mxu3  ;;  %v1494_v60 = vadd.f32 %v8299_v10, %v1480_v47  ;;  %1995 = vmatpush.msrb.mxu2 %v1900_v37  ;;  %v1892_v21 = vld [vmem:[%s10335_s4 + $0x280] sm:$0xff]  ;;  %v1851_v54 = vld [vmem:[%s10335_s4 + $0x138] sm:$0xff]  ;;  %v1905_v37 = vld [vmem:[%s10335_s4 + $0x2e8] sm:$0xff] }
  0xef   :  { %1951 = vmatpush.msrb.mxu0 %v1832_v1  ;;  %1974 = vmatpush.msrb.mxu1 %v1864_v2  ;;  %v1839_v1 = vld [vmem:[%s10335_s4 + $0xd8] sm:$0xff]  ;;  %v1896_v2 = vld [vmem:[%s10335_s4 + $0x2a0] sm:$0xff]  ;;  %v1576_v4 = vadd.f32 %v1575_v59, %v1562_v61  ;;  %v1550_v10 = vadd.f32 %v1549_v55, %v1536_v63  ;;  %v1938_v55 = vld [vmem:[%s10335_s4 + $0x3f0] sm:$0xff] }
  0xf0   :  { %v8350_v44 = vadd.f32 %v1505_v3, %v1492_v33  ;;  %v8392_v41 = vadd.f32 %v1507_v24, %v1494_v60  ;;  %v1871_v3 = vld [vmem:[%s10335_s4 + $0x1d8] sm:$0xff]  ;;  %1996 = vmatpush.msrb.mxu2 %v1898_v42  ;;  %v1890_v24 = vld [vmem:[%s10335_s4 + $0x270] sm:$0xff]  ;;  %v1817_v59 = vld [vmem:[%s10335_s4 + $0x28] sm:$0xff]  ;;  %2015 = vmatpush.msrb.mxu3 %v1938_v55 }
  0xf1   :  { %1952 = vmatpush.msrb.mxu0 %v1830_v5  ;;  %1975 = vmatpush.msrb.mxu1 %v1862_v8  ;;  %v1837_v5 = vld [vmem:[%s10335_s4 + $0xc8] sm:$0xff]  ;;  %v1886_v33 = vld [vmem:[%s10335_s4 + $0x250] sm:$0xff]  ;;  %v1907_v61 = vld [vmem:[%s10335_s4 + $0x2f8] sm:$0xff] }
  0xf2   :  { %v1804_v53 = vmax.f32 %v8350_v44, 0.0  ;;  %1997 = vmatpush.msrb.mxu2 %v1896_v2  ;;  %v1849_v60 = vld [vmem:[%s10335_s4 + $0x128] sm:$0xff]  ;;  %v1899_v2 = vld [vmem:[%s10335_s4 + $0x2b8] sm:$0xff] }
  0xf3   :  { %1953 = vmatpush.msrb.mxu0 %v1828_v12  ;;  %1976 = vmatpush.msrb.mxu1 %v1860_v13  ;;  %v1563_v7 = vpop.f32.mrf.mxu2  ;;  %v1808_v12 = vmax.f32 %v8392_v41, 0.0  ;;  %v1835_v13 = vld [vmem:[%s10335_s4 + $0xb8] sm:$0xff]  ;;  %v1813_v42 = vld [vmem:[%s10335_s4 + $0x8] sm:$0xff]  ;;  %v1926_v41 = vld [vmem:[%s10335_s4 + $0x390] sm:$0xff] }
  0xf4   :  { %v1564_v17 = vadd.f32 %v1563_v7, %v1550_v10  ;;  %1998 = vmatpush.msrb.mxu2 %v1894_v9  ;;  %v1845_v63 = vld [vmem:[%s10335_s4 + $0x108] sm:$0xff]  ;;  %v1930_v7 = vld [vmem:[%s10335_s4 + $0x3b0] sm:$0xff]  ;;  %v286_v9 = vperm.slane %v8244_v57, 2  ;;  %v1935_v55 = vld [vmem:[%s10335_s4 + $0x3d8] sm:$0xff] }
  0xf5   :  { %1954 = vmatpush.msrb.mxu0 %v1826_v15  ;;  %1977 = vmatpush.msrb.mxu1 %v1858_v16  ;;  %v1867_v15 = vld [vmem:[%s10335_s4 + $0x1b8] sm:$0xff]  ;;  %v1897_v44 = vld [vmem:[%s10335_s4 + $0x2a8] sm:$0xff] }
  0xf6   :  { %1999 = vmatpush.msrb.mxu2 %v1892_v21  ;;  %v1893_v10 = vld [vmem:[%s10335_s4 + $0x288] sm:$0xff] }
  0xf7   :  { %1955 = vmatpush.msrb.mxu0 %v1824_v19  ;;  %1978 = vmatpush.msrb.mxu1 %v1856_v20  ;;  %v1865_v20 = vld [vmem:[%s10335_s4 + $0x1a8] sm:$0xff] }
  0xf8   :  { %2000 = vmatpush.msrb.mxu2 %v1890_v24  ;;  %v1920_v24 = vld [vmem:[%s10335_s4 + $0x360] sm:$0xff] }
  0xf9   :  { %1956 = vmatpush.msrb.mxu0 %v1822_v22  ;;  %1979 = vmatpush.msrb.mxu1 %v1854_v26  ;;  %v1577_v22 = vpop.f32.mrf.mxu3  ;;  %v1831_v26 = vld [vmem:[%s10335_s4 + $0x98] sm:$0xff] }
  0xfa   :  { %v1578_v29 = vadd.f32 %v1577_v22, %v1564_v17  ;;  %2001 = vmatpush.msrb.mxu2 %v1888_v28  ;;  %v1885_v22 = vld [vmem:[%s10335_s4 + $0x248] sm:$0xff] }
  0xfb   :  { %1957 = vmatpush.msrb.mxu0 %v1820_v30  ;;  %1980 = vmatpush.msrb.mxu1 %v1852_v32  ;;  %v1829_v30 = vld [vmem:[%s10335_s4 + $0x88] sm:$0xff] }
  0xfc   :  { %2002 = vmatpush.msrb.mxu2 %v1886_v33  ;;  %v1879_v33 = vld [vmem:[%s10335_s4 + $0x218] sm:$0xff] }
  0xfd   :  { %1958 = vmatpush.msrb.mxu0 %v1818_v34  ;;  %1981 = vmatpush.msrb.mxu1 %v1850_v35  ;;  %v1827_v34 = vld [vmem:[%s10335_s4 + $0x78] sm:$0xff] }
  0xff   :  { %1959 = vmatpush.msrb.mxu0 %v1816_v39  ;;  %1982 = vmatpush.msrb.mxu1 %v1848_v40  ;;  %v1884_v39 = vld [vmem:[%s10335_s4 + $0x240] sm:$0xff]  ;;  %v1825_v40 = vld [vmem:[%s10335_s4 + $0x68] sm:$0xff] }
 0x100   :  { %2003 = vmatpush.msrb.mxu2 %v1884_v39  ;;  %v1912_v39 = vld [vmem:[%s10335_s4 + $0x320] sm:$0xff] }
 0x101   :  { %1960 = vmatpush.msrb.mxu0 %v1814_v11  ;;  %1983 = vmatpush.msrb.mxu1 %v1846_v0  ;;  %v1603_v16 = vpop.f32.mrf.mxu1  ;;  %v1857_v11 = vld [vmem:[%s10335_s4 + $0x168] sm:$0xff]  ;;  %v1823_v0 = vld [vmem:[%s10335_s4 + $0x58] sm:$0xff] }
 0x102   :  { %v1589_v8 = vpop.f32.mrf.mxu0  ;;  %2004 = vmatpush.msrb.mxu2 %v1882_v45 }
 0x103   :  { %1961 = vmatpush.msrb.mxu0 %v1812_v49  ;;  %1984 = vmatpush.msrb.mxu1 %v1844_v51  ;;  %v1590_v14 = vadd.f32 %v1589_v8, %v1576_v4  ;;  %v1821_v49 = vld [vmem:[%s10335_s4 + $0x48] sm:$0xff]  ;;  %v1878_v51 = vld [vmem:[%s10335_s4 + $0x210] sm:$0xff] }
 0x104   :  { %1962 = vmatmul.f32.vlgmr.msrb.gmra.mxu0 %v1804_v53  ;;  %2005 = vmatpush.msrb.mxu2 %v1880_v48 }
 0x105   :  { %2038 = vmatpush.msra.mxu0 %v1843_v56  ;;  %2061 = vmatpush.msra.mxu1 %v1875_v58  ;;  %v8424_v19 = vadd.f32 %v1603_v16, %v1590_v14  ;;  %v1876_v56 = vld [vmem:[%s10335_s4 + $0x200] sm:$0xff]  ;;  %v1891_v14 = vld [vmem:[%s10335_s4 + $0x278] sm:$0xff] }
 0x106   :  { %v1936_v58 = vld [vmem:[%s10335_s4 + $0x3e0] sm:$0xff]  ;;  %2006 = vmatpush.msrb.mxu2 %v1878_v51  ;;  %v1937_v51 = vld [vmem:[%s10335_s4 + $0x3e8] sm:$0xff] }
 0x107   :  { %2039 = vmatpush.msra.mxu0 %v1841_v23  ;;  %2062 = vmatpush.msra.mxu1 %v1873_v62  ;;  %v1805_v25 = vmax.f32 %v8424_v19, 0.0  ;;  %v1815_v23 = vld [vmem:[%s10335_s4 + $0x18] sm:$0xff]  ;;  %v1924_v16 = vld [vmem:[%s10335_s4 + $0x380] sm:$0xff]  ;;  %v1922_v19 = vld [vmem:[%s10335_s4 + $0x370] sm:$0xff] }
 0x108   :  { %v1847_v62 = vld [vmem:[%s10335_s4 + $0x118] sm:$0xff]  ;;  %2007 = vmatpush.msrb.mxu2 %v1876_v56  ;;  %2016 = vmatpush.msrb.mxu3 %v1936_v58 }
 0x109   :  { %2040 = vmatpush.msra.mxu0 %v1839_v1  ;;  %2063 = vmatpush.msra.mxu1 %v1871_v3  ;;  %v1605_v38 = vpop.f32.mrf.mxu1  ;;  %v1903_v1 = vld [vmem:[%s10335_s4 + $0x2d8] sm:$0xff]  ;;  %v1901_v3 = vld [vmem:[%s10335_s4 + $0x2c8] sm:$0xff]  ;;  %v1617_v4 = vpop.f32.mrf.mxu2 }
 0x10a   :  { %1985 = vmatmul.f32.vlgmr.msrb.gmra.mxu1 %v1805_v25  ;;  %v1591_v32 = vpop.f32.mrf.mxu0  ;;  %2084 = vmatpush.msra.mxu2 %v1907_v61  ;;  %v1631_v8 = vpop.f32.mrf.mxu3 }
 0x10b   :  { %2041 = vmatpush.msra.mxu0 %v1837_v5  ;;  %2064 = vmatpush.msra.mxu1 %v1869_v6  ;;  %v1592_v35 = vadd.f32 %v1591_v32, %v1578_v29  ;;  %v1934_v5 = vld [vmem:[%s10335_s4 + $0x3d0] sm:$0xff]  ;;  %v1895_v6 = vld [vmem:[%s10335_s4 + $0x298] sm:$0xff]  ;;  %v1881_v29 = vld [vmem:[%s10335_s4 + $0x228] sm:$0xff] }
 0x10c   :  { %1965 = vmatmul.f32.gmra.mxu0 %v1808_v12  ;;  %2085 = vmatpush.msra.mxu2 %v1905_v37 }
 0x10d   :  { %2042 = vmatpush.msra.mxu0 %v1835_v13  ;;  %2065 = vmatpush.msra.mxu1 %v1867_v15  ;;  %v8468_v43 = vadd.f32 %v1605_v38, %v1592_v35  ;;  %v1928_v13 = vld [vmem:[%s10335_s4 + $0x3a0] sm:$0xff]  ;;  %v1889_v15 = vld [vmem:[%s10335_s4 + $0x268] sm:$0xff] }
 0x10e   :  { %2086 = vmatpush.msra.mxu2 %v1903_v1  ;;  %2017 = vmatpush.msrb.mxu3 %v1934_v5  ;;  %v1877_v38 = vld [vmem:[%s10335_s4 + $0x208] sm:$0xff]  ;;  %v1923_v5 = vld [vmem:[%s10335_s4 + $0x378] sm:$0xff] }
 0x10f   :  { %2043 = vmatpush.msra.mxu0 %v1833_v18  ;;  %2066 = vmatpush.msra.mxu1 %v1865_v20  ;;  %v1809_v47 = vmax.f32 %v8468_v43, 0.0  ;;  %v1887_v18 = vld [vmem:[%s10335_s4 + $0x258] sm:$0xff] }
 0x110   :  { %2087 = vmatpush.msra.mxu2 %v1901_v3  ;;  %v1927_v3 = vld [vmem:[%s10335_s4 + $0x398] sm:$0xff] }
 0x111   :  { %2044 = vmatpush.msra.mxu0 %v1831_v26  ;;  %2067 = vmatpush.msra.mxu1 %v1863_v27  ;;  %v1619_v17 = vpop.f32.mrf.mxu2  ;;  %v1883_v26 = vld [vmem:[%s10335_s4 + $0x238] sm:$0xff]  ;;  %v1918_v27 = vld [vmem:[%s10335_s4 + $0x350] sm:$0xff] }
 0x112   :  { %1988 = vmatmul.f32.gmra.mxu1 %v1809_v47  ;;  %2088 = vmatpush.msra.mxu2 %v1899_v2  ;;  %v1620_v32 = vadd.f32 %v1619_v17, %v286_v9  ;;  %v1925_v2 = vld [vmem:[%s10335_s4 + $0x388] sm:$0xff] }
 0x113   :  { %2045 = vmatpush.msra.mxu0 %v1829_v30  ;;  %2068 = vmatpush.msra.mxu1 %v1861_v31  ;;  %v1916_v30 = vld [vmem:[%s10335_s4 + $0x340] sm:$0xff] }
 0x114   :  { %2089 = vmatpush.msra.mxu2 %v1897_v44 }
 0x115   :  { %2046 = vmatpush.msra.mxu0 %v1827_v34  ;;  %2069 = vmatpush.msra.mxu1 %v1859_v36  ;;  %v1914_v34 = vld [vmem:[%s10335_s4 + $0x330] sm:$0xff] }
 0x116   :  { %2090 = vmatpush.msra.mxu2 %v1895_v6  ;;  %v287_v6 = vperm.slane %v8244_v57, 3  ;;  %v1913_v57 = vld [vmem:[%s10335_s4 + $0x328] sm:$0xff] }
 0x117   :  { %2047 = vmatpush.msra.mxu0 %v1825_v40  ;;  %2070 = vmatpush.msra.mxu1 %v1857_v11  ;;  %v1910_v11 = vld [vmem:[%s10335_s4 + $0x310] sm:$0xff] }
 0x118   :  { %2091 = vmatpush.msra.mxu2 %v1893_v10 }
 0x119   :  { %2048 = vmatpush.msra.mxu0 %v1823_v0  ;;  %2071 = vmatpush.msra.mxu1 %v1855_v46  ;;  %v1908_v46 = vld [vmem:[%s10335_s4 + $0x300] sm:$0xff] }
 0x11a   :  { %2092 = vmatpush.msra.mxu2 %v1891_v14 }
 0x11b   :  { %2049 = vmatpush.msra.mxu0 %v1821_v49  ;;  %2072 = vmatpush.msra.mxu1 %v1853_v50 }
 0x11c   :  { %2093 = vmatpush.msra.mxu2 %v1889_v15 }
 0x11d   :  { %2050 = vmatpush.msra.mxu0 %v1819_v52  ;;  %2073 = vmatpush.msra.mxu1 %v1851_v54 }
 0x11e   :  { %2094 = vmatpush.msra.mxu2 %v1887_v18 }
 0x11f   :  { %2051 = vmatpush.msra.mxu0 %v1817_v59  ;;  %2074 = vmatpush.msra.mxu1 %v1849_v60  ;;  %v1933_v59 = vld [vmem:[%s10335_s4 + $0x3c8] sm:$0xff] }
 0x120   :  { %2095 = vmatpush.msra.mxu2 %v1885_v22 }
 0x121   :  { %2052 = vmatpush.msra.mxu0 %v1815_v23  ;;  %2075 = vmatpush.msra.mxu1 %v1847_v62  ;;  %v1659_v31 = vpop.f32.mrf.mxu1  ;;  %v1931_v62 = vld [vmem:[%s10335_s4 + $0x3b8] sm:$0xff] }
 0x122   :  { %v1645_v20 = vpop.f32.mrf.mxu0  ;;  %2096 = vmatpush.msra.mxu2 %v1883_v26 }
 0x123   :  { %2053 = vmatpush.msra.mxu0 %v1813_v42  ;;  %2076 = vmatpush.msra.mxu1 %v1845_v63  ;;  %v1929_v42 = vld [vmem:[%s10335_s4 + $0x3a8] sm:$0xff] }
 0x124   :  { %2054 = vmatmul.f32.vlgmr.msra.gmra.mxu0 %v1804_v53  ;;  %2077 = vmatmul.f32.vlgmr.msra.gmra.mxu1 %v1805_v25  ;;  %v1932_v53 = vld [vmem:[%s10335_s4 + $0x3c0] sm:$0xff]  ;;  %v1633_v25 = vpop.f32.mrf.mxu3 }
 0x125   :  { %2018 = vmatpush.msrb.mxu3 %v1932_v53  ;;  %2097 = vmatpush.msra.mxu2 %v1881_v29  ;;  %v1634_v43 = vadd.f32 %v1633_v25, %v1620_v32  ;;  %v1921_v53 = vld [vmem:[%s10335_s4 + $0x368] sm:$0xff] }
 0x127   :  { %2019 = vmatpush.msrb.mxu3 %v1930_v7  ;;  %2098 = vmatpush.msra.mxu2 %v1879_v33  ;;  %v1919_v7 = vld [vmem:[%s10335_s4 + $0x358] sm:$0xff] }
 0x129   :  { %2020 = vmatpush.msrb.mxu3 %v1928_v13  ;;  %v1673_v35 = vpop.f32.mrf.mxu2  ;;  %2099 = vmatpush.msra.mxu2 %v1877_v38  ;;  %v1661_v49 = vpop.f32.mrf.mxu1  ;;  %v1915_v13 = vld [vmem:[%s10335_s4 + $0x338] sm:$0xff] }
 0x12a   :  { %v1647_v40 = vpop.f32.mrf.mxu0 }
 0x12b   :  { %2021 = vmatpush.msrb.mxu3 %v1926_v41  ;;  %v1648_v48 = vadd.f32 %v1647_v40, %v1634_v43 }
 0x12c   :  { %2057 = vmatmul.f32.gmra.mxu0 %v1808_v12  ;;  %2080 = vmatmul.f32.gmra.mxu1 %v1809_v47  ;;  %v1618_v12 = vadd.f32 %v1617_v4, %v286_v9  ;;  %v1687_v45 = vpop.f32.mrf.mxu3  ;;  %v1939_v47 = vld [vmem:[%s10335_s4 + $0x3f8] sm:$0xff]  ;;  %v1917_v9 = vld [vmem:[%s10335_s4 + $0x348] sm:$0xff] }
 0x12d   :  { %2022 = vmatpush.msrb.mxu3 %v1924_v16  ;;  %v1662_v56 = vadd.f32 %v1661_v49, %v1648_v48  ;;  %v1909_v16 = vld [vmem:[%s10335_s4 + $0x308] sm:$0xff]  ;;  %v5325_v48 = vld [vmem:[%s10336_s6 + $0xf0] sm:$0xf0] }
 0x12e   :  { %v1632_v21 = vadd.f32 %v1631_v8, %v1618_v12  ;;  %v1911_v12 = vld [vmem:[%s10335_s4 + $0x318] sm:$0xff]  ;;  %v5331_v49 = vld [vmem:[%s10336_s6 + $0xe8] sm:$0xf] }
 0x12f   :  { %2023 = vmatpush.msrb.mxu3 %v1922_v19 }
 0x130   :  { %v1646_v28 = vadd.f32 %v1645_v20, %v1632_v21 }
 0x131   :  { %2024 = vmatpush.msrb.mxu3 %v1920_v24  ;;  %v1675_v52 = vpop.f32.mrf.mxu2 }
 0x132   :  { %v1660_v36 = vadd.f32 %v1659_v31, %v1646_v28  ;;  %v1676_v60 = vadd.f32 %v1675_v52, %v1662_v56 }
 0x133   :  { %2025 = vmatpush.msrb.mxu3 %v1918_v27 }
 0x134   :  { %v1674_v0 = vadd.f32 %v1673_v35, %v1660_v36  ;;  %v1689_v23 = vpop.f32.mrf.mxu3 }
 0x135   :  { %2026 = vmatpush.msrb.mxu3 %v1916_v30  ;;  %v1690_v37 = vadd.f32 %v1689_v23, %v1676_v60  ;;  %v6481_v60 = vld [vmem:[%s10336_s6 + $0xc4] sm:$0xf] }
 0x136   :  { %v1688_v50 = vadd.f32 %v1687_v45, %v1674_v0  ;;  %v5323_v45 = vld [vmem:[%s10336_s6 + $0xe0] sm:$0xf]  ;;  %v6487_v0 = vld [vmem:[%s10336_s6 + $0xec] sm:$0xf0] }
 0x137   :  { %2027 = vmatpush.msrb.mxu3 %v1914_v34 }
 0x139   :  { %2028 = vmatpush.msrb.mxu3 %v1912_v39 }
 0x13b   :  { %2029 = vmatpush.msrb.mxu3 %v1910_v11 }
 0x13d   :  { %2030 = vmatpush.msrb.mxu3 %v1908_v46  ;;  %v6485_v46 = vld [vmem:[%s10336_s6 + $0xe4] sm:$0xf] }
 0x13f   :  { %2107 = vmatpush.msra.mxu3 %v1939_v47  ;;  %v5324_v47 = vor.u32 %v6487_v0, %v5323_v45 }
 0x141   :  { %2108 = vmatpush.msra.mxu3 %v1937_v51  ;;  %v1715_v44 = vpop.f32.mrf.mxu1  ;;  %v5328_v51 = vor.u32 %v6485_v46, %v5325_v48  ;;  %2349 = vmatpush.bf16.msrb.mxu0 %v5324_v47  ;;  %v6470_v46 = vld [vmem:[%s10336_s6 + $0x6c] sm:$0xf]  ;;  %v5269_v47 = vld [vmem:[%s10336_s6 + $0x78] sm:$0xf0] }
 0x142   :  { %v1701_v54 = vpop.f32.mrf.mxu0  ;;  %v1716_v14 = vadd.f32 %v1715_v44, %v287_v6 }
 0x143   :  { %v1702_v58 = vadd.f32 %v1701_v54, %v1688_v50  ;;  %2109 = vmatpush.msra.mxu3 %v1935_v55  ;;  %v6488_v50 = vld [vmem:[%s10336_s6 + $0xf4] sm:$0xf0]  ;;  %v6486_v54 = vld [vmem:[%s10336_s6 + $0xec] sm:$0xf]  ;;  %v5333_v55 = vld [vmem:[%s10336_s6 + $0xf8] sm:$0xf0]  ;;  %2363 = vmatpush.bf16.msrb.mxu1 %v5328_v51 }
 0x144   :  { %v5332_v52 = vor.u32 %v6488_v50, %v5331_v49  ;;  %v5336_v56 = vor.u32 %v6486_v54, %v5333_v55  ;;  %v5272_v49 = vor.u32 %v6470_v46, %v5269_v47  ;;  %v6467_v54 = vld [vmem:[%s10336_s6 + $0x4c] sm:$0xf0]  ;;  %v6465_v55 = vld [vmem:[%s10336_s6 + $0x44] sm:$0xf] }
 0x145   :  { %v1806_v61 = vmax.f32 %v1702_v58, 0.0  ;;  %2110 = vmatpush.msra.mxu3 %v1933_v59  ;;  %v5307_v58 = vld [vmem:[%s10336_s6 + $0xc0] sm:$0xf]  ;;  %v6483_v59 = vld [vmem:[%s10336_s6 + $0xcc] sm:$0xf0] }
 0x146   :  { %v5308_v23 = vor.u32 %v6483_v59, %v5307_v58  ;;  %v5245_v59 = vld [vmem:[%s10336_s6 + $0x50] sm:$0xf0]  ;;  %v5731_v47 = vld [vmem:[%s10339_s8 + $0x310] sm:$0xf] }
 0x147   :  { %2008 = vmatmul.f32.vlgmr.msrb.gmra.mxu2 %v1806_v61  ;;  %2111 = vmatpush.msra.mxu3 %v1931_v62  ;;  %v5309_v62 = vld [vmem:[%s10336_s6 + $0xd0] sm:$0xf0] }
 0x148   :  { %2377 = vmatpush.bf16.msrb.mxu2 %v5332_v52  ;;  %2350 = vmatpush.bf16.msrb.mxu0 %v5308_v23  ;;  %v5243_v52 = vld [vmem:[%s10336_s6 + $0x40] sm:$0xf]  ;;  %v5248_v23 = vor.u32 %v6465_v55, %v5245_v59  ;;  %v6207_v55 = vld [vmem:[%s10339_s8 + $0x6c8] sm:$0xf] }
 0x149   :  { %2112 = vmatpush.msra.mxu3 %v1929_v42  ;;  %v1729_v8 = vpop.f32.mrf.mxu2  ;;  %v1743_v10 = vpop.f32.mrf.mxu3  ;;  %v6484_v42 = vld [vmem:[%s10336_s6 + $0xd4] sm:$0xf0]  ;;  %v5244_v58 = vor.u32 %v6467_v54, %v5243_v52  ;;  %v6653_v54 = vld [vmem:[%s10339_s8 + $0x520] sm:$0xf0] }
 0x14a   :  { %v1703_v63 = vpop.f32.mrf.mxu0  ;;  %v1717_v41 = vpop.f32.mrf.mxu1  ;;  %v1730_v15 = vadd.f32 %v1729_v8, %v1716_v14 }
 0x14b   :  { %v1704_v1 = vadd.f32 %v1703_v63, %v1690_v37  ;;  %2113 = vmatpush.msra.mxu3 %v1927_v3  ;;  %v1718_v19 = vadd.f32 %v1717_v41, %v287_v6  ;;  %v5315_v37 = vld [vmem:[%s10336_s6 + $0xc8] sm:$0xf]  ;;  %v5312_v63 = vor.u32 %v6481_v60, %v5309_v62  ;;  %v6482_v3 = vld [vmem:[%s10336_s6 + $0xcc] sm:$0xf]  ;;  %v6479_v6 = vld [vmem:[%s10336_s6 + $0xac] sm:$0xf0] }
 0x14c   :  { %v1744_v18 = vadd.f32 %v1743_v10, %v1730_v15  ;;  %v5299_v10 = vld [vmem:[%s10336_s6 + $0xa8] sm:$0xf]  ;;  %v5301_v15 = vld [vmem:[%s10336_s6 + $0xb8] sm:$0xf0] }
 0x14d   :  { %v1810_v4 = vmax.f32 %v1704_v1, 0.0  ;;  %2114 = vmatpush.msra.mxu3 %v1925_v2  ;;  %v5316_v1 = vor.u32 %v6484_v42, %v5315_v37  ;;  %v5317_v2 = vld [vmem:[%s10336_s6 + $0xd8] sm:$0xf0]  ;;  %2364 = vmatpush.bf16.msrb.mxu1 %v5312_v63  ;;  %v5251_v60 = vld [vmem:[%s10336_s6 + $0x48] sm:$0xf] }
 0x14e   :  { %v6466_v37 = vld [vmem:[%s10336_s6 + $0x4c] sm:$0xf]  ;;  %v5253_v42 = vld [vmem:[%s10336_s6 + $0x58] sm:$0xf0] }
 0x14f   :  { %2011 = vmatmul.f32.gmra.mxu2 %v1810_v4  ;;  %2115 = vmatpush.msra.mxu3 %v1923_v5  ;;  %v5320_v5 = vor.u32 %v6482_v3, %v5317_v2  ;;  %v5256_v2 = vor.u32 %v6466_v37, %v5253_v42  ;;  %v5703_v37 = vld [vmem:[%s10339_s8 + $0x2d8] sm:$0xf] }
 0x150   :  { %2378 = vmatpush.bf16.msrb.mxu2 %v5316_v1 }
 0x151   :  { %2116 = vmatpush.msra.mxu3 %v1921_v53  ;;  %v1731_v17 = vpop.f32.mrf.mxu2  ;;  %v1745_v20 = vpop.f32.mrf.mxu3  ;;  %v5291_v53 = vld [vmem:[%s10336_s6 + $0xa0] sm:$0xf] }
 0x152   :  { %v1732_v25 = vadd.f32 %v1731_v17, %v1718_v19  ;;  %v5292_v8 = vor.u32 %v6479_v6, %v5291_v53  ;;  %v6475_v19 = vld [vmem:[%s10336_s6 + $0x8c] sm:$0xf0]  ;;  %v6461_v53 = vld [vmem:[%s10336_s6 + $0x24] sm:$0xf] }
 0x153   :  { %2117 = vmatpush.msra.mxu3 %v1919_v7  ;;  %v6477_v7 = vld [vmem:[%s10336_s6 + $0xa4] sm:$0xf] }
 0x154   :  { %v1746_v28 = vadd.f32 %v1745_v20, %v1732_v25  ;;  %2351 = vmatpush.bf16.msrb.mxu0 %v5292_v8  ;;  %v6473_v20 = vld [vmem:[%s10336_s6 + $0x84] sm:$0xf]  ;;  %v6476_v25 = vld [vmem:[%s10336_s6 + $0x94] sm:$0xf0]  ;;  %v5229_v8 = vld [vmem:[%s10336_s6 + $0x30] sm:$0xf0] }
 0x155   :  { %2118 = vmatpush.msra.mxu3 %v1917_v9  ;;  %v5293_v9 = vld [vmem:[%s10336_s6 + $0xb0] sm:$0xf0] }
 0x157   :  { %2100 = vmatmul.f32.vlgmr.msra.gmra.mxu2 %v1806_v61  ;;  %2119 = vmatpush.msra.mxu3 %v1915_v13  ;;  %v6480_v13 = vld [vmem:[%s10336_s6 + $0xb4] sm:$0xf0] }
 0x158   :  { %v5300_v41 = vor.u32 %v6480_v13, %v5299_v10  ;;  %v6464_v10 = vld [vmem:[%s10336_s6 + $0x34] sm:$0xf0]  ;;  %v5232_v13 = vor.u32 %v6461_v53, %v5229_v8  ;;  %v6702_v53 = vld [vmem:[%s10339_s8 + $0x6a8] sm:$0xf0] }
 0x159   :  { %2120 = vmatpush.msra.mxu3 %v1913_v57  ;;  %v5296_v57 = vor.u32 %v6477_v7, %v5293_v9  ;;  %v5235_v9 = vld [vmem:[%s10336_s6 + $0x28] sm:$0xf] }
 0x15a   :  { %2379 = vmatpush.bf16.msrb.mxu2 %v5300_v41  ;;  %v5237_v41 = vld [vmem:[%s10336_s6 + $0x38] sm:$0xf0] }
 0x15b   :  { %2121 = vmatpush.msra.mxu3 %v1911_v12  ;;  %v6478_v12 = vld [vmem:[%s10336_s6 + $0xac] sm:$0xf]  ;;  %2365 = vmatpush.bf16.msrb.mxu1 %v5296_v57 }
 0x15c   :  { %v5304_v17 = vor.u32 %v6478_v12, %v5301_v15  ;;  %v6462_v57 = vld [vmem:[%s10336_s6 + $0x2c] sm:$0xf]  ;;  %v5211_v12 = vld [vmem:[%s10336_s6] sm:$0xf] }
 0x15d   :  { %2122 = vmatpush.msra.mxu3 %v1909_v16 }
 0x15f   :  { %2103 = vmatmul.f32.gmra.mxu2 %v1810_v4  ;;  %v8725_v4 = vld [vmem:[%s10337_s5] sm:$0x3] }
 0x160   :  { %v1942_v16 = vperm.slane %v8725_v4, 0  ;;  %v1943_v1 = vperm.slane %v8725_v4, 1 }
 0x161   :  { %v1771_v24 = vpop.f32.mrf.mxu1 }
 0x162   :  { %v1757_v21 = vpop.f32.mrf.mxu0 }
 0x163   :  { %v1758_v22 = vadd.f32 %v1757_v21, %v1744_v18  ;;  %v5275_v18 = vld [vmem:[%s10336_s6 + $0x80] sm:$0xf] }
 0x164   :  { %v5276_v21 = vor.u32 %v6475_v19, %v5275_v18  ;;  %v6457_v18 = vld [vmem:[%s10336_s6 + $0x4] sm:$0xf]  ;;  %v5213_v19 = vld [vmem:[%s10336_s6 + $0x10] sm:$0xf0] }
 0x165   :  { %v1772_v26 = vadd.f32 %v1771_v24, %v1758_v22  ;;  %v5277_v22 = vld [vmem:[%s10336_s6 + $0x90] sm:$0xf0]  ;;  %v5283_v24 = vld [vmem:[%s10336_s6 + $0x88] sm:$0xf] }
 0x166   :  { %2352 = vmatpush.bf16.msrb.mxu0 %v5276_v21 }
 0x169   :  { %v1785_v27 = vpop.f32.mrf.mxu2  ;;  %v1799_v30 = vpop.f32.mrf.mxu3 }
 0x16a   :  { %v1786_v29 = vadd.f32 %v1785_v27, %v1772_v26  ;;  %v1759_v31 = vpop.f32.mrf.mxu0  ;;  %v1773_v35 = vpop.f32.mrf.mxu1  ;;  %v5280_v26 = vor.u32 %v6473_v20, %v5277_v22  ;;  %v5284_v27 = vor.u32 %v6476_v25, %v5283_v24  ;;  %v5216_v24 = vor.u32 %v6457_v18, %v5213_v19  ;;  %v5219_v25 = vld [vmem:[%s10336_s6 + $0x8] sm:$0xf] }
 0x16b   :  { %v1760_v33 = vadd.f32 %v1759_v31, %v1746_v28  ;;  %v6474_v28 = vld [vmem:[%s10336_s6 + $0x8c] sm:$0xf] }
 0x16c   :  { %v1800_v32 = vadd.f32 %v1799_v30, %v1786_v29  ;;  %v5285_v29 = vld [vmem:[%s10336_s6 + $0x98] sm:$0xf0]  ;;  %2366 = vmatpush.bf16.msrb.mxu1 %v5280_v26  ;;  %2380 = vmatpush.bf16.msrb.mxu2 %v5284_v27  ;;  %v6460_v26 = vld [vmem:[%s10336_s6 + $0x14] sm:$0xf0]  ;;  %v6458_v27 = vld [vmem:[%s10336_s6 + $0xc] sm:$0xf] }
 0x16d   :  { %v1774_v36 = vadd.f32 %v1773_v35, %v1760_v33  ;;  %v5259_v33 = vld [vmem:[%s10336_s6 + $0x60] sm:$0xf]  ;;  %v6469_v35 = vld [vmem:[%s10336_s6 + $0x64] sm:$0xf] }
 0x16e   :  { %v1807_v34 = vmax.f32 %v1800_v32, 0.0  ;;  %v5288_v32 = vor.u32 %v6474_v28, %v5285_v29 }
 0x170   :  { %2031 = vmatmul.f32.vlgmr.msrb.gmra.mxu3 %v1807_v34 }
 0x171   :  { %v1787_v38 = vpop.f32.mrf.mxu2  ;;  %v1801_v40 = vpop.f32.mrf.mxu3  ;;  %2391 = vmatpush.bf16.msrb.mxu3 %v5336_v56 }
 0x172   :  { %v1788_v39 = vadd.f32 %v1787_v38, %v1774_v36 }
 0x174   :  { %v1802_v43 = vadd.f32 %v1801_v40, %v1788_v39  ;;  %v5261_v39 = vld [vmem:[%s10336_s6 + $0x70] sm:$0xf0]  ;;  %v5267_v40 = vld [vmem:[%s10336_s6 + $0x68] sm:$0xf] }
 0x175   :  { %2392 = vmatpush.bf16.msrb.mxu3 %v5320_v5  ;;  %v5264_v45 = vor.u32 %v6469_v35, %v5261_v39  ;;  %v5227_v5 = vld [vmem:[%s10336_s6 + $0x20] sm:$0xf]  ;;  %v5759_v39 = vld [vmem:[%s10339_s8 + $0x348] sm:$0xf] }
 0x176   :  { %v1811_v11 = vmax.f32 %v1802_v43, 0.0  ;;  %v6472_v43 = vld [vmem:[%s10336_s6 + $0x74] sm:$0xf0] }
 0x177   :  { %v5268_v0 = vor.u32 %v6472_v43, %v5267_v40  ;;  %2367 = vmatpush.bf16.msrb.mxu1 %v5264_v45  ;;  %v6597_v43 = vld [vmem:[%s10339_s8 + $0x360] sm:$0xf0]  ;;  %v6534_v45 = vld [vmem:[%s10339_s8 + $0x168] sm:$0xf0] }
 0x178   :  { %2034 = vmatmul.f32.gmra.mxu3 %v1811_v11  ;;  %v5760_v46 = vor.u32 %v6597_v43, %v5759_v39 }
 0x179   :  { %2393 = vmatpush.bf16.msrb.mxu3 %v5304_v17  ;;  %2381 = vmatpush.bf16.msrb.mxu2 %v5268_v0  ;;  %v6459_v17 = vld [vmem:[%s10336_s6 + $0xc] sm:$0xf0] }
 0x17a   :  { %v5212_v22 = vor.u32 %v6459_v17, %v5211_v12  ;;  %v5927_v12 = vld [vmem:[%s10339_s8 + $0x498] sm:$0xf]  ;;  %v6695_v17 = vld [vmem:[%s10339_s8 + $0x670] sm:$0xf0] }
 0x17b   :  { %2368 = vmatpush.bf16.msrb.mxu1 %v5248_v23  ;;  %v5479_v23 = vld [vmem:[%s10339_s8 + $0x118] sm:$0xf] }
 0x17d   :  { %2394 = vmatpush.bf16.msrb.mxu3 %v5288_v32 }
 0x17f   :  { %2369 = vmatpush.bf16.msrb.mxu1 %v5232_v13 }
 0x180   :  { %2123 = vmatmul.f32.vlgmr.msra.gmra.mxu3 %v1807_v34  ;;  %v6471_v34 = vld [vmem:[%s10336_s6 + $0x6c] sm:$0xf0] }
 0x181   :  { %v1963_v61 = vpop.f32.mrf.mxu0  ;;  %v5260_v38 = vor.u32 %v6471_v34, %v5259_v33  ;;  %2395 = vmatpush.bf16.msrb.mxu3 %v5272_v49  ;;  %v5983_v49 = vld [vmem:[%s10339_s8 + $0x508] sm:$0xf] }
 0x182   :  { %v1964_v30 = vadd.f32 %v1963_v61, %v1942_v16  ;;  %v6468_v61 = vld [vmem:[%s10336_s6 + $0x54] sm:$0xf0]  ;;  %v5984_v4 = vor.u32 %v6653_v54, %v5983_v49  ;;  %v6506_v49 = vld [vmem:[%s10339_s8 + $0x88] sm:$0xf0] }
 0x183   :  { %2353 = vmatpush.bf16.msrb.mxu0 %v5260_v38  ;;  %v5252_v62 = vor.u32 %v6468_v61, %v5251_v60  ;;  %2370 = vmatpush.bf16.msrb.mxu1 %v5216_v24  ;;  %v6541_v38 = vld [vmem:[%s10339_s8 + $0x1a0] sm:$0xf0] }
 0x185   :  { %2382 = vmatpush.bf16.msrb.mxu2 %v5252_v62  ;;  %2396 = vmatpush.bf16.msrb.mxu3 %v5256_v2  ;;  %v6527_v62 = vld [vmem:[%s10339_s8 + $0x130] sm:$0xf0] }
 0x187   :  { %v1986_v44 = vpop.f32.mrf.mxu1  ;;  %2354 = vmatpush.bf16.msrb.mxu0 %v5244_v58  ;;  %v6709_v58 = vld [vmem:[%s10339_s8 + $0x6e0] sm:$0xf0]  ;;  %3855 = vmatpush.bf16.msra.mxu1 %v5760_v46 }
 0x188   :  { %2126 = vmatmul.f32.gmra.mxu3 %v1811_v11  ;;  %v1987_v36 = vadd.f32 %v1986_v44, %v1964_v30  ;;  %v6463_v44 = vld [vmem:[%s10336_s6 + $0x2c] sm:$0xf0]  ;;  %v5220_v30 = vor.u32 %v6460_v26, %v5219_v25  ;;  %v6208_v61 = vor.u32 %v6709_v58, %v6207_v55  ;;  %v5423_v25 = vld [vmem:[%s10339_s8 + $0xa8] sm:$0xf]  ;;  %v5899_v26 = vld [vmem:[%s10339_s8 + $0x460] sm:$0xf] }
 0x189   :  { %v1966_v31 = vpop.f32.mrf.mxu0  ;;  %v5228_v7 = vor.u32 %v6463_v44, %v5227_v5  ;;  %v6179_v44 = vld [vmem:[%s10339_s8 + $0x690] sm:$0xf] }
 0x18a   :  { %v1967_v63 = vadd.f32 %v1966_v31, %v1942_v16  ;;  %v5240_v16 = vor.u32 %v6462_v57, %v5237_v41  ;;  %v5221_v31 = vld [vmem:[%s10336_s6 + $0x18] sm:$0xf0]  ;;  %v6180_v8 = vor.u32 %v6702_v53, %v6179_v44  ;;  %v5675_v57 = vld [vmem:[%s10339_s8 + $0x2a0] sm:$0xf]  ;;  %v5843_v55 = vld [vmem:[%s10339_s8 + $0x3f0] sm:$0xf] }
 0x18b   :  { %2355 = vmatpush.bf16.msrb.mxu0 %v5228_v7  ;;  %v5224_v33 = vor.u32 %v6458_v27, %v5221_v31  ;;  %v5480_v7 = vor.u32 %v6527_v62, %v5479_v23  ;;  %v6576_v41 = vld [vmem:[%s10339_s8 + $0x2b8] sm:$0xf0]  ;;  %v6513_v31 = vld [vmem:[%s10339_s8 + $0xc0] sm:$0xf0]  ;;  %v5815_v44 = vld [vmem:[%s10339_s8 + $0x3b8] sm:$0xf] }
 0x18c   :  { %2397 = vmatpush.bf16.msrb.mxu3 %v5240_v16  ;;  %v6151_v16 = vld [vmem:[%s10339_s8 + $0x658] sm:$0xf]  ;;  %v6632_v27 = vld [vmem:[%s10339_s8 + $0x478] sm:$0xf0]  ;;  %v5424_v43 = vor.u32 %v6513_v31, %v5423_v25  ;;  %v2134_v23 = vld [vmem:[%s10340_s1] sm:$0xff] }
 0x18d   :  { %v5787_v25 = vld [vmem:[%s10339_s8 + $0x380] sm:$0xf] }
 0x18f   :  { %v1989_v11 = vpop.f32.mrf.mxu1  ;;  %2356 = vmatpush.bf16.msrb.mxu0 %v5212_v22 }
 0x190   :  { %v1990_v6 = vadd.f32 %v1989_v11, %v1967_v63  ;;  %2398 = vmatpush.bf16.msrb.mxu3 %v5224_v33  ;;  %v5507_v11 = vld [vmem:[%s10339_s8 + $0x150] sm:$0xf]  ;;  %v6583_v63 = vld [vmem:[%s10339_s8 + $0x2f0] sm:$0xf0]  ;;  %v6688_v33 = vld [vmem:[%s10339_s8 + $0x638] sm:$0xf0] }
 0x191   :  { %v5508_v52 = vor.u32 %v6534_v45, %v5507_v11  ;;  %v6625_v11 = vld [vmem:[%s10339_s8 + $0x440] sm:$0xf0]  ;;  %v6095_v45 = vld [vmem:[%s10339_s8 + $0x5e8] sm:$0xf] }
 0x194   :  { %3883 = vmatpush.bf16.msra.mxu3 %v6208_v61 }
 0x198   :  { %3884 = vmatpush.bf16.msra.mxu3 %v6180_v8  ;;  %v6039_v8 = vld [vmem:[%s10339_s8 + $0x578] sm:$0xf] }
 0x1a1   :  { %v2055_v3 = vpop.f32.mrf.mxu0  ;;  %v2078_v20 = vpop.f32.mrf.mxu1 }
 0x1a2   :  { %v2056_v28 = vadd.f32 %v2055_v3, %v1943_v1  ;;  %v6646_v3 = vld [vmem:[%s10339_s8 + $0x4e8] sm:$0xf0] }
 0x1a4   :  { %v2079_v34 = vadd.f32 %v2078_v20, %v2056_v28 }
 0x1a9   :  { %v2058_v35 = vpop.f32.mrf.mxu0  ;;  %v2081_v42 = vpop.f32.mrf.mxu1 }
 0x1ca   :  { %v2009_v14 = vpop.f32.mrf.mxu2 }
 0x1cb   :  { %v2010_v48 = vadd.f32 %v2009_v14, %v1987_v36  ;;  %v5236_v14 = vor.u32 %v6464_v10, %v5235_v9  ;;  %v5535_v36 = vld [vmem:[%s10339_s8 + $0x188] sm:$0xf]  ;;  %v5451_v9 = vld [vmem:[%s10339_s8 + $0xe0] sm:$0xf]  ;;  %v6520_v10 = vld [vmem:[%s10339_s8 + $0xf8] sm:$0xf0] }
 0x1cc   :  { %v5536_v40 = vor.u32 %v6541_v38, %v5535_v36  ;;  %v5452_v24 = vor.u32 %v6520_v10, %v5451_v9  ;;  %v5900_v38 = vor.u32 %v6632_v27, %v5899_v26  ;;  %v6667_v9 = vld [vmem:[%s10339_s8 + $0x590] sm:$0xf0]  ;;  %v6604_v26 = vld [vmem:[%s10339_s8 + $0x398] sm:$0xf0]  ;;  %v6650_v27 = vld [vmem:[%s10339_s8 + $0x50c] sm:$0xf] }
 0x1cd   :  { %2383 = vmatpush.bf16.msrb.mxu2 %v5236_v14  ;;  %v5704_v14 = vor.u32 %v6583_v63, %v5703_v37  ;;  %v5367_v37 = vld [vmem:[%s10339_s8 + $0x38] sm:$0xf] }
 0x1ce   :  { %3841 = vmatpush.bf16.msra.mxu0 %v5536_v40  ;;  %v5871_v40 = vld [vmem:[%s10339_s8 + $0x428] sm:$0xf]  ;;  %v5591_v63 = vld [vmem:[%s10339_s8 + $0x1f8] sm:$0xf] }
 0x1d1   :  { %2384 = vmatpush.bf16.msrb.mxu2 %v5220_v30  ;;  %v5676_v30 = vor.u32 %v6576_v41, %v5675_v57  ;;  %v6492_v41 = vld [vmem:[%s10339_s8 + $0x18] sm:$0xf0] }
 0x1d2   :  { %v2012_v50 = vpop.f32.mrf.mxu2  ;;  %3842 = vmatpush.bf16.msra.mxu0 %v5508_v52  ;;  %v5872_v52 = vor.u32 %v6625_v11, %v5871_v40  ;;  %v6587_v40 = vld [vmem:[%s10339_s8 + $0x314] sm:$0xf]  ;;  %v5788_v11 = vor.u32 %v6604_v26, %v5787_v25  ;;  %v6622_v26 = vld [vmem:[%s10339_s8 + $0x42c] sm:$0xf] }
 0x1d3   :  { %v2013_v15 = vadd.f32 %v2012_v50, %v1990_v6  ;;  %v2059_v50 = vadd.f32 %v2058_v35, %v1943_v1  ;;  %v5955_v1 = vld [vmem:[%s10339_s8 + $0x4d0] sm:$0xf]  ;;  %v6569_v35 = vld [vmem:[%s10339_s8 + $0x280] sm:$0xf0] }
 0x1d4   :  { %v5956_v5 = vor.u32 %v6646_v3, %v5955_v1  ;;  %v6555_v1 = vld [vmem:[%s10339_s8 + $0x210] sm:$0xf0]  ;;  %v2135_v3 = vld [vmem:[%s10340_s1 + $0x8] sm:$0xff] }
 0x1d5   :  { %3869 = vmatpush.bf16.msra.mxu2 %v5984_v4  ;;  %v2082_v13 = vadd.f32 %v2081_v42, %v2059_v50  ;;  %v5619_v50 = vld [vmem:[%s10339_s8 + $0x230] sm:$0xf]  ;;  %v6674_v4 = vld [vmem:[%s10339_s8 + $0x5c8] sm:$0xf0]  ;;  %v6499_v42 = vld [vmem:[%s10339_s8 + $0x50] sm:$0xf0] }
 0x1d6   :  { %3843 = vmatpush.bf16.msra.mxu0 %v5480_v7  ;;  %v6611_v7 = vld [vmem:[%s10339_s8 + $0x3d0] sm:$0xf0] }
 0x1d9   :  { %3870 = vmatpush.bf16.msra.mxu2 %v5956_v5 }
 0x1da   :  { %v2101_v32 = vpop.f32.mrf.mxu2  ;;  %3844 = vmatpush.bf16.msra.mxu0 %v5452_v24  ;;  %v5761_v24 = vld [vmem:[%s10339_s8 + $0x364] sm:$0xf0] }
 0x1db   :  { %v2102_v0 = vadd.f32 %v2101_v32, %v2079_v34  ;;  %v6123_v32 = vld [vmem:[%s10339_s8 + $0x620] sm:$0xf]  ;;  %v5647_v34 = vld [vmem:[%s10339_s8 + $0x268] sm:$0xf] }
 0x1dc   :  { %v6124_v39 = vor.u32 %v6688_v33, %v6123_v32  ;;  %v5985_v32 = vld [vmem:[%s10339_s8 + $0x524] sm:$0xf0]  ;;  %v6706_v33 = vld [vmem:[%s10339_s8 + $0x6cc] sm:$0xf] }
 0x1de   :  { %3845 = vmatpush.bf16.msra.mxu0 %v5424_v43  ;;  %v5733_v43 = vld [vmem:[%s10339_s8 + $0x32c] sm:$0xf0] }
 0x1e2   :  { %v2104_v6 = vpop.f32.mrf.mxu2 }
 0x1e3   :  { %v2105_v18 = vadd.f32 %v2104_v6, %v2082_v13  ;;  %v5368_v6 = vor.u32 %v6499_v42, %v5367_v37  ;;  %v5592_v13 = vor.u32 %v6555_v1, %v5591_v63  ;;  %v5453_v37 = vld [vmem:[%s10339_s8 + $0xfc] sm:$0xf0]  ;;  %v6573_v42 = vld [vmem:[%s10339_s8 + $0x2a4] sm:$0xf] }
 0x1e4   :  { %v5677_v63 = vld [vmem:[%s10339_s8 + $0x2bc] sm:$0xf0] }
 0x1f3   :  { %v2032_v51 = vpop.f32.mrf.mxu3 }
 0x1f4   :  { %v8809_v56 = vadd.f32 %v2032_v51, %v2010_v48  ;;  %v6590_v48 = vld [vmem:[%s10339_s8 + $0x328] sm:$0xf0] }
 0x1f5   :  { %v5732_v60 = vor.u32 %v6590_v48, %v5731_v47  ;;  %v5648_v47 = vor.u32 %v6569_v35, %v5647_v34  ;;  %v5395_v48 = vld [vmem:[%s10339_s8 + $0x70] sm:$0xf]  ;;  %v6209_v34 = vld [vmem:[%s10339_s8 + $0x6e4] sm:$0xf0] }
 0x1f6   :  { %2130 = vst [vmem:[%s10338_s10] sm:$0xff] %v8809_v56  ;;  %v5396_v58 = vor.u32 %v6506_v49, %v5395_v48  ;;  %v5957_v48 = vld [vmem:[%s10339_s8 + $0x4ec] sm:$0xf0]  ;;  %v6699_v49 = vld [vmem:[%s10339_s8 + $0x694] sm:$0xf] }
 0x1f7   :  { %3856 = vmatpush.bf16.msra.mxu1 %v5732_v60  ;;  %v6067_v60 = vld [vmem:[%s10339_s8 + $0x5b0] sm:$0xf] }
 0x1f8   :  { %v6068_v5 = vor.u32 %v6674_v4, %v6067_v60  ;;  %3846 = vmatpush.bf16.msra.mxu0 %v5396_v58  ;;  %v6580_v58 = vld [vmem:[%s10339_s8 + $0x2dc] sm:$0xf] }
 0x1fb   :  { %v2035_v21 = vpop.f32.mrf.mxu3  ;;  %3857 = vmatpush.bf16.msra.mxu1 %v5704_v14  ;;  %v5339_v14 = vld [vmem:[%s10339_s8] sm:$0xf] }
 0x1fc   :  { %v8878_v29 = vadd.f32 %v2035_v21, %v2013_v15  ;;  %v6639_v15 = vld [vmem:[%s10339_s8 + $0x4b0] sm:$0xf0]  ;;  %v6152_v21 = vor.u32 %v6695_v17, %v6151_v16  ;;  %v6538_v16 = vld [vmem:[%s10339_s8 + $0x18c] sm:$0xf]  ;;  %v5537_v17 = vld [vmem:[%s10339_s8 + $0x1a4] sm:$0xf0]  ;;  %3847 = vmatpush.bf16.msra.mxu0 %v5368_v6 }
 0x1fd   :  { %v5928_v20 = vor.u32 %v6639_v15, %v5927_v12  ;;  %v5563_v12 = vld [vmem:[%s10339_s8 + $0x1c0] sm:$0xf]  ;;  %v6548_v15 = vld [vmem:[%s10339_s8 + $0x1d8] sm:$0xf0]  ;;  %v5540_v35 = vor.u32 %v6538_v16, %v5537_v17  ;;  %v6153_v6 = vld [vmem:[%s10339_s8 + $0x674] sm:$0xf0] }
 0x1fe   :  { %2132 = vst [vmem:[%s10338_s10 + $0x10] sm:$0xff] %v8878_v29  ;;  %3885 = vmatpush.bf16.msra.mxu3 %v6152_v21  ;;  %v5564_v31 = vor.u32 %v6548_v15, %v5563_v12  ;;  %v5901_v12 = vld [vmem:[%s10339_s8 + $0x47c] sm:$0xf0]  ;;  %v6685_v15 = vld [vmem:[%s10339_s8 + $0x624] sm:$0xf] }
 0x1ff   :  { %3871 = vmatpush.bf16.msra.mxu2 %v5928_v20  ;;  %3858 = vmatpush.bf16.msra.mxu1 %v5676_v30  ;;  %v6040_v20 = vor.u32 %v6667_v9, %v6039_v8  ;;  %v5340_v30 = vor.u32 %v6492_v41, %v5339_v14  ;;  %v6510_v8 = vld [vmem:[%s10339_s8 + $0xac] sm:$0xf]  ;;  %v5425_v9 = vld [vmem:[%s10339_s8 + $0xc4] sm:$0xf0]  ;;  %v6629_v41 = vld [vmem:[%s10339_s8 + $0x464] sm:$0xf] }
 0x200   :  { %v5649_v14 = vld [vmem:[%s10339_s8 + $0x284] sm:$0xf0]  ;;  %v5904_v16 = vor.u32 %v6629_v41, %v5901_v12  ;;  %v6125_v17 = vld [vmem:[%s10339_s8 + $0x63c] sm:$0xf0]  ;;  %v6598_v41 = vld [vmem:[%s10339_s8 + $0x368] sm:$0xf0] }
 0x201   :  { %3848 = vmatpush.bf16.msra.mxu0 %v5340_v30 }
 0x202   :  { %3886 = vmatpush.bf16.msra.mxu3 %v6124_v39  ;;  %v5509_v39 = vld [vmem:[%s10339_s8 + $0x16c] sm:$0xf0] }
 0x203   :  { %v2124_v51 = vpop.f32.mrf.mxu3  ;;  %3872 = vmatpush.bf16.msra.mxu2 %v5900_v38  ;;  %3859 = vmatpush.bf16.msra.mxu1 %v5648_v47  ;;  %v6531_v38 = vld [vmem:[%s10339_s8 + $0x154] sm:$0xf] }
 0x204   :  { %v2125_v59 = vadd.f32 %v2124_v51, %v2102_v0  ;;  %v6681_v0 = vld [vmem:[%s10339_s8 + $0x600] sm:$0xf0]  ;;  %v6562_v51 = vld [vmem:[%s10339_s8 + $0x248] sm:$0xf0]  ;;  %v6643_v47 = vld [vmem:[%s10339_s8 + $0x4d4] sm:$0xf] }
 0x205   :  { %v6096_v54 = vor.u32 %v6681_v0, %v6095_v45  ;;  %v5620_v62 = vor.u32 %v6562_v51, %v5619_v50  ;;  %v5988_v0 = vor.u32 %v6650_v27, %v5985_v32  ;;  %v6181_v50 = vld [vmem:[%s10339_s8 + $0x6ac] sm:$0xf0]  ;;  %v5512_v51 = vor.u32 %v6531_v38, %v5509_v39  ;;  %v6678_v27 = vld [vmem:[%s10339_s8 + $0x5ec] sm:$0xf]  ;;  %v5369_v32 = vld [vmem:[%s10339_s8 + $0x54] sm:$0xf0] }
 0x206   :  { %2131 = vst [vmem:[%s10338_s10 + $0x8] sm:$0xff] %v2125_v59  ;;  %v2136_v2 = vmul.f32 0.5, %v2125_v59  ;;  %v6618_v59 = vld [vmem:[%s10339_s8 + $0x408] sm:$0xf0]  ;;  %v5960_v60 = vor.u32 %v6643_v47, %v5957_v48  ;;  %v6184_v4 = vor.u32 %v6699_v49, %v6181_v50  ;;  %v6615_v38 = vld [vmem:[%s10339_s8 + $0x3f4] sm:$0xf] }
 0x207   :  { %3873 = vmatpush.bf16.msra.mxu2 %v5872_v52  ;;  %3887 = vmatpush.bf16.msra.mxu3 %v6096_v54  ;;  %v5736_v52 = vor.u32 %v6587_v40, %v5733_v43  ;;  %v6524_v54 = vld [vmem:[%s10339_s8 + $0x11c] sm:$0xf]  ;;  %v5845_v39 = vld [vmem:[%s10339_s8 + $0x40c] sm:$0xf0]  ;;  %v6671_v40 = vld [vmem:[%s10339_s8 + $0x5b4] sm:$0xf] }
 0x208   :  { %v2138_v19 = vmul.f32 1.442695, %v2136_v2  ;;  %v5844_v2 = vor.u32 %v6618_v59, %v5843_v55  ;;  %3860 = vmatpush.bf16.msra.mxu1 %v5620_v62  ;;  %v5481_v55 = vld [vmem:[%s10339_s8 + $0x134] sm:$0xf0]  ;;  %v6517_v62 = vld [vmem:[%s10339_s8 + $0xe4] sm:$0xf]  ;;  %v5848_v43 = vor.u32 %v6615_v38, %v5845_v39 }
 0x209   :  { %v5705_v59 = vld [vmem:[%s10339_s8 + $0x2f4] sm:$0xf0]  ;;  %v5456_v1 = vor.u32 %v6517_v62, %v5453_v37  ;;  %v6545_v47 = vld [vmem:[%s10339_s8 + $0x1c4] sm:$0xf]  ;;  %v5565_v49 = vld [vmem:[%s10339_s8 + $0x1dc] sm:$0xf0] }
 0x20a   :  { %6713 = vpow2.f32 %v2138_v19  ;;  %v5816_v19 = vor.u32 %v6611_v7, %v5815_v44  ;;  %v6692_v44 = vld [vmem:[%s10339_s8 + $0x65c] sm:$0xf]  ;;  %v5568_v50 = vor.u32 %v6545_v47, %v5565_v49  ;;  %v6013_v62 = vld [vmem:[%s10339_s8 + $0x55c] sm:$0xf0] }
 0x20b   :  { %v2127_v22 = vpop.f32.mrf.mxu3  ;;  %3874 = vmatpush.bf16.msra.mxu2 %v5844_v2  ;;  %3888 = vmatpush.bf16.msra.mxu3 %v6068_v5  ;;  %v6636_v2 = vld [vmem:[%s10339_s8 + $0x49c] sm:$0xf]  ;;  %v5929_v5 = vld [vmem:[%s10339_s8 + $0x4b4] sm:$0xf0]  ;;  %v6156_v7 = vor.u32 %v6692_v44, %v6153_v6 }
 0x20c   :  { %v2128_v28 = vadd.f32 %v2127_v22, %v2105_v18  ;;  %v6594_v18 = vld [vmem:[%s10339_s8 + $0x34c] sm:$0xf]  ;;  %3861 = vmatpush.bf16.msra.mxu1 %v5592_v13 }
 0x20d   :  { %v6566_v13 = vld [vmem:[%s10339_s8 + $0x26c] sm:$0xf] }
 0x20e   :  { %2133 = vst [vmem:[%s10338_s10 + $0x18] sm:$0xff] %v2128_v28  ;;  %v2137_v36 = vmul.f32 0.5, %v2128_v28 }
 0x20f   :  { %3875 = vmatpush.bf16.msra.mxu2 %v5816_v19  ;;  %3889 = vmatpush.bf16.msra.mxu3 %v6040_v20  ;;  %v6503_v19 = vld [vmem:[%s10339_s8 + $0x74] sm:$0xf]  ;;  %v5397_v20 = vld [vmem:[%s10339_s8 + $0x8c] sm:$0xf0] }
 0x210   :  { %v2140_v46 = vmul.f32 1.442695, %v2137_v36  ;;  %v6714_v61 = vpop.eup %6713  ;;  %v5764_v36 = vor.u32 %v6594_v18, %v5761_v24  ;;  %3862 = vmatpush.bf16.msra.mxu1 %v5564_v31  ;;  %v6128_v18 = vor.u32 %v6685_v15, %v6125_v17  ;;  %v5621_v24 = vld [vmem:[%s10339_s8 + $0x24c] sm:$0xf0]  ;;  %v6496_v31 = vld [vmem:[%s10339_s8 + $0x3c] sm:$0xf] }
 0x211   :  { %v2142_v53 = vmul.f32 %v6714_v61, %v2134_v23  ;;  %v5484_v61 = vor.u32 %v6524_v54, %v5481_v55  ;;  %v5708_v23 = vor.u32 %v6580_v58, %v5705_v59  ;;  %v6664_v54 = vld [vmem:[%s10339_s8 + $0x57c] sm:$0xf]  ;;  %v6041_v55 = vld [vmem:[%s10339_s8 + $0x594] sm:$0xf0] }
 0x212   :  { %6715 = vpow2.f32 %v2140_v46  ;;  %v6212_v46 = vor.u32 %v6706_v33, %v6209_v34  ;;  %v6552_v33 = vld [vmem:[%s10339_s8 + $0x1fc] sm:$0xf]  ;;  %v5372_v34 = vor.u32 %v6496_v31, %v5369_v32  ;;  %v6044_v59 = vor.u32 %v6664_v54, %v6041_v55  ;;  %v5963_v54 = vld [vmem:[%s10339_s8 + $0x4d8] sm:$0xf]  ;;  %v6647_v55 = vld [vmem:[%s10339_s8 + $0x4f0] sm:$0xf0] }
 0x213   :  { %v2144_v21 = vadd.f32 %v2142_v53, %v8809_v56  ;;  %v6011_v56 = vld [vmem:[%s10339_s8 + $0x540] sm:$0xf]  ;;  %3876 = vmatpush.bf16.msra.mxu2 %v5788_v11  ;;  %v5932_v53 = vor.u32 %v6636_v2, %v5929_v5  ;;  %v6069_v11 = vld [vmem:[%s10339_s8 + $0x5cc] sm:$0xf0] }
 0x218   :  { %v6716_v10 = vpop.eup %6715 }
 0x219   :  { %v2143_v57 = vmul.f32 %v6716_v10, %v2135_v3  ;;  %v5680_v3 = vor.u32 %v6573_v42, %v5677_v63  ;;  %v5428_v10 = vor.u32 %v6510_v8, %v5425_v9  ;;  %v2179_v42 = vld [vmem:[%s10341_s7] sm:$0xf]  ;;  %v5543_v9 = vld [vmem:[%s10339_s8 + $0x190] sm:$0xf] }
 0x21a   :  { %v2182_v2 = vperm.slane %v2179_v42, 1  ;;  %v2183_v12 = vperm.slane %v2179_v42, 2  ;;  %v2184_v15 = vperm.slane %v2179_v42, 3 }
 0x21b   :  { %v2145_v22 = vadd.f32 %v2143_v57, %v8878_v29  ;;  %v6660_v29 = vld [vmem:[%s10339_s8 + $0x558] sm:$0xf0]  ;;  %v5652_v57 = vor.u32 %v6566_v13, %v5649_v14  ;;  %v6542_v14 = vld [vmem:[%s10339_s8 + $0x1a8] sm:$0xf0] }
 0x21c   :  { %v6012_v45 = vor.u32 %v6660_v29, %v6011_v56  ;;  %v5873_v56 = vld [vmem:[%s10339_s8 + $0x444] sm:$0xf0] }
 0x21d   :  { %v2146_v28 = vpack.c.bf16 %v2145_v22, %v2144_v21  ;;  %v6559_v21 = vld [vmem:[%s10339_s8 + $0x234] sm:$0xf]  ;;  %v5400_v22 = vor.u32 %v6503_v19, %v5397_v20  ;;  %v5876_v29 = vor.u32 %v6622_v26, %v5873_v56  ;;  %v5544_v20 = vor.u32 %v6542_v14, %v5543_v9  ;;  %v5739_v56 = vld [vmem:[%s10339_s8 + $0x318] sm:$0xf]  ;;  %v5655_v9 = vld [vmem:[%s10339_s8 + $0x270] sm:$0xf] }
 0x21e   :  { %3890 = vmatpush.bf16.msra.mxu3 %v6012_v45  ;;  %v5624_v25 = vor.u32 %v6559_v21, %v5621_v24  ;;  %v6072_v45 = vor.u32 %v6671_v40, %v6069_v11  ;;  %v6535_v24 = vld [vmem:[%s10339_s8 + $0x170] sm:$0xf0]  ;;  %v6710_v40 = vld [vmem:[%s10339_s8 + $0x6e8] sm:$0xf0]  ;;  %v6528_v11 = vld [vmem:[%s10339_s8 + $0x138] sm:$0xf0] }
 0x21f   :  { %2357 = vmatmul.bf16.vlgmr.msrb.gmra.mxu0 %v2146_v28  ;;  %2371 = vmatmul.bf16.vlgmr.msrb.gmra.mxu1 %v2146_v28 }
 0x220   :  { %2385 = vmatmul.bf16.vlgmr.msrb.gmra.mxu2 %v2146_v28  ;;  %2399 = vmatmul.bf16.vlgmr.msrb.gmra.mxu3 %v2146_v28  ;;  %v6097_v28 = vld [vmem:[%s10339_s8 + $0x604] sm:$0xf0] }
 0x221   :  { %3897 = vmatpush.bf16.msrb.mxu0 %v5540_v35  ;;  %3911 = vmatpush.bf16.msrb.mxu1 %v5764_v36  ;;  %v6100_v30 = vor.u32 %v6678_v27, %v6097_v28  ;;  %v5593_v35 = vld [vmem:[%s10339_s8 + $0x214] sm:$0xf0] }
 0x222   :  { %3925 = vmatpush.bf16.msrb.mxu2 %v5988_v0  ;;  %3939 = vmatpush.bf16.msrb.mxu3 %v6212_v46  ;;  %v5596_v36 = vor.u32 %v6552_v33, %v5593_v35  ;;  %v6489_v0 = vld [vmem:[%s10339_s8 + $0x4] sm:$0xf]  ;;  %v5341_v46 = vld [vmem:[%s10339_s8 + $0x1c] sm:$0xf0]  ;;  %v5991_v33 = vld [vmem:[%s10339_s8 + $0x510] sm:$0xf] }
 0x223   :  { %v5344_v48 = vor.u32 %v6489_v0, %v5341_v46  ;;  %v6215_v35 = vld [vmem:[%s10339_s8 + $0x6d0] sm:$0xf]  ;;  %v6584_v0 = vld [vmem:[%s10339_s8 + $0x2f8] sm:$0xf0] }
 0x225   :  { %3898 = vmatpush.bf16.msrb.mxu0 %v5512_v51  ;;  %3912 = vmatpush.bf16.msrb.mxu1 %v5736_v52  ;;  %v6608_v51 = vld [vmem:[%s10339_s8 + $0x3bc] sm:$0xf]  ;;  %v5817_v52 = vld [vmem:[%s10339_s8 + $0x3d4] sm:$0xf0] }
 0x226   :  { %3926 = vmatpush.bf16.msrb.mxu2 %v5960_v60  ;;  %3940 = vmatpush.bf16.msrb.mxu3 %v6184_v4  ;;  %v5820_v58 = vor.u32 %v6608_v51, %v5817_v52  ;;  %v6601_v60 = vld [vmem:[%s10339_s8 + $0x384] sm:$0xf]  ;;  %v5789_v4 = vld [vmem:[%s10339_s8 + $0x39c] sm:$0xf0]  ;;  %v6216_v51 = vor.u32 %v6710_v40, %v6215_v35  ;;  %v6556_v35 = vld [vmem:[%s10339_s8 + $0x218] sm:$0xf0] }
 0x227   :  { %v6619_v40 = vld [vmem:[%s10339_s8 + $0x410] sm:$0xf0] }
 0x229   :  { %3899 = vmatpush.bf16.msrb.mxu0 %v5484_v61  ;;  %3913 = vmatpush.bf16.msrb.mxu1 %v5708_v23  ;;  %v5792_v61 = vor.u32 %v6601_v60, %v5789_v4  ;;  %v6657_v23 = vld [vmem:[%s10339_s8 + $0x544] sm:$0xf]  ;;  %v6187_v4 = vld [vmem:[%s10339_s8 + $0x698] sm:$0xf] }
 0x22a   :  { %3927 = vmatpush.bf16.msrb.mxu2 %v5932_v53  ;;  %3941 = vmatpush.bf16.msrb.mxu3 %v6156_v7  ;;  %v6016_v37 = vor.u32 %v6657_v23, %v6013_v62  ;;  %v5459_v23 = vld [vmem:[%s10339_s8 + $0xe8] sm:$0xf]  ;;  %v6521_v62 = vld [vmem:[%s10339_s8 + $0x100] sm:$0xf0] }
 0x22d   :  { %3900 = vmatpush.bf16.msrb.mxu0 %v5456_v1  ;;  %3914 = vmatpush.bf16.msrb.mxu1 %v5680_v3  ;;  %v2181_v3 = vperm.slane %v2179_v42, 0  ;;  %v6577_v42 = vld [vmem:[%s10339_s8 + $0x2c0] sm:$0xf0] }
 0x22e   :  { %3928 = vmatpush.bf16.msrb.mxu2 %v5904_v16  ;;  %3942 = vmatpush.bf16.msrb.mxu3 %v6128_v18 }
 0x231   :  { %3901 = vmatpush.bf16.msrb.mxu0 %v5428_v10  ;;  %3915 = vmatpush.bf16.msrb.mxu1 %v5652_v57  ;;  %v5767_v57 = vld [vmem:[%s10339_s8 + $0x350] sm:$0xf] }
 0x232   :  { %3929 = vmatpush.bf16.msrb.mxu2 %v5876_v29  ;;  %3943 = vmatpush.bf16.msrb.mxu3 %v6100_v30  ;;  %v5768_v21 = vor.u32 %v6598_v41, %v5767_v57  ;;  %v6591_v29 = vld [vmem:[%s10339_s8 + $0x330] sm:$0xf0]  ;;  %v5907_v57 = vld [vmem:[%s10339_s8 + $0x468] sm:$0xf]  ;;  %v6633_v41 = vld [vmem:[%s10339_s8 + $0x480] sm:$0xf0] }
 0x233   :  { %v5740_v39 = vor.u32 %v6591_v29, %v5739_v56  ;;  %v5879_v56 = vld [vmem:[%s10339_s8 + $0x430] sm:$0xf]  ;;  %v6626_v29 = vld [vmem:[%s10339_s8 + $0x448] sm:$0xf0] }
 0x235   :  { %3902 = vmatpush.bf16.msrb.mxu0 %v5400_v22  ;;  %3916 = vmatpush.bf16.msrb.mxu1 %v5624_v25  ;;  %v5515_v22 = vld [vmem:[%s10339_s8 + $0x158] sm:$0xf] }
 0x236   :  { %3930 = vmatpush.bf16.msrb.mxu2 %v5848_v43  ;;  %3944 = vmatpush.bf16.msrb.mxu3 %v6072_v45  ;;  %v5516_v32 = vor.u32 %v6535_v24, %v5515_v22  ;;  %v5487_v43 = vld [vmem:[%s10339_s8 + $0x120] sm:$0xf]  ;;  %v5908_v22 = vor.u32 %v6633_v41, %v5907_v57  ;;  %v6707_v57 = vld [vmem:[%s10339_s8 + $0x6d4] sm:$0xf]  ;;  %v6217_v41 = vld [vmem:[%s10339_s8 + $0x6ec] sm:$0xf0] }
 0x237   :  { %v5711_v45 = vld [vmem:[%s10339_s8 + $0x2e0] sm:$0xf]  ;;  %v5488_v52 = vor.u32 %v6528_v11, %v5487_v43  ;;  %v6075_v43 = vld [vmem:[%s10339_s8 + $0x5b8] sm:$0xf]  ;;  %v6675_v11 = vld [vmem:[%s10339_s8 + $0x5d0] sm:$0xf0] }
 0x238   :  { %v5712_v60 = vor.u32 %v6584_v0, %v5711_v45 }
 0x239   :  { %3903 = vmatpush.bf16.msrb.mxu0 %v5372_v34  ;;  %3917 = vmatpush.bf16.msrb.mxu1 %v5596_v36  ;;  %v6654_v34 = vld [vmem:[%s10339_s8 + $0x528] sm:$0xf0] }
 0x23a   :  { %3931 = vmatpush.bf16.msrb.mxu2 %v5820_v58  ;;  %3945 = vmatpush.bf16.msrb.mxu3 %v6044_v59 }
 0x23d   :  { %3904 = vmatpush.bf16.msrb.mxu0 %v5344_v48  ;;  %3918 = vmatpush.bf16.msrb.mxu1 %v5568_v50  ;;  %v5992_v50 = vor.u32 %v6654_v34, %v5991_v33  ;;  %v6500_v33 = vld [vmem:[%s10339_s8 + $0x58] sm:$0xf0]  ;;  %v5599_v34 = vld [vmem:[%s10339_s8 + $0x200] sm:$0xf] }
 0x23e   :  { %3932 = vmatpush.bf16.msrb.mxu2 %v5792_v61  ;;  %3946 = vmatpush.bf16.msrb.mxu3 %v6016_v37  ;;  %v6703_v61 = vld [vmem:[%s10339_s8 + $0x6b0] sm:$0xf0]  ;;  %v5683_v37 = vld [vmem:[%s10339_s8 + $0x2a8] sm:$0xf]  ;;  %v5600_v0 = vor.u32 %v6556_v35, %v5599_v34  ;;  %v6574_v34 = vld [vmem:[%s10339_s8 + $0x2ac] sm:$0xf] }
 0x23f   :  { %v5685_v35 = vld [vmem:[%s10339_s8 + $0x2c4] sm:$0xf0] }
 0x29c   :  { %v2358_v63 = vpop.f32.mrf.mxu0  ;;  %v2372_v1 = vpop.f32.mrf.mxu1 }
 0x29d   :  { %v2359_v5 = vadd.f32 %v2358_v63, %v2181_v3  ;;  %v2373_v44 = vadd.f32 %v2372_v1, %v2182_v2  ;;  %v5964_v63 = vor.u32 %v6647_v55, %v5963_v54  ;;  %v6188_v1 = vor.u32 %v6703_v61, %v6187_v4  ;;  %v6595_v55 = vld [vmem:[%s10339_s8 + $0x354] sm:$0xf]  ;;  %v5823_v4 = vld [vmem:[%s10339_s8 + $0x3c0] sm:$0xf]  ;;  %v6612_v61 = vld [vmem:[%s10339_s8 + $0x3d8] sm:$0xf0] }
 0x29e   :  { %v6076_v54 = vor.u32 %v6675_v11, %v6075_v43  ;;  %v6693_v43 = vld [vmem:[%s10339_s8 + $0x664] sm:$0xf]  ;;  %v6161_v11 = vld [vmem:[%s10339_s8 + $0x67c] sm:$0xf0] }
 0x29f   :  { %v2405_v16 = vmax.f32 %v2359_v5, 0.0  ;;  %v2406_v17 = vmax.f32 %v2373_v44, 0.0  ;;  %v5684_v5 = vor.u32 %v6577_v42, %v5683_v37  ;;  %v6640_v44 = vld [vmem:[%s10339_s8 + $0x4b8] sm:$0xf0] }
 0x2a3   :  { %v2386_v53 = vpop.f32.mrf.mxu2  ;;  %v2400_v6 = vpop.f32.mrf.mxu3 }
 0x2a4   :  { %v2360_v7 = vpop.f32.mrf.mxu0  ;;  %v2374_v8 = vpop.f32.mrf.mxu1  ;;  %v2387_v27 = vadd.f32 %v2386_v53, %v2183_v12  ;;  %v2401_v28 = vadd.f32 %v2400_v6, %v2184_v15  ;;  %v6159_v53 = vld [vmem:[%s10339_s8 + $0x660] sm:$0xf]  ;;  %v6696_v6 = vld [vmem:[%s10339_s8 + $0x678] sm:$0xf0] }
 0x2a5   :  { %v2361_v10 = vadd.f32 %v2360_v7, %v2181_v3  ;;  %v2375_v13 = vadd.f32 %v2374_v8, %v2182_v2  ;;  %v5935_v3 = vld [vmem:[%s10339_s8 + $0x4a0] sm:$0xf]  ;;  %v5460_v2 = vor.u32 %v6521_v62, %v5459_v23  ;;  %v5431_v7 = vld [vmem:[%s10339_s8 + $0xb0] sm:$0xf]  ;;  %v6514_v8 = vld [vmem:[%s10339_s8 + $0xc8] sm:$0xf0]  ;;  %v6160_v14 = vor.u32 %v6696_v6, %v6159_v53 }
 0x2a6   :  { %v2407_v46 = vmax.f32 %v2387_v27, 0.0  ;;  %v2408_v47 = vmax.f32 %v2401_v28, 0.0  ;;  %v6103_v27 = vld [vmem:[%s10339_s8 + $0x5f0] sm:$0xf]  ;;  %v6682_v28 = vld [vmem:[%s10339_s8 + $0x608] sm:$0xf0] }
 0x2a7   :  { %v2409_v18 = vmax.f32 %v2361_v10, 0.0  ;;  %v2410_v19 = vmax.f32 %v2375_v13, 0.0  ;;  %v6570_v10 = vld [vmem:[%s10339_s8 + $0x288] sm:$0xf0]  ;;  %v5936_v13 = vor.u32 %v6640_v44, %v5935_v3  ;;  %v6047_v23 = vld [vmem:[%s10339_s8 + $0x580] sm:$0xf]  ;;  %v5824_v44 = vor.u32 %v6612_v61, %v5823_v4 }
 0x2a8   :  { %v6668_v62 = vld [vmem:[%s10339_s8 + $0x598] sm:$0xf0]  ;;  %v5741_v6 = vld [vmem:[%s10339_s8 + $0x334] sm:$0xf0] }
 0x2a9   :  { %v9308_v25 = vpack.c.bf16 %v2409_v18, %v2405_v16  ;;  %v9310_v26 = vpack.c.bf16 %v2410_v19, %v2406_v17  ;;  %v5432_v16 = vor.u32 %v6514_v8, %v5431_v7  ;;  %v5656_v17 = vor.u32 %v6570_v10, %v5655_v9  ;;  %v5403_v18 = vld [vmem:[%s10339_s8 + $0x78] sm:$0xf]  ;;  %v6507_v19 = vld [vmem:[%s10339_s8 + $0x90] sm:$0xf0]  ;;  %v6532_v3 = vld [vmem:[%s10339_s8 + $0x15c] sm:$0xf] }
 0x2aa   :  { %v6048_v53 = vor.u32 %v6668_v62, %v6047_v23  ;;  %v5795_v7 = vld [vmem:[%s10339_s8 + $0x388] sm:$0xf]  ;;  %v6605_v8 = vld [vmem:[%s10339_s8 + $0x3a0] sm:$0xf0]  ;;  %v6504_v23 = vld [vmem:[%s10339_s8 + $0x7c] sm:$0xf] }
 0x2ab   :  { %v2388_v30 = vpop.f32.mrf.mxu2  ;;  %v2402_v31 = vpop.f32.mrf.mxu3  ;;  %3849 = vmatmul.bf16.vlgmr.msra.gmra.mxu0 %v9308_v25  ;;  %3863 = vmatmul.bf16.vlgmr.msra.gmra.mxu1 %v9310_v26  ;;  %v6019_v9 = vld [vmem:[%s10339_s8 + $0x548] sm:$0xf]  ;;  %v6661_v10 = vld [vmem:[%s10339_s8 + $0x560] sm:$0xf0]  ;;  %v5405_v62 = vld [vmem:[%s10339_s8 + $0x94] sm:$0xf0] }
 0x2ac   :  { %v2389_v36 = vadd.f32 %v2388_v30, %v2183_v12  ;;  %v2403_v38 = vadd.f32 %v2402_v31, %v2184_v15  ;;  %3953 = vmatpush.bf16.msra.mxu0 %v5544_v20  ;;  %3967 = vmatpush.bf16.msra.mxu1 %v5768_v21  ;;  %v6131_v12 = vld [vmem:[%s10339_s8 + $0x628] sm:$0xf]  ;;  %v6689_v15 = vld [vmem:[%s10339_s8 + $0x640] sm:$0xf0]  ;;  %v5627_v20 = vld [vmem:[%s10339_s8 + $0x238] sm:$0xf]  ;;  %v5404_v30 = vor.u32 %v6507_v19, %v5403_v18 }
 0x2ad   :  { %v6563_v21 = vld [vmem:[%s10339_s8 + $0x250] sm:$0xf0]  ;;  %v6132_v24 = vor.u32 %v6689_v15, %v6131_v12  ;;  %v6020_v18 = vor.u32 %v6661_v10, %v6019_v9  ;;  %v5489_v19 = vld [vmem:[%s10339_s8 + $0x13c] sm:$0xf0]  ;;  %v6553_v9 = vld [vmem:[%s10339_s8 + $0x204] sm:$0xf] }
 0x2ae   :  { %v2411_v48 = vmax.f32 %v2389_v36, 0.0  ;;  %v2412_v49 = vmax.f32 %v2403_v38, 0.0  ;;  %v5628_v31 = vor.u32 %v6563_v21, %v5627_v20  ;;  %v5880_v36 = vor.u32 %v6626_v29, %v5879_v56  ;;  %v6581_v20 = vld [vmem:[%s10339_s8 + $0x2e4] sm:$0xf]  ;;  %v5713_v21 = vld [vmem:[%s10339_s8 + $0x2fc] sm:$0xf0] }
 0x2af   :  { %v6104_v38 = vor.u32 %v6682_v28, %v6103_v27  ;;  %v6644_v56 = vld [vmem:[%s10339_s8 + $0x4dc] sm:$0xf]  ;;  %v5965_v29 = vld [vmem:[%s10339_s8 + $0x4f4] sm:$0xf0]  ;;  %v5601_v10 = vld [vmem:[%s10339_s8 + $0x21c] sm:$0xf0] }
 0x2b0   :  { %v9350_v58 = vpack.c.bf16 %v2411_v48, %v2407_v46  ;;  %v9352_v59 = vpack.c.bf16 %v2412_v49, %v2408_v47  ;;  %3954 = vmatpush.bf16.msra.mxu0 %v5516_v32  ;;  %3968 = vmatpush.bf16.msra.mxu1 %v5740_v39  ;;  %v5375_v32 = vld [vmem:[%s10339_s8 + $0x40] sm:$0xf]  ;;  %v5851_v39 = vld [vmem:[%s10339_s8 + $0x3f8] sm:$0xf]  ;;  %v5347_v46 = vld [vmem:[%s10339_s8 + $0x8] sm:$0xf] }
 0x2b1   :  { %v5376_v45 = vor.u32 %v6500_v33, %v5375_v32  ;;  %v6493_v47 = vld [vmem:[%s10339_s8 + $0x20] sm:$0xf0]  ;;  %v5571_v48 = vld [vmem:[%s10339_s8 + $0x1c8] sm:$0xf]  ;;  %v6700_v27 = vld [vmem:[%s10339_s8 + $0x69c] sm:$0xf] }
 0x2b2   :  { %3877 = vmatmul.bf16.vlgmr.msra.gmra.mxu2 %v9350_v58  ;;  %3891 = vmatmul.bf16.vlgmr.msra.gmra.mxu3 %v9352_v59  ;;  %v6549_v49 = vld [vmem:[%s10339_s8 + $0x1e0] sm:$0xf0]  ;;  %v5348_v37 = vor.u32 %v6493_v47, %v5347_v46  ;;  %v6189_v28 = vld [vmem:[%s10339_s8 + $0x6b4] sm:$0xf0]  ;;  %v6518_v32 = vld [vmem:[%s10339_s8 + $0xec] sm:$0xf] }
 0x2b3   :  { %3981 = vmatpush.bf16.msra.mxu2 %v5992_v50  ;;  %3995 = vmatpush.bf16.msra.mxu3 %v6216_v51  ;;  %v6539_v50 = vld [vmem:[%s10339_s8 + $0x194] sm:$0xf]  ;;  %v5545_v51 = vld [vmem:[%s10339_s8 + $0x1ac] sm:$0xf0]  ;;  %v5572_v42 = vor.u32 %v6549_v49, %v5571_v48  ;;  %v5461_v33 = vld [vmem:[%s10339_s8 + $0x104] sm:$0xf0] }
 0x2b4   :  { %3955 = vmatpush.bf16.msra.mxu0 %v5488_v52  ;;  %3969 = vmatpush.bf16.msra.mxu1 %v5712_v60  ;;  %v5852_v52 = vor.u32 %v6619_v40, %v5851_v39  ;;  %v5769_v60 = vld [vmem:[%s10339_s8 + $0x36c] sm:$0xf0]  ;;  %v6637_v39 = vld [vmem:[%s10339_s8 + $0x4a4] sm:$0xf]  ;;  %v5937_v40 = vld [vmem:[%s10339_s8 + $0x4bc] sm:$0xf0] }
 0x2b5   :  { %v6511_v46 = vld [vmem:[%s10339_s8 + $0xb4] sm:$0xf]  ;;  %v5433_v47 = vld [vmem:[%s10339_s8 + $0xcc] sm:$0xf0] }
 0x2b6   :  { %v6567_v48 = vld [vmem:[%s10339_s8 + $0x274] sm:$0xf]  ;;  %v5657_v49 = vld [vmem:[%s10339_s8 + $0x28c] sm:$0xf0]  ;;  %v5436_v4 = vor.u32 %v6511_v46, %v5433_v47  ;;  %v6602_v46 = vld [vmem:[%s10339_s8 + $0x38c] sm:$0xf] }
 0x2b7   :  { %3982 = vmatpush.bf16.msra.mxu2 %v5964_v63  ;;  %3996 = vmatpush.bf16.msra.mxu3 %v6188_v1  ;;  %v5548_v63 = vor.u32 %v6539_v50, %v5545_v51  ;;  %v5772_v1 = vor.u32 %v6595_v55, %v5769_v60  ;;  %v5940_v50 = vor.u32 %v6637_v39, %v5937_v40  ;;  %v6686_v55 = vld [vmem:[%s10339_s8 + $0x62c] sm:$0xf]  ;;  %v6133_v60 = vld [vmem:[%s10339_s8 + $0x644] sm:$0xf0]  ;;  %v5523_v39 = vld [vmem:[%s10339_s8 + $0x160] sm:$0xf] }
 0x2b8   :  { %3956 = vmatpush.bf16.msra.mxu0 %v5460_v2  ;;  %3970 = vmatpush.bf16.msra.mxu1 %v5684_v5  ;;  %v5517_v2 = vld [vmem:[%s10339_s8 + $0x174] sm:$0xf0]  ;;  %v6588_v5 = vld [vmem:[%s10339_s8 + $0x31c] sm:$0xf]  ;;  %v6164_v51 = vor.u32 %v6693_v43, %v6161_v11  ;;  %v5660_v61 = vor.u32 %v6567_v48, %v5657_v49  ;;  %v5747_v43 = vld [vmem:[%s10339_s8 + $0x320] sm:$0xf] }
 0x2b9   :  { %v5520_v12 = vor.u32 %v6532_v3, %v5517_v2  ;;  %v5744_v15 = vor.u32 %v6588_v5, %v5741_v6  ;;  %v6623_v3 = vld [vmem:[%s10339_s8 + $0x434] sm:$0xf]  ;;  %v5881_v2 = vld [vmem:[%s10339_s8 + $0x44c] sm:$0xf0]  ;;  %v6536_v40 = vld [vmem:[%s10339_s8 + $0x178] sm:$0xf0] }
 0x2ba   :  { %v6679_v5 = vld [vmem:[%s10339_s8 + $0x5f4] sm:$0xf]  ;;  %v5797_v47 = vld [vmem:[%s10339_s8 + $0x3a4] sm:$0xf0]  ;;  %v6658_v48 = vld [vmem:[%s10339_s8 + $0x54c] sm:$0xf] }
 0x2bb   :  { %3983 = vmatpush.bf16.msra.mxu2 %v5936_v13  ;;  %3997 = vmatpush.bf16.msra.mxu3 %v6160_v14  ;;  %v6651_v13 = vld [vmem:[%s10339_s8 + $0x514] sm:$0xf]  ;;  %v5993_v14 = vld [vmem:[%s10339_s8 + $0x52c] sm:$0xf0]  ;;  %v6021_v49 = vld [vmem:[%s10339_s8 + $0x564] sm:$0xf0] }
 0x2bc   :  { %3905 = vmatmul.bf16.vlgmr.msrb.gmra.mxu0 %v9308_v25  ;;  %3919 = vmatmul.bf16.vlgmr.msrb.gmra.mxu1 %v9310_v26 }
 0x2bd   :  { %3957 = vmatpush.bf16.msra.mxu0 %v5432_v16  ;;  %3971 = vmatpush.bf16.msra.mxu1 %v5656_v17  ;;  %v6525_v16 = vld [vmem:[%s10339_s8 + $0x124] sm:$0xf]  ;;  %v5796_v17 = vor.u32 %v6605_v8, %v5795_v7  ;;  %v5377_v8 = vld [vmem:[%s10339_s8 + $0x5c] sm:$0xf0] }
 0x2be   :  { %v6497_v7 = vld [vmem:[%s10339_s8 + $0x44] sm:$0xf] }
 0x2bf   :  { %3984 = vmatpush.bf16.msra.mxu2 %v5908_v22  ;;  %3998 = vmatpush.bf16.msra.mxu3 %v6132_v24  ;;  %v5996_v22 = vor.u32 %v6651_v13, %v5993_v14  ;;  %v6220_v24 = vor.u32 %v6707_v57, %v6217_v41  ;;  %v5884_v13 = vor.u32 %v6623_v3, %v5881_v2  ;;  %v6616_v57 = vld [vmem:[%s10339_s8 + $0x3fc] sm:$0xf]  ;;  %v5853_v41 = vld [vmem:[%s10339_s8 + $0x414] sm:$0xf0]  ;;  %v5971_v3 = vld [vmem:[%s10339_s8 + $0x4e0] sm:$0xf] }
 0x2c0   :  { %v6648_v2 = vld [vmem:[%s10339_s8 + $0x4f8] sm:$0xf0] }
 0x2c1   :  { %3958 = vmatpush.bf16.msra.mxu0 %v5404_v30  ;;  %3972 = vmatpush.bf16.msra.mxu1 %v5628_v31  ;;  %v5492_v30 = vor.u32 %v6525_v16, %v5489_v19  ;;  %v5716_v31 = vor.u32 %v6581_v20, %v5713_v21  ;;  %v5380_v16 = vor.u32 %v6497_v7, %v5377_v8  ;;  %v5349_v19 = vld [vmem:[%s10339_s8 + $0x24] sm:$0xf0]  ;;  %v6546_v20 = vld [vmem:[%s10339_s8 + $0x1cc] sm:$0xf]  ;;  %v5467_v7 = vld [vmem:[%s10339_s8 + $0xf0] sm:$0xf] }
 0x2c2   :  { %3933 = vmatmul.bf16.vlgmr.msrb.gmra.mxu2 %v9350_v58  ;;  %3947 = vmatmul.bf16.vlgmr.msrb.gmra.mxu3 %v9352_v59  ;;  %v5573_v21 = vld [vmem:[%s10339_s8 + $0x1e4] sm:$0xf0]  ;;  %v6522_v8 = vld [vmem:[%s10339_s8 + $0x108] sm:$0xf0] }
 0x2c3   :  { %3985 = vmatpush.bf16.msra.mxu2 %v5880_v36  ;;  %3999 = vmatpush.bf16.msra.mxu3 %v6104_v38  ;;  %v5968_v36 = vor.u32 %v6644_v56, %v5965_v29  ;;  %v6192_v38 = vor.u32 %v6700_v27, %v6189_v28  ;;  %v5856_v56 = vor.u32 %v6616_v57, %v5853_v41  ;;  %v5775_v27 = vld [vmem:[%s10339_s8 + $0x358] sm:$0xf]  ;;  %v6599_v28 = vld [vmem:[%s10339_s8 + $0x370] sm:$0xf0]  ;;  %v5943_v57 = vld [vmem:[%s10339_s8 + $0x4a8] sm:$0xf] }
 0x2c4   :  { %v6641_v41 = vld [vmem:[%s10339_s8 + $0x4c0] sm:$0xf0] }
 0x2c5   :  { %3959 = vmatpush.bf16.msra.mxu0 %v5376_v45  ;;  %3973 = vmatpush.bf16.msra.mxu1 %v5600_v0  ;;  %v5464_v45 = vor.u32 %v6518_v32, %v5461_v33  ;;  %v5688_v0 = vor.u32 %v6574_v34, %v5685_v35  ;;  %v6665_v32 = vld [vmem:[%s10339_s8 + $0x584] sm:$0xf]  ;;  %v6049_v33 = vld [vmem:[%s10339_s8 + $0x59c] sm:$0xf0]  ;;  %v5576_v35 = vor.u32 %v6546_v20, %v5573_v21 }
 0x2c6   :  { %v5944_v20 = vor.u32 %v6641_v41, %v5943_v57  ;;  %v6533_v57 = vld [vmem:[%s10339_s8 + $0x164] sm:$0xf]  ;;  %v5525_v41 = vld [vmem:[%s10339_s8 + $0x17c] sm:$0xf0] }
 0x2c7   :  { %3986 = vmatpush.bf16.msra.mxu2 %v5852_v52  ;;  %4000 = vmatpush.bf16.msra.mxu3 %v6076_v54  ;;  %v6630_v52 = vld [vmem:[%s10339_s8 + $0x46c] sm:$0xf]  ;;  %v5909_v54 = vld [vmem:[%s10339_s8 + $0x484] sm:$0xf0] }
 0x2c9   :  { %3960 = vmatpush.bf16.msra.mxu0 %v5348_v37  ;;  %3974 = vmatpush.bf16.msra.mxu1 %v5572_v42  ;;  %v6560_v37 = vld [vmem:[%s10339_s8 + $0x23c] sm:$0xf]  ;;  %v5629_v42 = vld [vmem:[%s10339_s8 + $0x254] sm:$0xf0] }
 0x2ca   :  { %v5632_v6 = vor.u32 %v6560_v37, %v5629_v42 }
 0x2cb   :  { %3987 = vmatpush.bf16.msra.mxu2 %v5824_v44  ;;  %4001 = vmatpush.bf16.msra.mxu3 %v6048_v53  ;;  %v6105_v44 = vld [vmem:[%s10339_s8 + $0x60c] sm:$0xf0]  ;;  %v5408_v53 = vor.u32 %v6504_v23, %v5405_v62  ;;  %v5495_v23 = vld [vmem:[%s10339_s8 + $0x128] sm:$0xf]  ;;  %v6529_v62 = vld [vmem:[%s10339_s8 + $0x140] sm:$0xf0] }
 0x2cc   :  { %3961 = vmatmul.bf16.vlgmr.msra.gmra.mxu0 %v9308_v25  ;;  %3975 = vmatmul.bf16.vlgmr.msra.gmra.mxu1 %v9310_v26  ;;  %v6108_v14 = vor.u32 %v6679_v5, %v6105_v44  ;;  %v6195_v5 = vld [vmem:[%s10339_s8 + $0x6a0] sm:$0xf]  ;;  %v6704_v44 = vld [vmem:[%s10339_s8 + $0x6b8] sm:$0xf0] }
 0x2cd   :  { %4009 = vmatpush.bf16.msrb.mxu0 %v5548_v63  ;;  %4023 = vmatpush.bf16.msrb.mxu1 %v5772_v1  ;;  %v5912_v63 = vor.u32 %v6630_v52, %v5909_v54  ;;  %v6136_v1 = vor.u32 %v6686_v55, %v6133_v60  ;;  %v6223_v52 = vld [vmem:[%s10339_s8 + $0x6d8] sm:$0xf]  ;;  %v6711_v54 = vld [vmem:[%s10339_s8 + $0x6f0] sm:$0xf0]  ;;  %v5524_v55 = vor.u32 %v6536_v40, %v5523_v39 }
 0x2ce   :  { %v6224_v42 = vor.u32 %v6711_v54, %v6223_v52  ;;  %v5887_v39 = vld [vmem:[%s10339_s8 + $0x438] sm:$0xf]  ;;  %v6627_v40 = vld [vmem:[%s10339_s8 + $0x450] sm:$0xf0]  ;;  %v5859_v52 = vld [vmem:[%s10339_s8 + $0x400] sm:$0xf] }
 0x2cf   :  { %3988 = vmatpush.bf16.msra.mxu2 %v5796_v17  ;;  %4002 = vmatpush.bf16.msra.mxu3 %v6020_v18  ;;  %v5604_v17 = vor.u32 %v6553_v9, %v5601_v10  ;;  %v6490_v18 = vld [vmem:[%s10339_s8 + $0xc] sm:$0xf]  ;;  %v5972_v9 = vor.u32 %v6648_v2, %v5971_v3  ;;  %v6196_v10 = vor.u32 %v6704_v44, %v6195_v5  ;;  %v6620_v54 = vld [vmem:[%s10339_s8 + $0x418] sm:$0xf0]  ;;  %v5553_v2 = vld [vmem:[%s10339_s8 + $0x1b4] sm:$0xf0] }
 0x2d0   :  { %v5352_v34 = vor.u32 %v6490_v18, %v5349_v19  ;;  %v5439_v18 = vld [vmem:[%s10339_s8 + $0xb8] sm:$0xf]  ;;  %v6515_v19 = vld [vmem:[%s10339_s8 + $0xd0] sm:$0xf0]  ;;  %v6540_v3 = vld [vmem:[%s10339_s8 + $0x19c] sm:$0xf] }
 0x2d1   :  { %4010 = vmatpush.bf16.msrb.mxu0 %v5520_v12  ;;  %4024 = vmatpush.bf16.msrb.mxu1 %v5744_v15  ;;  %v6672_v12 = vld [vmem:[%s10339_s8 + $0x5bc] sm:$0xf]  ;;  %v6077_v15 = vld [vmem:[%s10339_s8 + $0x5d4] sm:$0xf0] }
 0x2d2   :  { %3989 = vmatmul.bf16.vlgmr.msra.gmra.mxu2 %v9350_v58  ;;  %4003 = vmatmul.bf16.vlgmr.msra.gmra.mxu3 %v9352_v59  ;;  %v6080_v29 = vor.u32 %v6672_v12, %v6077_v15  ;;  %v6167_v12 = vld [vmem:[%s10339_s8 + $0x668] sm:$0xf]  ;;  %v6697_v15 = vld [vmem:[%s10339_s8 + $0x680] sm:$0xf0]  ;;  %v6596_v5 = vld [vmem:[%s10339_s8 + $0x35c] sm:$0xf] }
 0x2d3   :  { %4037 = vmatpush.bf16.msrb.mxu2 %v5996_v22  ;;  %4051 = vmatpush.bf16.msrb.mxu3 %v6220_v24  ;;  %v5551_v22 = vld [vmem:[%s10339_s8 + $0x198] sm:$0xf]  ;;  %v6543_v24 = vld [vmem:[%s10339_s8 + $0x1b0] sm:$0xf0]  ;;  %v6168_v21 = vor.u32 %v6697_v15, %v6167_v12  ;;  %v6589_v12 = vld [vmem:[%s10339_s8 + $0x324] sm:$0xf] }
 0x2d4   :  { %v5777_v44 = vld [vmem:[%s10339_s8 + $0x374] sm:$0xf0] }
 0x2d5   :  { %4011 = vmatpush.bf16.msrb.mxu0 %v5492_v30  ;;  %4025 = vmatpush.bf16.msrb.mxu1 %v5716_v31  ;;  %v6609_v30 = vld [vmem:[%s10339_s8 + $0x3c4] sm:$0xf]  ;;  %v5825_v31 = vld [vmem:[%s10339_s8 + $0x3dc] sm:$0xf0] }
 0x2d6   :  { %v5828_v11 = vor.u32 %v6609_v30, %v5825_v31  ;;  %v5440_v30 = vor.u32 %v6515_v19, %v5439_v18  ;;  %v5803_v18 = vld [vmem:[%s10339_s8 + $0x390] sm:$0xf]  ;;  %v6606_v19 = vld [vmem:[%s10339_s8 + $0x3a8] sm:$0xf0] }
 0x2d7   :  { %4038 = vmatpush.bf16.msrb.mxu2 %v5968_v36  ;;  %4052 = vmatpush.bf16.msrb.mxu3 %v6192_v38  ;;  %v5552_v36 = vor.u32 %v6543_v24, %v5551_v22  ;;  %v5776_v38 = vor.u32 %v6599_v28, %v5775_v27  ;;  %v5663_v22 = vld [vmem:[%s10339_s8 + $0x278] sm:$0xf]  ;;  %v6571_v24 = vld [vmem:[%s10339_s8 + $0x290] sm:$0xf0]  ;;  %v6139_v27 = vld [vmem:[%s10339_s8 + $0x630] sm:$0xf] }
 0x2d8   :  { %v6690_v28 = vld [vmem:[%s10339_s8 + $0x648] sm:$0xf0]  ;;  %v5664_v31 = vor.u32 %v6571_v24, %v5663_v22  ;;  %v6652_v22 = vld [vmem:[%s10339_s8 + $0x51c] sm:$0xf]  ;;  %v6001_v24 = vld [vmem:[%s10339_s8 + $0x534] sm:$0xf0] }
 0x2d9   :  { %4012 = vmatpush.bf16.msrb.mxu0 %v5464_v45  ;;  %4026 = vmatpush.bf16.msrb.mxu1 %v5688_v0  ;;  %v6052_v45 = vor.u32 %v6665_v32, %v6049_v33  ;;  %v6592_v0 = vld [vmem:[%s10339_s8 + $0x338] sm:$0xf0]  ;;  %v5411_v32 = vld [vmem:[%s10339_s8 + $0x80] sm:$0xf] }
 0x2da   :  { %v5748_v60 = vor.u32 %v6592_v0, %v5747_v43  ;;  %v6508_v33 = vld [vmem:[%s10339_s8 + $0x98] sm:$0xf0]  ;;  %v6111_v43 = vld [vmem:[%s10339_s8 + $0x5f8] sm:$0xf] }
 0x2db   :  { %4039 = vmatpush.bf16.msrb.mxu2 %v5940_v50  ;;  %4053 = vmatpush.bf16.msrb.mxu3 %v6164_v51  ;;  %v5999_v50 = vld [vmem:[%s10339_s8 + $0x518] sm:$0xf]  ;;  %v6655_v51 = vld [vmem:[%s10339_s8 + $0x530] sm:$0xf0] }
 0x2dc   :  { %v6000_v37 = vor.u32 %v6655_v51, %v5999_v50  ;;  %v5607_v50 = vld [vmem:[%s10339_s8 + $0x208] sm:$0xf]  ;;  %v6557_v51 = vld [vmem:[%s10339_s8 + $0x220] sm:$0xf0] }
 0x2dd   :  { %4013 = vmatpush.bf16.msrb.mxu0 %v5436_v4  ;;  %4027 = vmatpush.bf16.msrb.mxu1 %v5660_v61  ;;  %v5800_v4 = vor.u32 %v6602_v46, %v5797_v47  ;;  %v6024_v61 = vor.u32 %v6658_v48, %v6021_v49  ;;  %v5383_v46 = vld [vmem:[%s10339_s8 + $0x48] sm:$0xf]  ;;  %v6501_v47 = vld [vmem:[%s10339_s8 + $0x60] sm:$0xf0]  ;;  %v5888_v48 = vor.u32 %v6627_v40, %v5887_v39  ;;  %v5973_v40 = vld [vmem:[%s10339_s8 + $0x4fc] sm:$0xf0] }
 0x2de   :  { %v6645_v39 = vld [vmem:[%s10339_s8 + $0x4e4] sm:$0xf] }
 0x2df   :  { %4040 = vmatpush.bf16.msrb.mxu2 %v5912_v63  ;;  %4054 = vmatpush.bf16.msrb.mxu3 %v6136_v1  ;;  %v5719_v63 = vld [vmem:[%s10339_s8 + $0x2e8] sm:$0xf]  ;;  %v6585_v1 = vld [vmem:[%s10339_s8 + $0x300] sm:$0xf0] }
 0x2e1   :  { %4014 = vmatpush.bf16.msrb.mxu0 %v5408_v53  ;;  %4028 = vmatpush.bf16.msrb.mxu1 %v5632_v6  ;;  %v5496_v53 = vor.u32 %v6529_v62, %v5495_v23  ;;  %v5720_v6 = vor.u32 %v6585_v1, %v5719_v63  ;;  %v5355_v23 = vld [vmem:[%s10339_s8 + $0x10] sm:$0xf]  ;;  %v6494_v62 = vld [vmem:[%s10339_s8 + $0x28] sm:$0xf0] }
 0x2e2   :  { %v6550_v1 = vld [vmem:[%s10339_s8 + $0x1e8] sm:$0xf0] }
 0x2e3   :  { %4041 = vmatpush.bf16.msrb.mxu2 %v5884_v13  ;;  %4055 = vmatpush.bf16.msrb.mxu3 %v6108_v14  ;;  %v5691_v13 = vld [vmem:[%s10339_s8 + $0x2b0] sm:$0xf]  ;;  %v6578_v14 = vld [vmem:[%s10339_s8 + $0x2c8] sm:$0xf0] }
 0x2e5   :  { %4015 = vmatpush.bf16.msrb.mxu0 %v5380_v16  ;;  %4029 = vmatpush.bf16.msrb.mxu1 %v5604_v17  ;;  %v5468_v16 = vor.u32 %v6522_v8, %v5467_v7  ;;  %v5692_v17 = vor.u32 %v6578_v14, %v5691_v13  ;;  %v6055_v7 = vld [vmem:[%s10339_s8 + $0x588] sm:$0xf]  ;;  %v6669_v8 = vld [vmem:[%s10339_s8 + $0x5a0] sm:$0xf0]  ;;  %v5556_v13 = vor.u32 %v6540_v3, %v5553_v2  ;;  %v6631_v3 = vld [vmem:[%s10339_s8 + $0x474] sm:$0xf] }
 0x2e6   :  { %v5780_v14 = vor.u32 %v6596_v5, %v5777_v44  ;;  %v5917_v2 = vld [vmem:[%s10339_s8 + $0x48c] sm:$0xf0]  ;;  %v6687_v5 = vld [vmem:[%s10339_s8 + $0x634] sm:$0xf] }
 0x2e7   :  { %4042 = vmatpush.bf16.msrb.mxu2 %v5856_v56  ;;  %4056 = vmatpush.bf16.msrb.mxu3 %v6080_v29  ;;  %v5915_v56 = vld [vmem:[%s10339_s8 + $0x470] sm:$0xf]  ;;  %v6634_v29 = vld [vmem:[%s10339_s8 + $0x488] sm:$0xf0] }
 0x2e8   :  { %v6141_v44 = vld [vmem:[%s10339_s8 + $0x64c] sm:$0xf0] }
 0x2e9   :  { %4016 = vmatpush.bf16.msrb.mxu0 %v5352_v34  ;;  %4030 = vmatpush.bf16.msrb.mxu1 %v5576_v35  ;;  %v5916_v34 = vor.u32 %v6634_v29, %v5915_v56  ;;  %v6140_v35 = vor.u32 %v6690_v28, %v6139_v27  ;;  %v6708_v56 = vld [vmem:[%s10339_s8 + $0x6dc] sm:$0xf]  ;;  %v6225_v29 = vld [vmem:[%s10339_s8 + $0x6f4] sm:$0xf0]  ;;  %v5528_v27 = vor.u32 %v6533_v57, %v5525_v41 }
 0x2ea   :  { %v6624_v57 = vld [vmem:[%s10339_s8 + $0x43c] sm:$0xf]  ;;  %v5889_v41 = vld [vmem:[%s10339_s8 + $0x454] sm:$0xf0] }
 0x2eb   :  { %4043 = vmatpush.bf16.msrb.mxu2 %v5828_v11  ;;  %4057 = vmatpush.bf16.msrb.mxu3 %v6052_v45  ;;  %v6683_v11 = vld [vmem:[%s10339_s8 + $0x610] sm:$0xf0]  ;;  %v5412_v45 = vor.u32 %v6508_v33, %v5411_v32  ;;  %v6526_v32 = vld [vmem:[%s10339_s8 + $0x12c] sm:$0xf]  ;;  %v5497_v33 = vld [vmem:[%s10339_s8 + $0x144] sm:$0xf0] }
 0x2ec   :  { %4017 = vmatmul.bf16.vlgmr.msrb.gmra.mxu0 %v9308_v25  ;;  %4031 = vmatmul.bf16.vlgmr.msrb.gmra.mxu1 %v9310_v26  ;;  %v6112_v49 = vor.u32 %v6683_v11, %v6111_v43  ;;  %v6701_v43 = vld [vmem:[%s10339_s8 + $0x6a4] sm:$0xf]  ;;  %v6197_v11 = vld [vmem:[%s10339_s8 + $0x6bc] sm:$0xf0] }
 0x2ed   :  { %4065 = vmatpush.bf16.msra.mxu0 %v5552_v36  ;;  %4079 = vmatpush.bf16.msra.mxu1 %v5776_v38  ;;  %v5635_v36 = vld [vmem:[%s10339_s8 + $0x240] sm:$0xf]  ;;  %v6564_v38 = vld [vmem:[%s10339_s8 + $0x258] sm:$0xf0] }
 0x2ee   :  { %v5636_v0 = vor.u32 %v6564_v38, %v5635_v36  ;;  %v6582_v36 = vld [vmem:[%s10339_s8 + $0x2ec] sm:$0xf]  ;;  %v5721_v38 = vld [vmem:[%s10339_s8 + $0x304] sm:$0xf0] }
 0x2ef   :  { %4044 = vmatpush.bf16.msrb.mxu2 %v5800_v4  ;;  %4058 = vmatpush.bf16.msrb.mxu3 %v6024_v61  ;;  %v5384_v4 = vor.u32 %v6501_v47, %v5383_v46  ;;  %v5608_v61 = vor.u32 %v6557_v51, %v5607_v50  ;;  %v6519_v46 = vld [vmem:[%s10339_s8 + $0xf4] sm:$0xf]  ;;  %v5469_v47 = vld [vmem:[%s10339_s8 + $0x10c] sm:$0xf0] }
 0x2f0   :  { %v6575_v50 = vld [vmem:[%s10339_s8 + $0x2b4] sm:$0xf]  ;;  %v5693_v51 = vld [vmem:[%s10339_s8 + $0x2cc] sm:$0xf0] }
 0x2f1   :  { %4066 = vmatpush.bf16.msra.mxu0 %v5524_v55  ;;  %4080 = vmatpush.bf16.msra.mxu1 %v5748_v60  ;;  %v6083_v55 = vld [vmem:[%s10339_s8 + $0x5c0] sm:$0xf]  ;;  %v6676_v60 = vld [vmem:[%s10339_s8 + $0x5d8] sm:$0xf0] }
 0x2f2   :  { %4045 = vmatmul.bf16.vlgmr.msrb.gmra.mxu2 %v9350_v58  ;;  %4059 = vmatmul.bf16.vlgmr.msrb.gmra.mxu3 %v9352_v59  ;;  %v6084_v63 = vor.u32 %v6676_v60, %v6083_v55  ;;  %v6694_v55 = vld [vmem:[%s10339_s8 + $0x66c] sm:$0xf]  ;;  %v6169_v60 = vld [vmem:[%s10339_s8 + $0x684] sm:$0xf0] }
 0x2f3   :  { %4093 = vmatpush.bf16.msra.mxu2 %v6000_v37  ;;  %4107 = vmatpush.bf16.msra.mxu3 %v6224_v42  ;;  %v5579_v37 = vld [vmem:[%s10339_s8 + $0x1d0] sm:$0xf]  ;;  %v5860_v42 = vor.u32 %v6620_v54, %v5859_v52  ;;  %v6638_v52 = vld [vmem:[%s10339_s8 + $0x4ac] sm:$0xf]  ;;  %v5945_v54 = vld [vmem:[%s10339_s8 + $0x4c4] sm:$0xf0] }
 0x2f5   :  { %4067 = vmatpush.bf16.msra.mxu0 %v5496_v53  ;;  %4081 = vmatpush.bf16.msra.mxu1 %v5720_v6  ;;  %v5831_v53 = vld [vmem:[%s10339_s8 + $0x3c8] sm:$0xf]  ;;  %v6613_v6 = vld [vmem:[%s10339_s8 + $0x3e0] sm:$0xf0] }
 0x2f6   :  { %v5832_v15 = vor.u32 %v6613_v6, %v5831_v53 }
 0x2f7   :  { %4094 = vmatpush.bf16.msra.mxu2 %v5972_v9  ;;  %4108 = vmatpush.bf16.msra.mxu3 %v6196_v10  ;;  %v5356_v9 = vor.u32 %v6494_v62, %v5355_v23  ;;  %v5580_v10 = vor.u32 %v6550_v1, %v5579_v37  ;;  %v6512_v23 = vld [vmem:[%s10339_s8 + $0xbc] sm:$0xf]  ;;  %v5441_v62 = vld [vmem:[%s10339_s8 + $0xd4] sm:$0xf0]  ;;  %v5948_v37 = vor.u32 %v6638_v52, %v5945_v54  ;;  %v5531_v52 = vld [vmem:[%s10339_s8 + $0x168] sm:$0xf] }
 0x2f8   :  { %v5665_v1 = vld [vmem:[%s10339_s8 + $0x294] sm:$0xf0]  ;;  %v5444_v53 = vor.u32 %v6512_v23, %v5441_v62  ;;  %v6537_v54 = vld [vmem:[%s10339_s8 + $0x180] sm:$0xf0]  ;;  %v6603_v23 = vld [vmem:[%s10339_s8 + $0x394] sm:$0xf] }
 0x2f9   :  { %4068 = vmatpush.bf16.msra.mxu0 %v5468_v16  ;;  %4082 = vmatpush.bf16.msra.mxu1 %v5692_v17  ;;  %v6056_v16 = vor.u32 %v6669_v8, %v6055_v7  ;;  %v5749_v17 = vld [vmem:[%s10339_s8 + $0x33c] sm:$0xf0]  ;;  %v6505_v7 = vld [vmem:[%s10339_s8 + $0x84] sm:$0xf]  ;;  %v5805_v62 = vld [vmem:[%s10339_s8 + $0x3ac] sm:$0xf0] }
 0x2fa   :  { %v5752_v28 = vor.u32 %v6589_v12, %v5749_v17  ;;  %v5413_v8 = vld [vmem:[%s10339_s8 + $0x9c] sm:$0xf0]  ;;  %v6680_v12 = vld [vmem:[%s10339_s8 + $0x5fc] sm:$0xf] }
 0x2fb   :  { %4095 = vmatpush.bf16.msra.mxu2 %v5944_v20  ;;  %4109 = vmatpush.bf16.msra.mxu3 %v6168_v21  ;;  %v6027_v20 = vld [vmem:[%s10339_s8 + $0x550] sm:$0xf]  ;;  %v6662_v21 = vld [vmem:[%s10339_s8 + $0x568] sm:$0xf0] }
 0x2fd   :  { %4069 = vmatpush.bf16.msra.mxu0 %v5440_v30  ;;  %4083 = vmatpush.bf16.msra.mxu1 %v5664_v31  ;;  %v5804_v30 = vor.u32 %v6606_v19, %v5803_v18  ;;  %v6028_v31 = vor.u32 %v6662_v21, %v6027_v20  ;;  %v6498_v18 = vld [vmem:[%s10339_s8 + $0x4c] sm:$0xf]  ;;  %v5385_v19 = vld [vmem:[%s10339_s8 + $0x64] sm:$0xf0]  ;;  %v5892_v20 = vor.u32 %v6624_v57, %v5889_v41  ;;  %v6649_v41 = vld [vmem:[%s10339_s8 + $0x500] sm:$0xf0] }
 0x2fe   :  { %v5979_v57 = vld [vmem:[%s10339_s8 + $0x4e8] sm:$0xf] }
 0x2ff   :  { %4096 = vmatpush.bf16.msra.mxu2 %v5916_v34  ;;  %4110 = vmatpush.bf16.msra.mxu3 %v6140_v35  ;;  %v6004_v34 = vor.u32 %v6652_v22, %v6001_v24  ;;  %v6228_v35 = vor.u32 %v6708_v56, %v6225_v29  ;;  %v6554_v22 = vld [vmem:[%s10339_s8 + $0x20c] sm:$0xf]  ;;  %v5609_v24 = vld [vmem:[%s10339_s8 + $0x224] sm:$0xf0]  ;;  %v6617_v56 = vld [vmem:[%s10339_s8 + $0x404] sm:$0xf] }
 0x300   :  { %v5861_v29 = vld [vmem:[%s10339_s8 + $0x41c] sm:$0xf0] }
 0x301   :  { %4070 = vmatpush.bf16.msra.mxu0 %v5412_v45  ;;  %4084 = vmatpush.bf16.msra.mxu1 %v5636_v0  ;;  %v5500_v45 = vor.u32 %v6526_v32, %v5497_v33  ;;  %v5724_v0 = vor.u32 %v6582_v36, %v5721_v38  ;;  %v6491_v32 = vld [vmem:[%s10339_s8 + $0x14] sm:$0xf]  ;;  %v5357_v33 = vld [vmem:[%s10339_s8 + $0x2c] sm:$0xf0] }
 0x302   :  { %v5581_v38 = vld [vmem:[%s10339_s8 + $0x1ec] sm:$0xf0] }
 0x303   :  { %4097 = vmatpush.bf16.msra.mxu2 %v5888_v48  ;;  %4111 = vmatpush.bf16.msra.mxu3 %v6112_v49  ;;  %v5976_v48 = vor.u32 %v6645_v39, %v5973_v40  ;;  %v6200_v49 = vor.u32 %v6701_v43, %v6197_v11  ;;  %v5559_v39 = vld [vmem:[%s10339_s8 + $0x1a0] sm:$0xf]  ;;  %v6544_v40 = vld [vmem:[%s10339_s8 + $0x1b8] sm:$0xf0] }
 0x304   :  { %v5783_v43 = vld [vmem:[%s10339_s8 + $0x360] sm:$0xf]  ;;  %v6600_v11 = vld [vmem:[%s10339_s8 + $0x378] sm:$0xf0] }
 0x305   :  { %4071 = vmatpush.bf16.msra.mxu0 %v5384_v4  ;;  %4085 = vmatpush.bf16.msra.mxu1 %v5608_v61  ;;  %v5472_v4 = vor.u32 %v6519_v46, %v5469_v47  ;;  %v5696_v61 = vor.u32 %v6575_v50, %v5693_v51  ;;  %v6666_v46 = vld [vmem:[%s10339_s8 + $0x58c] sm:$0xf]  ;;  %v6057_v47 = vld [vmem:[%s10339_s8 + $0x5a4] sm:$0xf0]  ;;  %v5560_v50 = vor.u32 %v6544_v40, %v5559_v39  ;;  %v5671_v40 = vld [vmem:[%s10339_s8 + $0x280] sm:$0xf] }
 0x306   :  { %v5784_v51 = vor.u32 %v6600_v11, %v5783_v43  ;;  %v6572_v43 = vld [vmem:[%s10339_s8 + $0x298] sm:$0xf0]  ;;  %v5923_v11 = vld [vmem:[%s10339_s8 + $0x478] sm:$0xf] }
 0x307   :  { %4098 = vmatpush.bf16.msra.mxu2 %v5860_v42  ;;  %4112 = vmatpush.bf16.msra.mxu3 %v6084_v63  ;;  %v6172_v42 = vor.u32 %v6694_v55, %v6169_v60  ;;  %v6568_v63 = vld [vmem:[%s10339_s8 + $0x27c] sm:$0xf]  ;;  %v5755_v55 = vld [vmem:[%s10339_s8 + $0x328] sm:$0xf] }
 0x308   :  { %v5668_v6 = vor.u32 %v6568_v63, %v5665_v1  ;;  %v6007_v63 = vld [vmem:[%s10339_s8 + $0x520] sm:$0xf]  ;;  %v6656_v1 = vld [vmem:[%s10339_s8 + $0x538] sm:$0xf0] }
 0x309   :  { %4072 = vmatpush.bf16.msra.mxu0 %v5356_v9  ;;  %4086 = vmatpush.bf16.msra.mxu1 %v5580_v10  ;;  %v5920_v9 = vor.u32 %v6631_v3, %v5917_v2  ;;  %v6144_v10 = vor.u32 %v6687_v5, %v6141_v44  ;;  %v6231_v3 = vld [vmem:[%s10339_s8 + $0x6e0] sm:$0xf]  ;;  %v6712_v2 = vld [vmem:[%s10339_s8 + $0x6f8] sm:$0xf0]  ;;  %v5532_v5 = vor.u32 %v6537_v54, %v5531_v52  ;;  %v6509_v52 = vld [vmem:[%s10339_s8 + $0xa0] sm:$0xf0] }
 0x30b   :  { %4099 = vmatpush.bf16.msra.mxu2 %v5832_v15  ;;  %4113 = vmatpush.bf16.msra.mxu3 %v6056_v16  ;;  %v6113_v15 = vld [vmem:[%s10339_s8 + $0x614] sm:$0xf0]  ;;  %v5416_v16 = vor.u32 %v6505_v7, %v5413_v8  ;;  %v5503_v7 = vld [vmem:[%s10339_s8 + $0x130] sm:$0xf]  ;;  %v6530_v8 = vld [vmem:[%s10339_s8 + $0x148] sm:$0xf0] }
 0x30c   :  { %4073 = vmatmul.bf16.vlgmr.msra.gmra.mxu0 %v9308_v25  ;;  %4087 = vmatmul.bf16.vlgmr.msra.gmra.mxu1 %v9310_v26  ;;  %v6116_v21 = vor.u32 %v6680_v12, %v6113_v15  ;;  %v6203_v12 = vld [vmem:[%s10339_s8 + $0x6a8] sm:$0xf]  ;;  %v6705_v15 = vld [vmem:[%s10339_s8 + $0x6c0] sm:$0xf0] }
 0x30d   :  { %4121 = vmatpush.bf16.msrb.mxu0 %v5556_v13  ;;  %4135 = vmatpush.bf16.msrb.mxu1 %v5780_v14  ;;  %v6561_v13 = vld [vmem:[%s10339_s8 + $0x244] sm:$0xf]  ;;  %v5637_v14 = vld [vmem:[%s10339_s8 + $0x25c] sm:$0xf0] }
 0x30e   :  { %v5640_v17 = vor.u32 %v6561_v13, %v5637_v14  ;;  %v5727_v13 = vld [vmem:[%s10339_s8 + $0x2f0] sm:$0xf]  ;;  %v6586_v14 = vld [vmem:[%s10339_s8 + $0x308] sm:$0xf0] }
 0x30f   :  { %4100 = vmatpush.bf16.msra.mxu2 %v5804_v30  ;;  %4114 = vmatpush.bf16.msra.mxu3 %v6028_v31  ;;  %v5388_v30 = vor.u32 %v6498_v18, %v5385_v19  ;;  %v5612_v31 = vor.u32 %v6554_v22, %v5609_v24  ;;  %v5475_v19 = vld [vmem:[%s10339_s8 + $0xf8] sm:$0xf]  ;;  %v6204_v22 = vor.u32 %v6705_v15, %v6203_v12 }
 0x310   :  { %v5699_v24 = vld [vmem:[%s10339_s8 + $0x2b8] sm:$0xf] }
 0x311   :  { %4122 = vmatpush.bf16.msrb.mxu0 %v5528_v27  ;;  %4136 = vmatpush.bf16.msrb.mxu1 %v5752_v28  ;;  %v6673_v27 = vld [vmem:[%s10339_s8 + $0x5c4] sm:$0xf]  ;;  %v6085_v28 = vld [vmem:[%s10339_s8 + $0x5dc] sm:$0xf0]  ;;  %v5363_v15 = vld [vmem:[%s10339_s8 + $0x18] sm:$0xf] }
 0x312   :  { %4101 = vmatmul.bf16.vlgmr.msra.gmra.mxu2 %v9350_v58  ;;  %4115 = vmatmul.bf16.vlgmr.msra.gmra.mxu3 %v9352_v59  ;;  %v6088_v36 = vor.u32 %v6673_v27, %v6085_v28  ;;  %v6642_v27 = vld [vmem:[%s10339_s8 + $0x4c8] sm:$0xf0]  ;;  %v6175_v28 = vld [vmem:[%s10339_s8 + $0x670] sm:$0xf] }
 0x313   :  { %4149 = vmatpush.bf16.msrb.mxu2 %v6004_v34  ;;  %4163 = vmatpush.bf16.msrb.mxu3 %v6228_v35  ;;  %v6547_v34 = vld [vmem:[%s10339_s8 + $0x1d4] sm:$0xf]  ;;  %v5864_v35 = vor.u32 %v6617_v56, %v5861_v29  ;;  %v5951_v29 = vld [vmem:[%s10339_s8 + $0x4b0] sm:$0xf] }
 0x314   :  { %v6579_v56 = vld [vmem:[%s10339_s8 + $0x2d0] sm:$0xf0] }
 0x315   :  { %4123 = vmatpush.bf16.msrb.mxu0 %v5500_v45  ;;  %4137 = vmatpush.bf16.msrb.mxu1 %v5724_v0  ;;  %v6610_v45 = vld [vmem:[%s10339_s8 + $0x3cc] sm:$0xf]  ;;  %v5833_v0 = vld [vmem:[%s10339_s8 + $0x3e4] sm:$0xf0] }
 0x316   :  { %v5836_v60 = vor.u32 %v6610_v45, %v5833_v0  ;;  %v6635_v45 = vld [vmem:[%s10339_s8 + $0x490] sm:$0xf0]  ;;  %v6147_v0 = vld [vmem:[%s10339_s8 + $0x638] sm:$0xf] }
 0x317   :  { %4150 = vmatpush.bf16.msrb.mxu2 %v5976_v48  ;;  %4164 = vmatpush.bf16.msrb.mxu3 %v6200_v49  ;;  %v5360_v48 = vor.u32 %v6491_v32, %v5357_v33  ;;  %v5584_v49 = vor.u32 %v6547_v34, %v5581_v38  ;;  %v5700_v33 = vor.u32 %v6579_v56, %v5699_v24  ;;  %v5447_v34 = vld [vmem:[%s10339_s8 + $0xc0] sm:$0xf]  ;;  %v6614_v56 = vld [vmem:[%s10339_s8 + $0x3e8] sm:$0xf0] }
 0x318   :  { %v5952_v38 = vor.u32 %v6642_v27, %v5951_v29  ;;  %v5924_v54 = vor.u32 %v6635_v45, %v5923_v11  ;;  %v6063_v29 = vld [vmem:[%s10339_s8 + $0x590] sm:$0xf]  ;;  %v6670_v27 = vld [vmem:[%s10339_s8 + $0x5a8] sm:$0xf0]  ;;  %v6035_v11 = vld [vmem:[%s10339_s8 + $0x558] sm:$0xf] }
 0x319   :  { %4124 = vmatpush.bf16.msrb.mxu0 %v5472_v4  ;;  %4138 = vmatpush.bf16.msrb.mxu1 %v5696_v61  ;;  %v6060_v4 = vor.u32 %v6666_v46, %v6057_v47  ;;  %v6593_v61 = vld [vmem:[%s10339_s8 + $0x340] sm:$0xf0]  ;;  %v6691_v46 = vld [vmem:[%s10339_s8 + $0x650] sm:$0xf0] }
 0x31a   :  { %v5756_v44 = vor.u32 %v6593_v61, %v5755_v55  ;;  %v6148_v55 = vor.u32 %v6691_v46, %v6147_v0  ;;  %v5895_v61 = vld [vmem:[%s10339_s8 + $0x440] sm:$0xf]  ;;  %v6663_v45 = vld [vmem:[%s10339_s8 + $0x570] sm:$0xf0] }
 0x31b   :  { %4151 = vmatpush.bf16.msrb.mxu2 %v5948_v37  ;;  %4165 = vmatpush.bf16.msrb.mxu3 %v6172_v42  ;;  %v6659_v37 = vld [vmem:[%s10339_s8 + $0x554] sm:$0xf]  ;;  %v6029_v42 = vld [vmem:[%s10339_s8 + $0x56c] sm:$0xf0] }
 0x31d   :  { %4125 = vmatpush.bf16.msrb.mxu0 %v5444_v53  ;;  %4139 = vmatpush.bf16.msrb.mxu1 %v5668_v6  ;;  %v5808_v53 = vor.u32 %v6603_v23, %v5805_v62  ;;  %v6032_v6 = vor.u32 %v6659_v37, %v6029_v42  ;;  %v6628_v23 = vld [vmem:[%s10339_s8 + $0x458] sm:$0xf0]  ;;  %v6119_v62 = vld [vmem:[%s10339_s8 + $0x600] sm:$0xf] }
 0x31e   :  { %v6684_v37 = vld [vmem:[%s10339_s8 + $0x618] sm:$0xf0] }
 0x31f   :  { %4152 = vmatpush.bf16.msrb.mxu2 %v5920_v9  ;;  %4166 = vmatpush.bf16.msrb.mxu3 %v6144_v10  ;;  %v6008_v9 = vor.u32 %v6656_v1, %v6007_v63  ;;  %v6232_v10 = vor.u32 %v6712_v2, %v6231_v3  ;;  %v5391_v1 = vld [vmem:[%s10339_s8 + $0x50] sm:$0xf]  ;;  %v6502_v3 = vld [vmem:[%s10339_s8 + $0x68] sm:$0xf0] }
 0x321   :  { %4126 = vmatpush.bf16.msrb.mxu0 %v5416_v16  ;;  %4140 = vmatpush.bf16.msrb.mxu1 %v5640_v17  ;;  %v5504_v16 = vor.u32 %v6530_v8, %v5503_v7  ;;  %v5728_v17 = vor.u32 %v6586_v14, %v5727_v13  ;;  %v6558_v7 = vld [vmem:[%s10339_s8 + $0x228] sm:$0xf0]  ;;  %v5867_v8 = vld [vmem:[%s10339_s8 + $0x408] sm:$0xf]  ;;  %v6677_v14 = vld [vmem:[%s10339_s8 + $0x5e0] sm:$0xf0] }
 0x322   :  { %v6091_v13 = vld [vmem:[%s10339_s8 + $0x5c8] sm:$0xf] }
 0x323   :  { %4153 = vmatpush.bf16.msrb.mxu2 %v5892_v20  ;;  %4167 = vmatpush.bf16.msrb.mxu3 %v6116_v21  ;;  %v6523_v20 = vld [vmem:[%s10339_s8 + $0x110] sm:$0xf0]  ;;  %v5980_v21 = vor.u32 %v6649_v41, %v5979_v57  ;;  %v5392_v41 = vor.u32 %v6502_v3, %v5391_v1 }
 0x324   :  { %v5476_v32 = vor.u32 %v6523_v20, %v5475_v19  ;;  %v5587_v19 = vld [vmem:[%s10339_s8 + $0x1d8] sm:$0xf]  ;;  %v6551_v20 = vld [vmem:[%s10339_s8 + $0x1f0] sm:$0xf0] }
 0x325   :  { %4127 = vmatpush.bf16.msrb.mxu0 %v5388_v30  ;;  %4141 = vmatpush.bf16.msrb.mxu1 %v5612_v31  ;;  %v6698_v30 = vld [vmem:[%s10339_s8 + $0x688] sm:$0xf0]  ;;  %v10179_v31 = vld [vmem:[%s10342_s9] sm:$0xff] }
 0x326   :  { %v6176_v39 = vor.u32 %v6698_v30, %v6175_v28  ;;  %v2675_v47 = vperm.slane %v10179_v31, 0  ;;  %v2676_v30 = vperm.slane %v10179_v31, 1 }
 0x327   :  { %4154 = vmatpush.bf16.msrb.mxu2 %v5864_v35  ;;  %4168 = vmatpush.bf16.msrb.mxu3 %v6088_v36  ;;  %v6516_v35 = vld [vmem:[%s10339_s8 + $0xd8] sm:$0xf0] }
 0x328   :  { %v10148_v18 = vpop.f32.mrf.mxu0  ;;  %v3864_v36 = vpop.f32.mrf.mxu1 }
 0x329   :  { %4128 = vmatpush.bf16.msrb.mxu0 %v5360_v48  ;;  %4142 = vmatpush.bf16.msrb.mxu1 %v5584_v49  ;;  %v5448_v48 = vor.u32 %v6516_v35, %v5447_v34  ;;  %v5672_v49 = vor.u32 %v6572_v43, %v5671_v40  ;;  %v6607_v43 = vld [vmem:[%s10339_s8 + $0x3b0] sm:$0xf0] }
 0x32b   :  { %4155 = vmatpush.bf16.msrb.mxu2 %v5836_v60  ;;  %4169 = vmatpush.bf16.msrb.mxu3 %v6060_v4  ;;  %v5643_v60 = vld [vmem:[%s10339_s8 + $0x248] sm:$0xf]  ;;  %v6565_v4 = vld [vmem:[%s10339_s8 + $0x260] sm:$0xf0] }
 0x32c   :  { %4129 = vmatmul.bf16.vlgmr.msrb.gmra.mxu0 %v9308_v25  ;;  %4143 = vmatmul.bf16.vlgmr.msrb.gmra.mxu1 %v9310_v26  ;;  %v5644_v63 = vor.u32 %v6565_v4, %v5643_v60 }
 0x32d   :  { %4177 = vmatpush.bf16.msra.mxu0 %v5560_v50  ;;  %4191 = vmatpush.bf16.msra.mxu1 %v5784_v51  ;;  %v5419_v51 = vld [vmem:[%s10339_s8 + $0x88] sm:$0xf] }
 0x32e   :  { %v5420_v42 = vor.u32 %v6509_v52, %v5419_v51 }
 0x32f   :  { %4156 = vmatpush.bf16.msrb.mxu2 %v5808_v53  ;;  %4170 = vmatpush.bf16.msrb.mxu3 %v6032_v6  ;;  %v6120_v53 = vor.u32 %v6684_v37, %v6119_v62  ;;  %v5615_v6 = vld [vmem:[%s10339_s8 + $0x210] sm:$0xf] }
 0x330   :  { %v10206_v50 = vpop.f32.mrf.mxu0  ;;  %v3866_v57 = vpop.f32.mrf.mxu1  ;;  %v5616_v12 = vor.u32 %v6558_v7, %v5615_v6 }
 0x331   :  { %4178 = vmatpush.bf16.msra.mxu0 %v5532_v5  ;;  %4192 = vmatpush.bf16.msra.mxu1 %v5756_v44  ;;  %v5896_v44 = vor.u32 %v6628_v23, %v5895_v61  ;;  %v3853_v40 = vadd.f32 %v10206_v50, %v2675_v47 }
 0x332   :  { %4157 = vmatmul.bf16.vlgmr.msrb.gmra.mxu2 %v9350_v58  ;;  %4171 = vmatmul.bf16.vlgmr.msrb.gmra.mxu3 %v9352_v59 }
 0x333   :  { %4205 = vmatpush.bf16.msra.mxu2 %v6008_v9  ;;  %4219 = vmatpush.bf16.msra.mxu3 %v6232_v10  ;;  %v3851_v9 = vadd.f32 %v10148_v18, %v2675_v47  ;;  %v6621_v10 = vld [vmem:[%s10339_s8 + $0x420] sm:$0xf0]  ;;  %v6092_v18 = vor.u32 %v6677_v14, %v6091_v13  ;;  %v3867_v50 = vadd.f32 %v3866_v57, %v3853_v40 }
 0x335   :  { %4179 = vmatpush.bf16.msra.mxu0 %v5504_v16  ;;  %4193 = vmatpush.bf16.msra.mxu1 %v5728_v17  ;;  %v3878_v2 = vpop.f32.mrf.mxu2  ;;  %v3892_v5 = vpop.f32.mrf.mxu3  ;;  %v6495_v16 = vld [vmem:[%s10339_s8 + $0x30] sm:$0xf0]  ;;  %v5868_v17 = vor.u32 %v6621_v10, %v5867_v8 }
 0x337   :  { %4206 = vmatpush.bf16.msra.mxu2 %v5980_v21  ;;  %4220 = vmatpush.bf16.msra.mxu3 %v6204_v22  ;;  %v5839_v21 = vld [vmem:[%s10339_s8 + $0x3d0] sm:$0xf]  ;;  %v3865_v22 = vadd.f32 %v3864_v36, %v3851_v9 }
 0x338   :  { %v5840_v36 = vor.u32 %v6614_v56, %v5839_v21 }
 0x339   :  { %4180 = vmatpush.bf16.msra.mxu0 %v5476_v32  ;;  %4194 = vmatpush.bf16.msra.mxu1 %v5700_v33  ;;  %v3906_v24 = vpop.f32.mrf.mxu0  ;;  %v3879_v28 = vadd.f32 %v3878_v2, %v3865_v22  ;;  %v5364_v32 = vor.u32 %v6495_v16, %v5363_v15  ;;  %v5588_v33 = vor.u32 %v6551_v20, %v5587_v19 }
 0x33a   :  { %v3907_v46 = vadd.f32 %v3906_v24, %v2676_v30 }
 0x33b   :  { %4207 = vmatpush.bf16.msra.mxu2 %v5952_v38  ;;  %4221 = vmatpush.bf16.msra.mxu3 %v6176_v39  ;;  %v6064_v38 = vor.u32 %v6670_v27, %v6063_v29  ;;  %v5811_v39 = vld [vmem:[%s10339_s8 + $0x398] sm:$0xf]  ;;  %v3893_v0 = vadd.f32 %v3892_v5, %v3879_v28  ;;  %v2678_v28 = vperm.slane %v10179_v31, 3 }
 0x33c   :  { %v5812_v47 = vor.u32 %v6607_v43, %v5811_v39 }
 0x33d   :  { %4181 = vmatpush.bf16.msra.mxu0 %v5448_v48  ;;  %4195 = vmatpush.bf16.msra.mxu1 %v5672_v49  ;;  %v3880_v34 = vpop.f32.mrf.mxu2  ;;  %v3894_v35 = vpop.f32.mrf.mxu3  ;;  %v6036_v49 = vor.u32 %v6663_v45, %v6035_v11  ;;  %v4233_v51 = vmul.f32 0.5, %v3893_v0 }
 0x33e   :  { %v3920_v48 = vpop.f32.mrf.mxu1 }
 0x33f   :  { %4208 = vmatpush.bf16.msra.mxu2 %v5924_v54  ;;  %4222 = vmatpush.bf16.msra.mxu3 %v6148_v55  ;;  %v3921_v52 = vadd.f32 %v3920_v48, %v3907_v46  ;;  %v3881_v54 = vadd.f32 %v3880_v34, %v3867_v50  ;;  %6717 = vtanh.f32 %v4233_v51 }
 0x341   :  { %4182 = vmatpush.bf16.msra.mxu0 %v5420_v42  ;;  %4196 = vmatpush.bf16.msra.mxu1 %v5644_v63  ;;  %v3908_v55 = vpop.f32.mrf.mxu0  ;;  %v3895_v23 = vadd.f32 %v3894_v35, %v3881_v54 }
 0x342   :  { %v3909_v62 = vadd.f32 %v3908_v55, %v2676_v30 }
 0x343   :  { %4209 = vmatpush.bf16.msra.mxu2 %v5896_v44  ;;  %4223 = vmatpush.bf16.msra.mxu3 %v6120_v53 }
 0x345   :  { %4183 = vmatpush.bf16.msra.mxu0 %v5392_v41  ;;  %4197 = vmatpush.bf16.msra.mxu1 %v5616_v12  ;;  %v3934_v60 = vpop.f32.mrf.mxu2  ;;  %v3948_v4 = vpop.f32.mrf.mxu3 }
 0x346   :  { %v3935_v61 = vadd.f32 %v3934_v60, %v3921_v52  ;;  %v3922_v42 = vpop.f32.mrf.mxu1  ;;  %v6718_v3 = vpop.eup %6717 }
 0x347   :  { %4210 = vmatpush.bf16.msra.mxu2 %v5868_v17  ;;  %4224 = vmatpush.bf16.msra.mxu3 %v6092_v18  ;;  %v3923_v63 = vadd.f32 %v3922_v42, %v3909_v62  ;;  %v4261_v53 = vadd.f32 1.0, %v6718_v3  ;;  %v2677_v17 = vperm.slane %v10179_v31, 2 }
 0x348   :  { %v3949_v37 = vadd.f32 %v3948_v4, %v3935_v61 }
 0x349   :  { %4184 = vmatpush.bf16.msra.mxu0 %v5364_v32  ;;  %4198 = vmatpush.bf16.msra.mxu1 %v5588_v33  ;;  %v4275_v9 = vmul.f32 0.5, %v4261_v53  ;;  %v3962_v10 = vpop.f32.mrf.mxu0 }
 0x34a   :  { %v3963_v22 = vadd.f32 %v3962_v10, %v2677_v17 }
 0x34b   :  { %4211 = vmatpush.bf16.msra.mxu2 %v5840_v36  ;;  %4225 = vmatpush.bf16.msra.mxu3 %v6064_v38 }
 0x34c   :  { %4185 = vmatmul.bf16.vlgmr.msra.gmra.mxu0 %v9308_v25  ;;  %4199 = vmatmul.bf16.vlgmr.msra.gmra.mxu1 %v9310_v26  ;;  %v4234_v25 = vmul.f32 0.5, %v3949_v37  ;;  %v4240_v26 = vmul.f32 0.5, %v3895_v23 }
 0x34d   :  { %v3936_v1 = vpop.f32.mrf.mxu2  ;;  %v3950_v5 = vpop.f32.mrf.mxu3 }
 0x34e   :  { %6719 = vtanh.f32 %v4234_v25  ;;  %v3937_v2 = vadd.f32 %v3936_v1, %v3923_v63  ;;  %v3976_v12 = vpop.f32.mrf.mxu1 }
 0x34f   :  { %4212 = vmatpush.bf16.msra.mxu2 %v5812_v47  ;;  %4226 = vmatpush.bf16.msra.mxu3 %v6036_v49  ;;  %6721 = vtanh.f32 %v4240_v26  ;;  %v3977_v56 = vadd.f32 %v3976_v12, %v3963_v22 }
 0x350   :  { %v3951_v44 = vadd.f32 %v3950_v5, %v3937_v2 }
 0x351   :  { %v3964_v19 = vpop.f32.mrf.mxu0 }
 0x352   :  { %4213 = vmatmul.bf16.vlgmr.msra.gmra.mxu2 %v9350_v58  ;;  %4227 = vmatmul.bf16.vlgmr.msra.gmra.mxu3 %v9352_v59  ;;  %v4241_v7 = vmul.f32 0.5, %v3951_v44  ;;  %v3965_v33 = vadd.f32 %v3964_v19, %v2677_v17 }
 0x354   :  { %v6720_v6 = vpop.eup %6719  ;;  %6723 = vtanh.f32 %v4241_v7 }
 0x355   :  { %v4262_v8 = vadd.f32 1.0, %v6720_v6  ;;  %v6722_v59 = vpop.eup %6721  ;;  %v3990_v20 = vpop.f32.mrf.mxu2 }
 0x356   :  { %v4268_v14 = vadd.f32 1.0, %v6722_v59  ;;  %v4004_v21 = vpop.f32.mrf.mxu3  ;;  %v3978_v24 = vpop.f32.mrf.mxu1  ;;  %v3991_v27 = vadd.f32 %v3990_v20, %v3977_v56 }
 0x357   :  { %v4276_v58 = vmul.f32 0.5, %v4262_v8  ;;  %v3979_v38 = vadd.f32 %v3978_v24, %v3965_v33 }
 0x358   :  { %v4282_v15 = vmul.f32 0.5, %v4268_v14  ;;  %v4005_v34 = vadd.f32 %v4004_v21, %v3991_v27 }
 0x359   :  { %v4289_v13 = vpack.c.bf16 %v4276_v58, %v4275_v9  ;;  %v2679_v58 = vperm.slane %v10179_v31, 4 }
 0x35a   :  { %v6724_v57 = vpop.eup %6723  ;;  %v4235_v39 = vmul.f32 0.5, %v4005_v34 }
 0x35b   :  { %4297 = vst [vmem:[%s10343_s11] sm:$0xff] %v4289_v13  ;;  %v4269_v41 = vadd.f32 1.0, %v6724_v57 }
 0x35c   :  { %6725 = vtanh.f32 %v4235_v39 }
 0x35d   :  { %v4283_v16 = vmul.f32 0.5, %v4269_v41  ;;  %v3992_v30 = vpop.f32.mrf.mxu2 }
 0x35e   :  { %v4006_v32 = vpop.f32.mrf.mxu3  ;;  %v3993_v40 = vadd.f32 %v3992_v30, %v3979_v38 }
 0x35f   :  { %v4293_v18 = vpack.c.bf16 %v4283_v16, %v4282_v15  ;;  %v2680_v16 = vperm.slane %v10179_v31, 5 }
 0x360   :  { %v4007_v48 = vadd.f32 %v4006_v32, %v3993_v40 }
 0x361   :  { %4301 = vst [vmem:[%s10343_s11 + $0x1c] sm:$0xff] %v4293_v18 }
 0x362   :  { %v4242_v52 = vmul.f32 0.5, %v4007_v48  ;;  %v6726_v60 = vpop.eup %6725 }
 0x363   :  { %v4263_v62 = vadd.f32 1.0, %v6726_v60 }
 0x365   :  { %v4277_v26 = vmul.f32 0.5, %v4263_v62 }
 0x369   :  { %v4018_v29 = vpop.f32.mrf.mxu0  ;;  %v4032_v36 = vpop.f32.mrf.mxu1 }
 0x36a   :  { %v4019_v35 = vadd.f32 %v4018_v29, %v2678_v28 }
 0x36c   :  { %v4033_v43 = vadd.f32 %v4032_v36, %v4019_v35 }
 0x371   :  { %v4020_v11 = vpop.f32.mrf.mxu0  ;;  %v4034_v51 = vpop.f32.mrf.mxu1 }
 0x372   :  { %v4021_v47 = vadd.f32 %v4020_v11, %v2678_v28 }
 0x374   :  { %v4035_v54 = vadd.f32 %v4034_v51, %v4021_v47 }
 0x375   :  { %v4046_v45 = vpop.f32.mrf.mxu2  ;;  %v4060_v0 = vpop.f32.mrf.mxu3 }
 0x376   :  { %v4047_v46 = vadd.f32 %v4046_v45, %v4033_v43 }
 0x378   :  { %v4061_v49 = vadd.f32 %v4060_v0, %v4047_v46 }
 0x37a   :  { %v4236_v50 = vmul.f32 0.5, %v4061_v49 }
 0x37c   :  { %6727 = vtanh.f32 %v4236_v50 }
 0x37d   :  { %v4048_v55 = vpop.f32.mrf.mxu2  ;;  %v4062_v61 = vpop.f32.mrf.mxu3  ;;  %6729 = vtanh.f32 %v4242_v52 }
 0x37e   :  { %v4049_v4 = vadd.f32 %v4048_v55, %v4035_v54 }
 0x380   :  { %v4063_v23 = vadd.f32 %v4062_v61, %v4049_v4 }
 0x382   :  { %v6728_v37 = vpop.eup %6727  ;;  %v4243_v25 = vmul.f32 0.5, %v4063_v23  ;;  %v2681_v23 = vperm.slane %v10179_v31, 6 }
 0x383   :  { %v4264_v42 = vadd.f32 1.0, %v6728_v37  ;;  %v6730_v1 = vpop.eup %6729 }
 0x384   :  { %6731 = vtanh.f32 %v4243_v25  ;;  %v4270_v2 = vadd.f32 1.0, %v6730_v1 }
 0x385   :  { %v4278_v63 = vmul.f32 0.5, %v4264_v42 }
 0x386   :  { %v4284_v53 = vmul.f32 0.5, %v4270_v2 }
 0x387   :  { %v4290_v3 = vpack.c.bf16 %v4278_v63, %v4277_v26 }
 0x389   :  { %4298 = vst [vmem:[%s10343_s11 + $0x8] sm:$0xff] %v4290_v3  ;;  %v4074_v8 = vpop.f32.mrf.mxu0  ;;  %v4088_v9 = vpop.f32.mrf.mxu1 }
 0x38a   :  { %v6732_v5 = vpop.eup %6731  ;;  %v4075_v14 = vadd.f32 %v4074_v8, %v2679_v58 }
 0x38b   :  { %v4271_v44 = vadd.f32 1.0, %v6732_v5 }
 0x38c   :  { %v4089_v41 = vadd.f32 %v4088_v9, %v4075_v14 }
 0x38d   :  { %v4285_v6 = vmul.f32 0.5, %v4271_v44 }
 0x38f   :  { %v4294_v7 = vpack.c.bf16 %v4285_v6, %v4284_v53 }
 0x391   :  { %4302 = vst [vmem:[%s10343_s11 + $0x24] sm:$0xff] %v4294_v7  ;;  %v4076_v10 = vpop.f32.mrf.mxu0  ;;  %v4090_v57 = vpop.f32.mrf.mxu1 }
 0x392   :  { %v4077_v19 = vadd.f32 %v4076_v10, %v2679_v58 }
 0x394   :  { %v4091_v24 = vadd.f32 %v4090_v57, %v4077_v19 }
 0x395   :  { %v4102_v59 = vpop.f32.mrf.mxu2  ;;  %v4116_v13 = vpop.f32.mrf.mxu3 }
 0x396   :  { %v4103_v15 = vadd.f32 %v4102_v59, %v4089_v41 }
 0x398   :  { %v4117_v20 = vadd.f32 %v4116_v13, %v4103_v15 }
 0x39a   :  { %v4237_v56 = vmul.f32 0.5, %v4117_v20 }
 0x39c   :  { %6733 = vtanh.f32 %v4237_v56 }
 0x39d   :  { %v4104_v17 = vpop.f32.mrf.mxu2  ;;  %v4118_v18 = vpop.f32.mrf.mxu3 }
 0x39e   :  { %v4105_v29 = vadd.f32 %v4104_v17, %v4091_v24 }
 0x3a0   :  { %v4119_v34 = vadd.f32 %v4118_v18, %v4105_v29 }
 0x3a2   :  { %v4244_v40 = vmul.f32 0.5, %v4119_v34  ;;  %v6734_v45 = vpop.eup %6733 }
 0x3a3   :  { %v4265_v47 = vadd.f32 1.0, %v6734_v45 }
 0x3a5   :  { %v4279_v52 = vmul.f32 0.5, %v4265_v47 }
 0x3a9   :  { %v4130_v12 = vpop.f32.mrf.mxu0  ;;  %v4144_v22 = vpop.f32.mrf.mxu1 }
 0x3aa   :  { %v4131_v21 = vadd.f32 %v4130_v12, %v2680_v16 }
 0x3ac   :  { %v4145_v27 = vadd.f32 %v4144_v22, %v4131_v21 }
 0x3b1   :  { %v4132_v28 = vpop.f32.mrf.mxu0  ;;  %v4146_v39 = vpop.f32.mrf.mxu1 }
 0x3b2   :  { %v4133_v35 = vadd.f32 %v4132_v28, %v2680_v16 }
 0x3b4   :  { %v4147_v43 = vadd.f32 %v4146_v39, %v4133_v35 }
 0x3b5   :  { %v4158_v30 = vpop.f32.mrf.mxu2  ;;  %v4172_v32 = vpop.f32.mrf.mxu3 }
 0x3b6   :  { %v4159_v33 = vadd.f32 %v4158_v30, %v4145_v27 }
 0x3b8   :  { %v4173_v36 = vadd.f32 %v4172_v32, %v4159_v33 }
 0x3ba   :  { %v4238_v38 = vmul.f32 0.5, %v4173_v36 }
 0x3bc   :  { %6735 = vtanh.f32 %v4238_v38 }
 0x3bd   :  { %v4160_v11 = vpop.f32.mrf.mxu2  ;;  %v4174_v46 = vpop.f32.mrf.mxu3  ;;  %6737 = vtanh.f32 %v4244_v40 }
 0x3be   :  { %v4161_v0 = vadd.f32 %v4160_v11, %v4147_v43 }
 0x3c0   :  { %v4175_v48 = vadd.f32 %v4174_v46, %v4161_v0 }
 0x3c2   :  { %v6736_v49 = vpop.eup %6735  ;;  %v4245_v50 = vmul.f32 0.5, %v4175_v48 }
 0x3c3   :  { %v4266_v51 = vadd.f32 1.0, %v6736_v49  ;;  %v6738_v55 = vpop.eup %6737 }
 0x3c4   :  { %6739 = vtanh.f32 %v4245_v50  ;;  %v4272_v61 = vadd.f32 1.0, %v6738_v55 }
 0x3c5   :  { %v4280_v54 = vmul.f32 0.5, %v4266_v51 }
 0x3c6   :  { %v4286_v25 = vmul.f32 0.5, %v4272_v61 }
 0x3c7   :  { %v4291_v60 = vpack.c.bf16 %v4280_v54, %v4279_v52 }
 0x3c9   :  { %v4186_v4 = vpop.f32.mrf.mxu0  ;;  %4299 = vst [vmem:[%s10343_s11 + $0x10] sm:$0xff] %v4291_v60  ;;  %v4200_v63 = vpop.f32.mrf.mxu1 }
 0x3ca   :  { %v6740_v62 = vpop.eup %6739  ;;  %v4187_v26 = vadd.f32 %v4186_v4, %v2681_v23 }
 0x3cb   :  { %v4273_v37 = vadd.f32 1.0, %v6740_v62 }
 0x3cc   :  { %v4201_v3 = vadd.f32 %v4200_v63, %v4187_v26 }
 0x3cd   :  { %v4287_v42 = vmul.f32 0.5, %v4273_v37 }
 0x3cf   :  { %v4295_v1 = vpack.c.bf16 %v4287_v42, %v4286_v25 }
 0x3d1   :  { %4303 = vst [vmem:[%s10343_s11 + $0x2c] sm:$0xff] %v4295_v1  ;;  %v4188_v2 = vpop.f32.mrf.mxu0  ;;  %v4202_v31 = vpop.f32.mrf.mxu1 }
 0x3d2   :  { %v4189_v6 = vadd.f32 %v4188_v2, %v2681_v23 }
 0x3d4   :  { %v4203_v9 = vadd.f32 %v4202_v31, %v4189_v6 }
 0x3d5   :  { %v4214_v5 = vpop.f32.mrf.mxu2  ;;  %v4228_v44 = vpop.f32.mrf.mxu3 }
 0x3d6   :  { %v4215_v53 = vadd.f32 %v4214_v5, %v4201_v3 }
 0x3d8   :  { %v4229_v7 = vadd.f32 %v4228_v44, %v4215_v53 }
 0x3da   :  { %v4239_v8 = vmul.f32 0.5, %v4229_v7 }
 0x3dc   :  { %6741 = vtanh.f32 %v4239_v8 }
 0x3dd   :  { %v4216_v58 = vpop.f32.mrf.mxu2  ;;  %v4230_v59 = vpop.f32.mrf.mxu3 }
 0x3de   :  { %v4217_v10 = vadd.f32 %v4216_v58, %v4203_v9 }
 0x3e0   :  { %v4231_v13 = vadd.f32 %v4230_v59, %v4217_v10 }
 0x3e2   :  { %v6742_v14 = vpop.eup %6741  ;;  %v4246_v57 = vmul.f32 0.5, %v4231_v13 }
 0x3e3   :  { %v4267_v41 = vadd.f32 1.0, %v6742_v14 }
 0x3e4   :  { %6743 = vtanh.f32 %v4246_v57 }
 0x3e5   :  { %v4281_v12 = vmul.f32 0.5, %v4267_v41 }
 0x3e7   :  { %v4292_v15 = vpack.c.bf16 %v4281_v12, %v4281_v12 }
 0x3e9   :  { %4300 = vst [vmem:[%s10343_s11 + $0x18] sm:$0xf] %v4292_v15 }
 0x3ea   :  { %v6744_v16 = vpop.eup %6743 }
 0x3eb   :  { %v4274_v17 = vadd.f32 1.0, %v6744_v16 }
 0x3ed   :  { %v4288_v18 = vmul.f32 0.5, %v4274_v17 }
 0x3ef   :  { %v4296_v19 = vpack.c.bf16 %v4288_v18, %v4288_v18 }
 0x3f1   :  { %4304 = vst [vmem:[%s10343_s11 + $0x34] sm:$0xf] %v4296_v19 }

</bundles_post_ra>
